<compile_context>
chip_gen: v6e
topology: v6e:2x2x1
jax: 0.10.0
libtpu: 0.0.40
codegen_flags: <defaults>
</compile_context>

<pallas_src>
import functools

import jax
import jax.numpy as jnp
from jax.experimental import pallas as pl
from jax.experimental.pallas import tpu as pltpu


def _ceil_to(a, b):
    return (a + b - 1) // b * b


def _vmem_limit_bytes():
    """~112 MiB on v5e/v6e (128 MiB physical VMEM), ~48 MiB on v7x (64 MiB)."""
    cap = 64 * 1024 * 1024
    try:
        info = pltpu.get_tpu_info()
        cap = int(getattr(info, "vmem_capacity_bytes", cap))
    except Exception:
        pass
    return int(min(max(cap - 16 * 1024 * 1024, 48 * 1024 * 1024),
                   112 * 1024 * 1024))


# ---------------------------------------------------------------------------
# Kernel 1: row L2-normalization of the concatenated embedding matrix.
# ---------------------------------------------------------------------------
def _normalize_kernel(x_ref, xn_ref):
    x = x_ref[...]                                             # (TILE, D_pad) f32
    nrm = jnp.sqrt(jnp.sum(x * x, axis=1, keepdims=True))
    # Guard exactly-zero rows (only zero-padded rows hit this; a genuinely
    # all-zero input row would be NaN in the torch reference too).
    nrm = jnp.where(nrm == 0.0, 1.0, nrm)
    xn_ref[...] = (x / nrm).astype(xn_ref.dtype)               # bf16 store


# ---------------------------------------------------------------------------
# Kernel 2 (pass 1): row-sums of W = exp(clamp(Xn Xn^T)/0.5), W never stored.
# ---------------------------------------------------------------------------
def _rowsum_kernel(xr_ref, xc_ref, rs_ref, *, M, M_pad, TILE):
    i = pl.program_id(0)
    j = pl.program_id(1)

    w = jax.lax.dot_general(
        xr_ref[...], xc_ref[...],
        dimension_numbers=(((1,), (1,)), ((), ())),
        preferred_element_type=jnp.float32)                    # (TILE, TILE) f32
    w = jnp.exp(jnp.maximum(w, 0.0) * 2.0)                     # exp(W / 0.5)

    ii = jax.lax.broadcasted_iota(jnp.int32, (TILE, TILE), 0)
    jj = jax.lax.broadcasted_iota(jnp.int32, (TILE, TILE), 1)
    # Masks folded into the local value (no VMEM store/reload round-trips):
    # exclude the diagonal of W from the row-sum.
    w = jnp.where(jnp.logical_and(i == j, ii == jj), 0.0, w)
    if M_pad != M:
        # Zero-padded xn rows give exp(0) = 1; mask padded columns (they only
        # exist in the last column tile).
        last = pl.num_programs(1) - 1
        w = jnp.where(jnp.logical_and(j == last, jj + j * TILE >= M), 0.0, w)

    @pl.when(j == 0)
    def _():
        rs_ref[...] = jnp.zeros_like(rs_ref)

    rs_ref[...] += jnp.sum(w, axis=1, keepdims=True)


# ---------------------------------------------------------------------------
# Kernel 3 (pass 2): B = I - alpha * D W D, gram tile recomputed, single store.
# ---------------------------------------------------------------------------
def _b_kernel(xr_ref, xc_ref, dcol_ref, drow_ref, b_ref, *, alpha, TILE):
    i = pl.program_id(0)
    j = pl.program_id(1)

    w = jax.lax.dot_general(
        xr_ref[...], xc_ref[...],
        dimension_numbers=(((1,), (1,)), ((), ())),
        preferred_element_type=jnp.float32)
    w = jnp.exp(jnp.maximum(w, 0.0) * 2.0)

    b = (-alpha) * (dcol_ref[...] * w * drow_ref[...])         # -alpha * D W D
    ii = jax.lax.broadcasted_iota(jnp.int32, (TILE, TILE), 0)
    jj = jax.lax.broadcasted_iota(jnp.int32, (TILE, TILE), 1)
    # Diagonal of B is exactly 1 (W_ii is zeroed in the reference, so
    # B_ii = 1 - alpha * d_i * 0 * d_i).  Padded rows/cols are sliced off
    # before the solve, so no padding masks are needed here.
    b_ref[...] = jnp.where(jnp.logical_and(i == j, ii == jj), 1.0, b)


# ---------------------------------------------------------------------------
# Kernel 4: loss, tiled over row panels of A[:N]; per-row losses written to a
#           lane-dense (TNR, 128) block so the grid axis is fully parallel.
# ---------------------------------------------------------------------------
def _loss_kernel(an_ref, aps_ref, apx_ref, lbl_ref, out_ref, *,
                 P, lambdaC, mm_dtype):
    An = an_ref[...]                        # (TNR,  M_pad) f32
    Ap_s = aps_ref[...]                     # (P_pad, M_pad) pre-normalized
    A_px = apx_ref[...]                     # (TNR,  P_pad) f32
    labels = lbl_ref[...]                   # (TNR, 1) int32
    TNR = An.shape[0]
    P_pad = A_px.shape[1]

    eps = 1e-8
    # Fold the cosine denominator of A[i] into a per-row scaling (no (N,P)
    # divide); Ap's normalization is hoisted out of the kernel entirely.
    inv_n = 1.0 / jnp.maximum(jnp.sqrt(jnp.sum(An * An, axis=1, keepdims=True)), eps)
    An_s = (An * inv_n).astype(mm_dtype)
    cos = jax.lax.dot_general(
        An_s, Ap_s, dimension_numbers=(((1,), (1,)), ((), ())),
        preferred_element_type=jnp.float32)                    # (TNR, P_pad)

    jj = jax.lax.broadcasted_iota(jnp.int32, (TNR, P_pad), 1)
    onehot = jj == labels                                      # (TNR, P_pad)
    valid = jj < P            # padded An / A_px rows are all-zero -> contribute 0
    oh_f = onehot.astype(jnp.float32)

    # context term: cos(A[i], A_p[j]) - cos(A[i], A_p[label_i]), j != label, > 0
    dist_pos = jnp.sum(cos * oh_f, axis=1, keepdims=True)
    val_ctx = cos - dist_pos
    ctx_mask = jnp.logical_not(onehot) & valid & (val_ctx > 0.0)
    sum_ctx = jnp.sum(jnp.where(ctx_mask, jnp.exp(val_ctx), 0.0),
                      axis=1, keepdims=True)                   # (TNR, 1)

    # intrinsic term: A[i, N+j] - A[i, N+label_i], j != label, > 0
    pos_intr = jnp.sum(A_px * oh_f, axis=1, keepdims=True)
    val_intr = A_px - pos_intr
    intr_mask = jnp.logical_not(onehot) & valid & (val_intr > 0.0)
    sum_intr = jnp.sum(jnp.where(intr_mask, jnp.exp(val_intr), 0.0),
                       axis=1, keepdims=True)                  # (TNR, 1)

    per_row = jnp.log(1.0 + sum_intr) + lambdaC * jnp.log(1.0 + sum_ctx)
    # Lane-dense unmasked store; padded rows are exactly zero by construction.
    out_ref[...] = jnp.broadcast_to(per_row, (TNR, 128))


# ---------------------------------------------------------------------------
# Wrapper
# ---------------------------------------------------------------------------
def manifold_loss(fvec, labels, proxies, *, alpha=0.5, lambdaC=1.0,
                  matmul_dtype=jnp.bfloat16, loss_matmul_dtype=jnp.float32):
    """JAX/Pallas port of OriginalImplementationManifoldLoss.forward (fvecs_add=None).

    matmul_dtype:      MXU input dtype for the two gram passes (f32 accumulation
                       always); bf16 default for MXU throughput, set f32 for
                       bit-level parity with the PyTorch reference.
    loss_matmul_dtype: MXU input dtype for the loss cosine matmul; kept f32 by
                       default because bf16 can flip borderline `> 0` margin
                       masks relative to the f32 torch reference.
    """
    fvec = fvec.astype(jnp.float32)
    proxies = proxies.astype(jnp.float32)
    N, D = fvec.shape
    P = proxies.shape[0]
    M = N + P

    # self.proxy = proxies / proxies.norm(p=2)   (Frobenius norm, scalar)
    proxy = proxies / jnp.linalg.norm(proxies)
    x = jnp.concatenate([fvec, proxy], axis=0)                 # (M, D)

    # ---- lane/sublane-dense padding (128-multiples) -----------------------
    M_pad = _ceil_to(M, 128)
    D_pad = _ceil_to(D, 128)
    vmem_limit = _vmem_limit_bytes()
    if M_pad % 512 == 0 and vmem_limit >= 96 * 1024 * 1024:    # v5e/v6e: big tiles
        TILE = 512
    elif M_pad % 256 == 0:
        TILE = 256
    else:
        TILE = 128
    n_tiles = M_pad // TILE
    x_p = jnp.pad(x, ((0, M_pad - M), (0, D_pad - D)))

    # Kernel 1: row-normalize; written directly in the gram matmul dtype.
    xn = pl.pallas_call(
        _normalize_kernel,
        out_shape=jax.ShapeDtypeStruct((M_pad, D_pad), matmul_dtype),
        grid=(n_tiles,),
        in_specs=[pl.BlockSpec((TILE, D_pad), lambda i: (i, 0))],
        out_specs=pl.BlockSpec((TILE, D_pad), lambda i: (i, 0)),
        compiler_params=pltpu.CompilerParams(
            dimension_semantics=("parallel",), vmem_limit_bytes=vmem_limit),
    )(x_p)

    # Kernel 2 (pass 1): rs = rowsum(W) without materializing W in HBM.
    rs = pl.pallas_call(
        functools.partial(_rowsum_kernel, M=M, M_pad=M_pad, TILE=TILE),
        out_shape=jax.ShapeDtypeStruct((M_pad, 1), jnp.float32),
        grid=(n_tiles, n_tiles),
        in_specs=[pl.BlockSpec((TILE, D_pad), lambda i, j: (i, 0)),
                  pl.BlockSpec((TILE, D_pad), lambda i, j: (j, 0))],
        out_specs=pl.BlockSpec((TILE, 1), lambda i, j: (i, 0)),
        compiler_params=pltpu.CompilerParams(
            dimension_semantics=("parallel", "arbitrary"),
            vmem_limit_bytes=vmem_limit),
    )(xn, xn)

    # D = diag(rowsum(W)^-0.5), inf -> 0.  W is symmetric, so one row-sum pass
    # suffices; the column-side scale is the transposed (M,1) vector.
    d_col = jnp.where(rs > 0.0, jax.lax.rsqrt(rs), 0.0)        # (M_pad, 1)
    d_row = d_col.reshape(1, M_pad)                            # (1, M_pad)

    # Kernel 3 (pass 2): B = I - alpha * D W D, recomputing the gram tiles
    # (HBM-write-bound for modest D, so the duplicated matmul is free).
    B = pl.pallas_call(
        functools.partial(_b_kernel, alpha=float(alpha), TILE=TILE),
        out_shape=jax.ShapeDtypeStruct((M_pad, M_pad), jnp.float32),
        grid=(n_tiles, n_tiles),
        in_specs=[pl.BlockSpec((TILE, D_pad), lambda i, j: (i, 0)),
                  pl.BlockSpec((TILE, D_pad), lambda i, j: (j, 0)),
                  pl.BlockSpec((TILE, 1), lambda i, j: (i, 0)),
                  pl.BlockSpec((1, TILE), lambda i, j: (0, j))],
        out_specs=pl.BlockSpec((TILE, TILE), lambda i, j: (i, j)),
        compiler_params=pltpu.CompilerParams(
            dimension_semantics=("parallel", "parallel"),
            vmem_limit_bytes=vmem_limit),
    )(xn, xn, d_col, d_row)

    # A = (1-alpha) * inv(I - alpha*S) on the UNPADDED M x M system.
    # I - alpha*S is SPD for 0 < alpha < 1 (the normalized affinity D W D has
    # spectral radius <= 1), so a Cholesky solve (~2x fewer flops than LU, and
    # (M_pad/M)^3-x less work than the padded system) replaces torch.inverse.
    # TODO(synk): no dense-factorization Pallas TPU primitive; done via XLA.
    Bm = B[:M, :M]
    rhs = (1.0 - alpha) * jnp.eye(M, dtype=jnp.float32)
    A = jax.scipy.linalg.cho_solve(jax.scipy.linalg.cho_factor(Bm), rhs)  # (M, M)

    # ---- pre-sliced, lane-aligned loss-kernel inputs (XLA glue) ------------
    N_pad = _ceil_to(N, 128)
    P_pad = _ceil_to(P, 128)
    TNR = 256 if N_pad % 256 == 0 else 128
    n_panels = N_pad // TNR

    eps = 1e-8
    Ap = A[N:N + P, :]
    # Ap normalization hoisted out of the loss kernel (it is grid-invariant).
    Ap_s = Ap / jnp.maximum(jnp.sqrt(jnp.sum(Ap * Ap, axis=1, keepdims=True)), eps)
    Ap_s = jnp.pad(Ap_s, ((0, P_pad - P), (0, M_pad - M))).astype(loss_matmul_dtype)

    An = jnp.pad(A[:N, :], ((0, N_pad - N), (0, M_pad - M)))              # (N_pad, M_pad)
    A_px = jnp.pad(A[:N, N:N + P], ((0, N_pad - N), (0, P_pad - P)))      # (N_pad, P_pad)
    lbl = jnp.pad(labels.astype(jnp.int32).reshape(N, 1),
                  ((0, N_pad - N), (0, 0)))                               # (N_pad, 1)

    # Kernel 4: the double loop over (i, j) as tiled masked reductions; the
    # grid axis is parallel (per-row outputs), reduced in XLA afterwards.
    # TODO(synk): for very large P*M_pad the grid-invariant Ap_s block should be
    # tiled over the proxy axis and accumulated in VMEM scratch.
    per_row = pl.pallas_call(
        functools.partial(_loss_kernel, P=P, lambdaC=float(lambdaC),
                          mm_dtype=loss_matmul_dtype),
        out_shape=jax.ShapeDtypeStruct((N_pad, 128), jnp.float32),
        grid=(n_panels,),
        in_specs=[pl.BlockSpec((TNR, M_pad), lambda i: (i, 0)),
                  pl.BlockSpec((P_pad, M_pad), lambda i: (0, 0),
                               pipeline_mode=pl.Buffered(1)),   # grid-invariant
                  pl.BlockSpec((TNR, P_pad), lambda i: (i, 0)),
                  pl.BlockSpec((TNR, 1), lambda i: (i, 0))],
        out_specs=pl.BlockSpec((TNR, 128), lambda i: (i, 0)),
        compiler_params=pltpu.CompilerParams(
            dimension_semantics=("parallel",),
            vmem_limit_bytes=vmem_limit),
    )(An, Ap_s, A_px, lbl)

    loss = jnp.sum(per_row[:N, 0]) / N
    return loss.reshape(1)   # matches torch output shape (1,)


if __name__ == "__main__":
    key = jax.random.PRNGKey(0)
    k1, k2, k3 = jax.random.split(key, 3)

    N, D, P = 8, 32, 4          # batch, embedding dim, number of proxies/classes
    fvec = jax.random.normal(k1, (N, D), dtype=jnp.float32)
    proxies = jax.random.normal(k2, (P, D), dtype=jnp.float32)
    labels = jax.random.randint(k3, (N,), 0, P)

    loss_fn = jax.jit(functools.partial(manifold_loss, alpha=0.5, lambdaC=1.0))
    out = loss_fn(fvec, labels, proxies)
    jax.block_until_ready(out)
    print("KERNEL_OK")
</pallas_src>

<mosaic_0001>
module attributes {stable_mosaic.version = 11 : i64} {
  func.func @_normalize_kernel(%arg0: i32, %arg1: memref<128x128xf32, #tpu.memory_space<vmem>>, %arg2: memref<128x128xbf16, #tpu.memory_space<vmem>>) attributes {dimension_semantics = [#tpu.dimension_semantics<parallel>], iteration_bounds = array<i64: 1>, scalar_prefetch = 0 : i64, scratch_operands = 0 : i64, tpu.core_type = #tpu.core_type<tc>, window_params = [{transform_indices = @transform_0, window_bounds = array<i64: 128, 128>}, {transform_indices = @transform_1, window_bounds = array<i64: 128, 128>}]} {
    %c0 = arith.constant 0 : index
    %c0_0 = arith.constant 0 : index
    %0 = vector.load %arg1[%c0, %c0_0] : memref<128x128xf32, #tpu.memory_space<vmem>>, vector<128x128xf32>
    %1 = arith.mulf %0, %0 : vector<128x128xf32>
    %cst = arith.constant dense<0.000000e+00> : vector<128xf32>
    %2 = vector.multi_reduction <add>, %1, %cst [1] : vector<128x128xf32> to vector<128xf32>
    %3 = vector.shape_cast %2 : vector<128xf32> to vector<128x1xf32>
    %4 = math.sqrt %3 : vector<128x1xf32>
    %cst_1 = arith.constant 0.000000e+00 : f32
    %5 = vector.broadcast %cst_1 : f32 to vector<128x1xf32>
    %6 = arith.cmpf oeq, %4, %5 : vector<128x1xf32>
    %cst_2 = arith.constant 1.000000e+00 : f32
    %7 = vector.broadcast %cst_2 : f32 to vector<128x1xf32>
    %8 = arith.select %6, %7, %4 : vector<128x1xi1>, vector<128x1xf32>
    %9 = vector.broadcast %8 : vector<128x1xf32> to vector<128x128xf32>
    %10 = arith.divf %0, %9 : vector<128x128xf32>
    %11 = arith.truncf %10 : vector<128x128xf32> to vector<128x128xbf16>
    %c0_3 = arith.constant 0 : index
    %c0_4 = arith.constant 0 : index
    %12 = vector.load %arg2[%c0_3, %c0_4] : memref<128x128xbf16, #tpu.memory_space<vmem>>, vector<128x128xbf16>
    tpu.vector_store %arg2[%c0_3, %c0_4], %11 {strides = array<i32>} : memref<128x128xbf16, #tpu.memory_space<vmem>>, vector<128x128xbf16>,
    return
  }
  func.func @transform_0(%arg0: i32) -> (i32, i32) {
    %c0_i32 = arith.constant 0 : i32
    %c0_i32_0 = arith.constant 0 : i32
    return %arg0, %c0_i32 : i32, i32
  }
  func.func @transform_1(%arg0: i32) -> (i32, i32) {
    %c0_i32 = arith.constant 0 : i32
    %c0_i32_0 = arith.constant 0 : i32
    return %arg0, %c0_i32 : i32, i32
  }
}

module attributes {stable_mosaic.version = 11 : i64} {
  func.func @_b_kernel(%arg0: i32, %arg1: i32, %arg2: memref<128x128xbf16, #tpu.memory_space<vmem>>, %arg3: memref<128x128xbf16, #tpu.memory_space<vmem>>, %arg4: memref<128x1xf32, #tpu.memory_space<vmem>>, %arg5: memref<1x128xf32, #tpu.memory_space<vmem>>, %arg6: memref<128x128xf32, #tpu.memory_space<vmem>>) attributes {dimension_semantics = [#tpu.dimension_semantics<parallel>, #tpu.dimension_semantics<parallel>], iteration_bounds = array<i64: 1, 1>, scalar_prefetch = 0 : i64, scratch_operands = 0 : i64, tpu.core_type = #tpu.core_type<tc>, window_params = [{transform_indices = @transform_0, window_bounds = array<i64: 128, 128>}, {transform_indices = @transform_1, window_bounds = array<i64: 128, 128>}, {transform_indices = @transform_2, window_bounds = array<i64: 128, 1>}, {transform_indices = @transform_3, window_bounds = array<i64: 1, 128>}, {transform_indices = @transform_4, window_bounds = array<i64: 128, 128>}]} {
    %c0 = arith.constant 0 : index
    %c0_0 = arith.constant 0 : index
    %0 = vector.load %arg2[%c0, %c0_0] : memref<128x128xbf16, #tpu.memory_space<vmem>>, vector<128x128xbf16>
    %c0_1 = arith.constant 0 : index
    %c0_2 = arith.constant 0 : index
    %1 = vector.load %arg3[%c0_1, %c0_2] : memref<128x128xbf16, #tpu.memory_space<vmem>>, vector<128x128xbf16>
    %cst = arith.constant dense<0.000000e+00> : vector<128x128xf32>
    %2 = tpu.matmul %0, %1, %cst {dimension_numbers = #tpu.dot_dimension_numbers<[1], [1], [0], [0], [0, 0, 1, 0], [], []>} : vector<128x128xbf16>, vector<128x128xbf16>, vector<128x128xf32> -> vector<128x128xf32>
    %cst_3 = arith.constant 0.000000e+00 : f32
    %3 = vector.broadcast %cst_3 : f32 to vector<128x128xf32>
    %4 = arith.maximumf %2, %3 : vector<128x128xf32>
    %cst_4 = arith.constant 2.000000e+00 : f32
    %5 = vector.broadcast %cst_4 : f32 to vector<128x128xf32>
    %6 = arith.mulf %4, %5 : vector<128x128xf32>
    %7 = math.exp %6 : vector<128x128xf32>
    %c0_5 = arith.constant 0 : index
    %c0_6 = arith.constant 0 : index
    %8 = vector.load %arg4[%c0_5, %c0_6] : memref<128x1xf32, #tpu.memory_space<vmem>>, vector<128x1xf32>
    %9 = vector.broadcast %8 : vector<128x1xf32> to vector<128x128xf32>
    %10 = arith.mulf %9, %7 : vector<128x128xf32>
    %c0_7 = arith.constant 0 : index
    %c0_8 = arith.constant 0 : index
    %11 = vector.load %arg5[%c0_7, %c0_8] : memref<1x128xf32, #tpu.memory_space<vmem>>, vector<1x128xf32>
    %12 = vector.broadcast %11 : vector<1x128xf32> to vector<128x128xf32>
    %13 = arith.mulf %10, %12 : vector<128x128xf32>
    %cst_9 = arith.constant -5.000000e-01 : f32
    %14 = vector.broadcast %cst_9 : f32 to vector<128x128xf32>
    %15 = arith.mulf %14, %13 : vector<128x128xf32>
    %16 = tpu.iota {dimensions = array<i32: 0>} : vector<128x128xi32>
    %17 = tpu.iota {dimensions = array<i32: 1>} : vector<128x128xi32>
    %18 = arith.cmpi eq, %arg0, %arg1 : i32
    %19 = arith.cmpi eq, %16, %17 : vector<128x128xi32>
    %20 = vector.broadcast %18 : i1 to vector<128x128xi1>
    %21 = arith.andi %20, %19 : vector<128x128xi1>
    %cst_10 = arith.constant 1.000000e+00 : f32
    %22 = vector.broadcast %cst_10 : f32 to vector<128x128xf32>
    %23 = arith.select %21, %22, %15 : vector<128x128xi1>, vector<128x128xf32>
    %c0_11 = arith.constant 0 : index
    %c0_12 = arith.constant 0 : index
    %24 = vector.load %arg6[%c0_11, %c0_12] : memref<128x128xf32, #tpu.memory_space<vmem>>, vector<128x128xf32>
    tpu.vector_store %arg6[%c0_11, %c0_12], %23 {strides = array<i32>} : memref<128x128xf32, #tpu.memory_space<vmem>>, vector<128x128xf32>,
    return
  }
  func.func @transform_0(%arg0: i32, %arg1: i32) -> (i32, i32) {
    %c0_i32 = arith.constant 0 : i32
    %c0_i32_0 = arith.constant 0 : i32
    return %arg0, %c0_i32 : i32, i32
  }
  func.func @transform_1(%arg0: i32, %arg1: i32) -> (i32, i32) {
    %c0_i32 = arith.constant 0 : i32
    %c0_i32_0 = arith.constant 0 : i32
    return %arg1, %c0_i32 : i32, i32
  }
  func.func @transform_2(%arg0: i32, %arg1: i32) -> (i32, i32) {
    %c0_i32 = arith.constant 0 : i32
    %c0_i32_0 = arith.constant 0 : i32
    return %arg0, %c0_i32 : i32, i32
  }
  func.func @transform_3(%arg0: i32, %arg1: i32) -> (i32, i32) {
    %c0_i32 = arith.constant 0 : i32
    %c0_i32_0 = arith.constant 0 : i32
    return %c0_i32, %arg1 : i32, i32
  }
  func.func @transform_4(%arg0: i32, %arg1: i32) -> (i32, i32) {
    %c0_i32 = arith.constant 0 : i32
    return %arg0, %arg1 : i32, i32
  }
}

module attributes {stable_mosaic.version = 11 : i64} {
  func.func @_rowsum_kernel(%arg0: i32, %arg1: i32, %arg2: memref<128x128xbf16, #tpu.memory_space<vmem>>, %arg3: memref<128x128xbf16, #tpu.memory_space<vmem>>, %arg4: memref<128x1xf32, #tpu.memory_space<vmem>>) attributes {dimension_semantics = [#tpu.dimension_semantics<parallel>, #tpu.dimension_semantics<arbitrary>], iteration_bounds = array<i64: 1, 1>, scalar_prefetch = 0 : i64, scratch_operands = 0 : i64, tpu.core_type = #tpu.core_type<tc>, window_params = [{transform_indices = @transform_0, window_bounds = array<i64: 128, 128>}, {transform_indices = @transform_1, window_bounds = array<i64: 128, 128>}, {transform_indices = @transform_2, window_bounds = array<i64: 128, 1>}]} {
    %c0 = arith.constant 0 : index
    %c0_0 = arith.constant 0 : index
    %0 = vector.load %arg2[%c0, %c0_0] : memref<128x128xbf16, #tpu.memory_space<vmem>>, vector<128x128xbf16>
    %c0_1 = arith.constant 0 : index
    %c0_2 = arith.constant 0 : index
    %1 = vector.load %arg3[%c0_1, %c0_2] : memref<128x128xbf16, #tpu.memory_space<vmem>>, vector<128x128xbf16>
    %cst = arith.constant dense<0.000000e+00> : vector<128x128xf32>
    %2 = tpu.matmul %0, %1, %cst {dimension_numbers = #tpu.dot_dimension_numbers<[1], [1], [0], [0], [0, 0, 1, 0], [], []>} : vector<128x128xbf16>, vector<128x128xbf16>, vector<128x128xf32> -> vector<128x128xf32>
    %cst_3 = arith.constant 0.000000e+00 : f32
    %3 = vector.broadcast %cst_3 : f32 to vector<128x128xf32>
    %4 = arith.maximumf %2, %3 : vector<128x128xf32>
    %cst_4 = arith.constant 2.000000e+00 : f32
    %5 = vector.broadcast %cst_4 : f32 to vector<128x128xf32>
    %6 = arith.mulf %4, %5 : vector<128x128xf32>
    %7 = math.exp %6 : vector<128x128xf32>
    %8 = tpu.iota {dimensions = array<i32: 0>} : vector<128x128xi32>
    %9 = tpu.iota {dimensions = array<i32: 1>} : vector<128x128xi32>
    %10 = arith.cmpi eq, %arg0, %arg1 : i32
    %11 = arith.cmpi eq, %8, %9 : vector<128x128xi32>
    %12 = vector.broadcast %10 : i1 to vector<128x128xi1>
    %13 = arith.andi %12, %11 : vector<128x128xi1>
    %cst_5 = arith.constant 0.000000e+00 : f32
    %14 = vector.broadcast %cst_5 : f32 to vector<128x128xf32>
    %15 = arith.select %13, %14, %7 : vector<128x128xi1>, vector<128x128xf32>
    %c0_i32 = arith.constant 0 : i32
    %16 = arith.cmpi eq, %arg1, %c0_i32 : i32
    %c128_i32 = arith.constant 128 : i32
    %17 = arith.muli %arg1, %c128_i32 : i32
    %18 = vector.broadcast %17 : i32 to vector<128x128xi32>
    %19 = arith.addi %9, %18 : vector<128x128xi32>
    %c12_i32 = arith.constant 12 : i32
    %20 = vector.broadcast %c12_i32 : i32 to vector<128x128xi32>
    %21 = arith.cmpi sge, %19, %20 : vector<128x128xi32>
    %22 = vector.broadcast %16 : i1 to vector<128x128xi1>
    %23 = arith.andi %22, %21 : vector<128x128xi1>
    %cst_6 = arith.constant 0.000000e+00 : f32
    %24 = vector.broadcast %cst_6 : f32 to vector<128x128xf32>
    %25 = arith.select %23, %24, %15 : vector<128x128xi1>, vector<128x128xf32>
    %c0_i32_7 = arith.constant 0 : i32
    %26 = arith.cmpi eq, %arg1, %c0_i32_7 : i32
    %27 = arith.extui %26 : i1 to i32
    %c0_i32_8 = arith.constant 0 : i32
    %28 = arith.cmpi ne, %27, %c0_i32_8 : i32
    scf.if %28 {
      %cst_14 = arith.constant 0.000000e+00 : f32
      %34 = vector.broadcast %cst_14 : f32 to vector<128x1xf32>
      %c0_15 = arith.constant 0 : index
      %c0_16 = arith.constant 0 : index
      %35 = vector.load %arg4[%c0_15, %c0_16] : memref<128x1xf32, #tpu.memory_space<vmem>>, vector<128x1xf32>
      tpu.vector_store %arg4[%c0_15, %c0_16], %34 {strides = array<i32>} : memref<128x1xf32, #tpu.memory_space<vmem>>, vector<128x1xf32>,
    } else {
    }
    %c0_9 = arith.constant 0 : index
    %c0_10 = arith.constant 0 : index
    %29 = vector.load %arg4[%c0_9, %c0_10] : memref<128x1xf32, #tpu.memory_space<vmem>>, vector<128x1xf32>
    %cst_11 = arith.constant dense<0.000000e+00> : vector<128xf32>
    %30 = vector.multi_reduction <add>, %25, %cst_11 [1] : vector<128x128xf32> to vector<128xf32>
    %31 = vector.shape_cast %30 : vector<128xf32> to vector<128x1xf32>
    %32 = arith.addf %29, %31 : vector<128x1xf32>
    %c0_12 = arith.constant 0 : index
    %c0_13 = arith.constant 0 : index
    %33 = vector.load %arg4[%c0_12, %c0_13] : memref<128x1xf32, #tpu.memory_space<vmem>>, vector<128x1xf32>
    tpu.vector_store %arg4[%c0_12, %c0_13], %32 {strides = array<i32>} : memref<128x1xf32, #tpu.memory_space<vmem>>, vector<128x1xf32>,
    return
  }
  func.func @transform_0(%arg0: i32, %arg1: i32) -> (i32, i32) {
    %c0_i32 = arith.constant 0 : i32
    %c0_i32_0 = arith.constant 0 : i32
    return %arg0, %c0_i32 : i32, i32
  }
  func.func @transform_1(%arg0: i32, %arg1: i32) -> (i32, i32) {
    %c0_i32 = arith.constant 0 : i32
    %c0_i32_0 = arith.constant 0 : i32
    return %arg1, %c0_i32 : i32, i32
  }
  func.func @transform_2(%arg0: i32, %arg1: i32) -> (i32, i32) {
    %c0_i32 = arith.constant 0 : i32
    %c0_i32_0 = arith.constant 0 : i32
    return %arg0, %c0_i32 : i32, i32
  }
}

module attributes {stable_mosaic.version = 11 : i64} {
  func.func @_loss_kernel(%arg0: i32, %arg1: memref<128x128xf32, #tpu.memory_space<vmem>>, %arg2: memref<128x128xf32, #tpu.memory_space<vmem>>, %arg3: memref<128x128xf32, #tpu.memory_space<vmem>>, %arg4: memref<128x1xi32, #tpu.memory_space<vmem>>, %arg5: memref<128x128xf32, #tpu.memory_space<vmem>>) attributes {dimension_semantics = [#tpu.dimension_semantics<parallel>], iteration_bounds = array<i64: 1>, scalar_prefetch = 0 : i64, scratch_operands = 0 : i64, tpu.core_type = #tpu.core_type<tc>, window_params = [{transform_indices = @transform_0, window_bounds = array<i64: 128, 128>}, {pipeline_mode = #tpu.pipeline_mode<synchronous>, transform_indices = @transform_1, window_bounds = array<i64: 128, 128>}, {transform_indices = @transform_2, window_bounds = array<i64: 128, 128>}, {transform_indices = @transform_3, window_bounds = array<i64: 128, 1>}, {transform_indices = @transform_4, window_bounds = array<i64: 128, 128>}]} {
    %c0 = arith.constant 0 : index
    %c0_0 = arith.constant 0 : index
    %0 = vector.load %arg1[%c0, %c0_0] : memref<128x128xf32, #tpu.memory_space<vmem>>, vector<128x128xf32>
    %c0_1 = arith.constant 0 : index
    %c0_2 = arith.constant 0 : index
    %1 = vector.load %arg2[%c0_1, %c0_2] : memref<128x128xf32, #tpu.memory_space<vmem>>, vector<128x128xf32>
    %c0_3 = arith.constant 0 : index
    %c0_4 = arith.constant 0 : index
    %2 = vector.load %arg3[%c0_3, %c0_4] : memref<128x128xf32, #tpu.memory_space<vmem>>, vector<128x128xf32>
    %c0_5 = arith.constant 0 : index
    %c0_6 = arith.constant 0 : index
    %3 = vector.load %arg4[%c0_5, %c0_6] : memref<128x1xi32, #tpu.memory_space<vmem>>, vector<128x1xi32>
    %4 = arith.mulf %0, %0 : vector<128x128xf32>
    %cst = arith.constant dense<0.000000e+00> : vector<128xf32>
    %5 = vector.multi_reduction <add>, %4, %cst [1] : vector<128x128xf32> to vector<128xf32>
    %6 = vector.shape_cast %5 : vector<128xf32> to vector<128x1xf32>
    %7 = math.sqrt %6 : vector<128x1xf32>
    %cst_7 = arith.constant 9.99999993E-9 : f32
    %8 = vector.broadcast %cst_7 : f32 to vector<128x1xf32>
    %9 = arith.maximumf %7, %8 : vector<128x1xf32>
    %cst_8 = arith.constant 1.000000e+00 : f32
    %10 = vector.broadcast %cst_8 : f32 to vector<128x1xf32>
    %11 = arith.divf %10, %9 : vector<128x1xf32>
    %12 = vector.broadcast %11 : vector<128x1xf32> to vector<128x128xf32>
    %13 = arith.mulf %0, %12 : vector<128x128xf32>
    %cst_9 = arith.constant dense<0.000000e+00> : vector<128x128xf32>
    %14 = tpu.matmul %13, %1, %cst_9 {dimension_numbers = #tpu.dot_dimension_numbers<[1], [1], [0], [0], [0, 0, 1, 0], [], []>} : vector<128x128xf32>, vector<128x128xf32>, vector<128x128xf32> -> vector<128x128xf32>
    %15 = tpu.iota {dimensions = array<i32: 1>} : vector<128x128xi32>
    %16 = vector.broadcast %3 : vector<128x1xi32> to vector<128x128xi32>
    %17 = arith.cmpi eq, %15, %16 : vector<128x128xi32>
    %c4_i32 = arith.constant 4 : i32
    %18 = vector.broadcast %c4_i32 : i32 to vector<128x128xi32>
    %19 = arith.cmpi slt, %15, %18 : vector<128x128xi32>
    %20 = arith.extui %17 : vector<128x128xi1> to vector<128x128xi32>
    %21 = arith.sitofp %20 : vector<128x128xi32> to vector<128x128xf32>
    %22 = arith.mulf %14, %21 : vector<128x128xf32>
    %cst_10 = arith.constant dense<0.000000e+00> : vector<128xf32>
    %23 = vector.multi_reduction <add>, %22, %cst_10 [1] : vector<128x128xf32> to vector<128xf32>
    %24 = vector.shape_cast %23 : vector<128xf32> to vector<128x1xf32>
    %25 = vector.broadcast %24 : vector<128x1xf32> to vector<128x128xf32>
    %26 = arith.subf %14, %25 : vector<128x128xf32>
    %cst_11 = arith.constant dense<true> : vector<128x128xi1>
    %27 = arith.xori %17, %cst_11 : vector<128x128xi1>
    %28 = arith.andi %27, %19 : vector<128x128xi1>
    %cst_12 = arith.constant 0.000000e+00 : f32
    %29 = vector.broadcast %cst_12 : f32 to vector<128x128xf32>
    %30 = arith.cmpf ogt, %26, %29 : vector<128x128xf32>
    %31 = arith.andi %28, %30 : vector<128x128xi1>
    %32 = math.exp %26 : vector<128x128xf32>
    %cst_13 = arith.constant 0.000000e+00 : f32
    %33 = vector.broadcast %cst_13 : f32 to vector<128x128xf32>
    %34 = arith.select %31, %32, %33 : vector<128x128xi1>, vector<128x128xf32>
    %cst_14 = arith.constant dense<0.000000e+00> : vector<128xf32>
    %35 = vector.multi_reduction <add>, %34, %cst_14 [1] : vector<128x128xf32> to vector<128xf32>
    %36 = vector.shape_cast %35 : vector<128xf32> to vector<128x1xf32>
    %37 = arith.mulf %2, %21 : vector<128x128xf32>
    %cst_15 = arith.constant dense<0.000000e+00> : vector<128xf32>
    %38 = vector.multi_reduction <add>, %37, %cst_15 [1] : vector<128x128xf32> to vector<128xf32>
    %39 = vector.shape_cast %38 : vector<128xf32> to vector<128x1xf32>
    %40 = vector.broadcast %39 : vector<128x1xf32> to vector<128x128xf32>
    %41 = arith.subf %2, %40 : vector<128x128xf32>
    %cst_16 = arith.constant dense<true> : vector<128x128xi1>
    %42 = arith.xori %17, %cst_16 : vector<128x128xi1>
    %43 = arith.andi %42, %19 : vector<128x128xi1>
    %cst_17 = arith.constant 0.000000e+00 : f32
    %44 = vector.broadcast %cst_17 : f32 to vector<128x128xf32>
    %45 = arith.cmpf ogt, %41, %44 : vector<128x128xf32>
    %46 = arith.andi %43, %45 : vector<128x128xi1>
    %47 = math.exp %41 : vector<128x128xf32>
    %cst_18 = arith.constant 0.000000e+00 : f32
    %48 = vector.broadcast %cst_18 : f32 to vector<128x128xf32>
    %49 = arith.select %46, %47, %48 : vector<128x128xi1>, vector<128x128xf32>
    %cst_19 = arith.constant dense<0.000000e+00> : vector<128xf32>
    %50 = vector.multi_reduction <add>, %49, %cst_19 [1] : vector<128x128xf32> to vector<128xf32>
    %51 = vector.shape_cast %50 : vector<128xf32> to vector<128x1xf32>
    %cst_20 = arith.constant 1.000000e+00 : f32
    %52 = vector.broadcast %cst_20 : f32 to vector<128x1xf32>
    %53 = arith.addf %52, %51 : vector<128x1xf32>
    %54 = math.log %53 : vector<128x1xf32>
    %cst_21 = arith.constant 1.000000e+00 : f32
    %55 = vector.broadcast %cst_21 : f32 to vector<128x1xf32>
    %56 = arith.addf %55, %36 : vector<128x1xf32>
    %57 = math.log %56 : vector<128x1xf32>
    %cst_22 = arith.constant 1.000000e+00 : f32
    %58 = vector.broadcast %cst_22 : f32 to vector<128x1xf32>
    %59 = arith.mulf %58, %57 : vector<128x1xf32>
    %60 = arith.addf %54, %59 : vector<128x1xf32>
    %61 = vector.shape_cast %60 : vector<128x1xf32> to vector<128x1xf32>
    %62 = vector.broadcast %61 : vector<128x1xf32> to vector<128x128xf32>
    %c0_23 = arith.constant 0 : index
    %c0_24 = arith.constant 0 : index
    %63 = vector.load %arg5[%c0_23, %c0_24] : memref<128x128xf32, #tpu.memory_space<vmem>>, vector<128x128xf32>
    tpu.vector_store %arg5[%c0_23, %c0_24], %62 {strides = array<i32>} : memref<128x128xf32, #tpu.memory_space<vmem>>, vector<128x128xf32>,
    return
  }
  func.func @transform_0(%arg0: i32) -> (i32, i32) {
    %c0_i32 = arith.constant 0 : i32
    %c0_i32_0 = arith.constant 0 : i32
    return %arg0, %c0_i32 : i32, i32
  }
  func.func @transform_1(%arg0: i32) -> (i32, i32) {
    %c0_i32 = arith.constant 0 : i32
    %c0_i32_0 = arith.constant 0 : i32
    %c0_i32_1 = arith.constant 0 : i32
    return %c0_i32, %c0_i32_0 : i32, i32
  }
  func.func @transform_2(%arg0: i32) -> (i32, i32) {
    %c0_i32 = arith.constant 0 : i32
    %c0_i32_0 = arith.constant 0 : i32
    return %arg0, %c0_i32 : i32, i32
  }
  func.func @transform_3(%arg0: i32) -> (i32, i32) {
    %c0_i32 = arith.constant 0 : i32
    %c0_i32_0 = arith.constant 0 : i32
    return %arg0, %c0_i32 : i32, i32
  }
  func.func @transform_4(%arg0: i32) -> (i32, i32) {
    %c0_i32 = arith.constant 0 : i32
    %c0_i32_0 = arith.constant 0 : i32
    return %arg0, %c0_i32 : i32, i32
  }
}

</mosaic_0001>

<bundles_post_ra>
// kernel: custom-call.6
= control target key start
LH: loop header
LB: loop body
LE: loop exit
PB: predicated region body
PF: predicated region fallthrough
CT: control target
= control target key end

     0   :  { %v486_v0 = vmov 0.0   ;;  %vm42_vm0 = vcmask 7168   ;;  %vm73_vm1 = vcmask 15368   ;;  %vm90_vm2 = vcmask 1047553   ;;  %s560_s0 = inlined_call_operand.vmem [shape: f32[12,12], index: 0, kind: input, shape index: {}]   ;;  %s561_s1 = inlined_call_operand.vmem [shape: f32[12,12], index: 1, kind: output, shape index: {}]  }
   0x1   :  { %39 = vst [vmem:[#allocation1] sm:$0xff] %v486_v0  ;;  %v500_v4 = vld [vmem:[%s560_s0] sm:$0xff]  ;;  %v508_v16 = vld [vmem:[%s560_s0 + $0x8] sm:$0xff]  ;;  %vm91_vm3 = vmand %vm73_vm1, %vm90_vm2  ;;  %vm108_vm4 = vcmask 23568   ;;  %vm125_vm5 = vcmask 1047554   ;;  %vm143_vm7 = vcmask 31768  }
   0x2   :  { %33 = vst [vmem:[#allocation0] sm:$0xff] %v500_v4  ;;  %35 = vst [vmem:[#allocation0 + $0x8] sm:$0xff] %v508_v16  ;;  %vm160_vm8 = vcmask 1047555   ;;  %vm178_vm10 = vcmask 39968   ;;  %vm195_vm11 = vcmask 1047556   ;;  %vm213_vm13 = vcmask 48168  }
   0x3   :  { %vm126_vm6 = vmand %vm108_vm4, %vm125_vm5  ;;  %vm230_vm14 = vcmask 1047557  }
   0x4   :  { %vm161_vm9 = vmand %vm143_vm7, %vm160_vm8 }
   0x5   :  { %vm196_vm12 = vmand %vm178_vm10, %vm195_vm11  ;;  %vm366_vm11 = vcmask 89168  }
   0x6   :  { %vm231_vm15 = vmand %vm213_vm13, %vm230_vm14 }
   0x8   :  { %v43_v1 = vld [vmem:[#allocation1] ss:$0 sm:$0xff] }
   0x9   :  { %v45_v2 = vmul.f32 %v43_v1, %v43_v1  ;;  %v52_v3 = vmul.f32 0.0, %v43_v1  ;;  %v44_v5 = vld [vmem:[#allocation0] ss:$0 sm:$0xff]  ;;  %v77_v17 = vld [vmem:[#allocation0 + $0x1] ss:$0 sm:$0xff] }
   0xa   :  { %v112_v40 = vld [vmem:[#allocation0 + $0x2] ss:$0 sm:$0xff]  ;;  %v147_v58 = vld [vmem:[#allocation0 + $0x3] ss:$0 sm:$0xff] }
   0xb   :  { %46 = vadd.xlane.f32.xlu0 %v45_v2 }
   0xf   :  { %53 = vadd.xlane.f32.xlu0 %v52_v3 }
  0x94   :  { %v47_v6 = vpop.xlane.xlu0 %46 }
  0x95   :  { %v48_v7 = vsub.f32 %v44_v5, %v47_v6 }
  0x97   :  { %462 = vrsqrt.f32 %v48_v7 }
  0x98   :  { %v54_v8 = vpop.xlane.xlu0 %53 }
  0x99   :  { %v55_v9 = vsub.f32 %v500_v4, %v54_v8 }
  0xa4   :  { %v463_v10 = vpop.eup %462 }
  0xa5   :  { %v56_v11 = vmul.f32 %v463_v10, %v55_v9 }
  0xa7   :  { %v57_v12 = vsel %vm42_vm0, %v56_v11, 0.0 }
  0xa8   :  { %59 = vst [vmem:[#allocation1] sm:$0xff] %v57_v12 }
  0xaf   :  { %v75_v13 = vld [vmem:[#allocation1 + $0x1] ss:$0 sm:$0xff] }
  0xb0   :  { %v85_v14 = vmul.f32 %v75_v13, %v57_v12  ;;  %v78_v15 = vmul.f32 %v75_v13, %v75_v13 }
  0xb2   :  { %86 = vadd.xlane.f32.xlu0 %v85_v14  ;;  %79 = vadd.xlane.f32.xlu1 %v78_v15 }
  0xb6   :  { %65 = vadd.xlane.f32.xlu1 %v52_v3 }
 0x13b   :  { %v80_v18 = vpop.xlane.xlu1 %79  ;;  %v87_v24 = vpop.xlane.xlu0 %86 }
 0x13c   :  { %v81_v19 = vsub.f32 %v77_v17, %v80_v18  ;;  %v88_v26 = vsub.f32 %v500_v4, %v87_v24 }
 0x13e   :  { %464 = vrsqrt.f32 %v81_v19 }
 0x13f   :  { %v66_v20 = vpop.xlane.xlu1 %65 }
 0x140   :  { %v67_v21 = vsub.f32 %v508_v16, %v66_v20 }
 0x142   :  { %v68_v22 = vmul.f32 %v463_v10, %v67_v21 }
 0x144   :  { %v69_v23 = vsel %vm42_vm0, %v68_v22, 0.0  ;;  %vm248_vm0 = vcmask 56368  }
 0x145   :  { %v99_v25 = vmul.f32 %v75_v13, %v69_v23  ;;  %v182_v13 = vld [vmem:[#allocation0 + $0x4] ss:$0 sm:$0xff] }
 0x147   :  { %100 = vadd.xlane.f32.xlu1 %v99_v25 }
 0x14b   :  { %v465_v27 = vpop.eup %464 }
 0x14c   :  { %v89_v28 = vmul.f32 %v465_v27, %v88_v26 }
 0x14e   :  { %v92_v29 = vsel %vm91_vm3, %v89_v28, 0.0 }
 0x14f   :  { %v93_v30 = vadd.f32 %v92_v29, %v57_v12 }
 0x151   :  { %94 = vst [vmem:[#allocation1] sm:$0xff] %v93_v30 }
 0x158   :  { %v110_v31 = vld [vmem:[#allocation1 + $0x2] ss:$0 sm:$0xff] }
 0x159   :  { %v113_v32 = vmul.f32 %v110_v31, %v110_v31  ;;  %v120_v33 = vmul.f32 %v110_v31, %v93_v30 }
 0x15b   :  { %114 = vadd.xlane.f32.xlu0 %v113_v32  ;;  %121 = vadd.xlane.f32.xlu1 %v120_v33  ;;  %v217_v32 = vld [vmem:[#allocation0 + $0x5] ss:$0 sm:$0xff] }
 0x1d0   :  { %v101_v34 = vpop.xlane.xlu1 %100 }
 0x1d1   :  { %v102_v35 = vsub.f32 %v508_v16, %v101_v34 }
 0x1d3   :  { %v103_v36 = vmul.f32 %v465_v27, %v102_v35 }
 0x1d5   :  { %v104_v37 = vsel %vm73_vm1, %v103_v36, 0.0  ;;  %vm265_vm1 = vcmask 1047558  }
 0x1d6   :  { %v105_v38 = vadd.f32 %v104_v37, %v69_v23  ;;  %vm266_vm3 = vmand %vm248_vm0, %vm265_vm1 }
 0x1d8   :  { %v134_v39 = vmul.f32 %v110_v31, %v105_v38 }
 0x1da   :  { %135 = vadd.xlane.f32.xlu0 %v134_v39 }
 0x1e4   :  { %v115_v41 = vpop.xlane.xlu0 %114  ;;  %v122_v43 = vpop.xlane.xlu1 %121 }
 0x1e5   :  { %v116_v42 = vsub.f32 %v112_v40, %v115_v41  ;;  %v123_v44 = vsub.f32 %v500_v4, %v122_v43 }
 0x1e7   :  { %466 = vrsqrt.f32 %v116_v42 }
 0x1f4   :  { %v467_v45 = vpop.eup %466 }
 0x1f5   :  { %v124_v46 = vmul.f32 %v467_v45, %v123_v44 }
 0x1f7   :  { %v127_v47 = vsel %vm126_vm6, %v124_v46, 0.0  ;;  %vm318_vm6 = vcmask 72768  }
 0x1f8   :  { %v128_v48 = vadd.f32 %v127_v47, %v93_v30 }
 0x1fa   :  { %129 = vst [vmem:[#allocation1] sm:$0xff] %v128_v48 }
 0x201   :  { %v145_v49 = vld [vmem:[#allocation1 + $0x3] ss:$0 sm:$0xff] }
 0x202   :  { %v155_v50 = vmul.f32 %v145_v49, %v128_v48  ;;  %v148_v51 = vmul.f32 %v145_v49, %v145_v49 }
 0x204   :  { %156 = vadd.xlane.f32.xlu0 %v155_v50  ;;  %149 = vadd.xlane.f32.xlu1 %v148_v51  ;;  %v252_v50 = vld [vmem:[#allocation0 + $0x6] ss:$0 sm:$0xff] }
 0x263   :  { %v136_v52 = vpop.xlane.xlu0 %135 }
 0x264   :  { %v137_v53 = vsub.f32 %v508_v16, %v136_v52 }
 0x266   :  { %v138_v54 = vmul.f32 %v467_v45, %v137_v53 }
 0x268   :  { %v139_v55 = vsel %vm108_vm4, %v138_v54, 0.0  ;;  %vm283_vm4 = vcmask 64568  }
 0x269   :  { %v140_v56 = vadd.f32 %v139_v55, %v105_v38 }
 0x26b   :  { %v169_v57 = vmul.f32 %v145_v49, %v140_v56 }
 0x26d   :  { %170 = vadd.xlane.f32.xlu1 %v169_v57 }
 0x28d   :  { %v150_v59 = vpop.xlane.xlu1 %149  ;;  %v157_v61 = vpop.xlane.xlu0 %156 }
 0x28e   :  { %v151_v60 = vsub.f32 %v147_v58, %v150_v59  ;;  %v158_v62 = vsub.f32 %v500_v4, %v157_v61 }
 0x290   :  { %468 = vrsqrt.f32 %v151_v60 }
 0x29d   :  { %v469_v63 = vpop.eup %468 }
 0x29e   :  { %v159_v0 = vmul.f32 %v469_v63, %v158_v62 }
 0x2a0   :  { %v162_v1 = vsel %vm161_vm9, %v159_v0, 0.0 }
 0x2a1   :  { %v163_v2 = vadd.f32 %v162_v1, %v128_v48 }
 0x2a3   :  { %164 = vst [vmem:[#allocation1] sm:$0xff] %v163_v2 }
 0x2aa   :  { %v180_v3 = vld [vmem:[#allocation1 + $0x4] ss:$0 sm:$0xff] }
 0x2ab   :  { %v190_v5 = vmul.f32 %v180_v3, %v163_v2  ;;  %v183_v6 = vmul.f32 %v180_v3, %v180_v3 }
 0x2ad   :  { %191 = vadd.xlane.f32.xlu1 %v190_v5  ;;  %184 = vadd.xlane.f32.xlu0 %v183_v6 }
 0x2f6   :  { %v171_v7 = vpop.xlane.xlu1 %170 }
 0x2f7   :  { %v172_v8 = vsub.f32 %v508_v16, %v171_v7 }
 0x2f9   :  { %v173_v9 = vmul.f32 %v469_v63, %v172_v8 }
 0x2fb   :  { %v174_v10 = vsel %vm143_vm7, %v173_v9, 0.0  ;;  %vm341_vm7 = vcmask 80968  }
 0x2fc   :  { %v175_v11 = vadd.f32 %v174_v10, %v140_v56  ;;  %vm361_vm9 = vmand %vm341_vm7, %vm90_vm2 }
 0x2fe   :  { %v204_v12 = vmul.f32 %v180_v3, %v175_v11  ;;  %v287_v3 = vld [vmem:[#allocation0 + $0x7] ss:$0 sm:$0xff] }
 0x300   :  { %205 = vadd.xlane.f32.xlu0 %v204_v12 }
 0x336   :  { %v185_v14 = vpop.xlane.xlu0 %184  ;;  %v192_v17 = vpop.xlane.xlu1 %191 }
 0x337   :  { %v186_v15 = vsub.f32 %v182_v13, %v185_v14  ;;  %v193_v18 = vsub.f32 %v500_v4, %v192_v17  ;;  %v322_v17 = vld [vmem:[#allocation0 + $0x8] ss:$0 sm:$0xff] }
 0x339   :  { %470 = vrsqrt.f32 %v186_v15 }
 0x346   :  { %v471_v19 = vpop.eup %470 }
 0x347   :  { %v194_v20 = vmul.f32 %v471_v19, %v193_v18 }
 0x349   :  { %v197_v21 = vsel %vm196_vm12, %v194_v20, 0.0  ;;  %vm386_vm12 = vmand %vm366_vm11, %vm125_vm5 }
 0x34a   :  { %v198_v22 = vadd.f32 %v197_v21, %v163_v2 }
 0x34c   :  { %199 = vst [vmem:[#allocation1] sm:$0xff] %v198_v22 }
 0x353   :  { %v215_v23 = vld [vmem:[#allocation1 + $0x5] ss:$0 sm:$0xff] }
 0x354   :  { %v225_v24 = vmul.f32 %v215_v23, %v198_v22  ;;  %v218_v25 = vmul.f32 %v215_v23, %v215_v23 }
 0x356   :  { %226 = vadd.xlane.f32.xlu0 %v225_v24  ;;  %219 = vadd.xlane.f32.xlu1 %v218_v25 }
 0x389   :  { %v206_v26 = vpop.xlane.xlu0 %205 }
 0x38a   :  { %v207_v27 = vsub.f32 %v508_v16, %v206_v26 }
 0x38c   :  { %v208_v28 = vmul.f32 %v471_v19, %v207_v27 }
 0x38e   :  { %v209_v29 = vsel %vm178_vm10, %v208_v28, 0.0  ;;  %vm300_vm10 = vcmask 1047559  }
 0x38f   :  { %v210_v30 = vadd.f32 %v209_v29, %v175_v11  ;;  %v345_v29 = vld [vmem:[#allocation0 + $0x9] ss:$0 sm:$0xff]  ;;  %vm301_vm2 = vmand %vm283_vm4, %vm300_vm10 }
 0x391   :  { %v239_v31 = vmul.f32 %v215_v23, %v210_v30 }
 0x393   :  { %240 = vadd.xlane.f32.xlu1 %v239_v31 }
 0x3df   :  { %v220_v33 = vpop.xlane.xlu1 %219  ;;  %v227_v35 = vpop.xlane.xlu0 %226 }
 0x3e0   :  { %v221_v34 = vsub.f32 %v217_v32, %v220_v33  ;;  %v228_v36 = vsub.f32 %v500_v4, %v227_v35 }
 0x3e2   :  { %472 = vrsqrt.f32 %v221_v34 }
 0x3ef   :  { %v473_v37 = vpop.eup %472 }
 0x3f0   :  { %v229_v38 = vmul.f32 %v473_v37, %v228_v36 }
 0x3f2   :  { %v232_v39 = vsel %vm231_vm15, %v229_v38, 0.0 }
 0x3f3   :  { %v233_v40 = vadd.f32 %v232_v39, %v198_v22 }
 0x3f5   :  { %234 = vst [vmem:[#allocation1] sm:$0xff] %v233_v40 }
 0x3fc   :  { %v250_v41 = vld [vmem:[#allocation1 + $0x6] ss:$0 sm:$0xff] }
 0x3fd   :  { %v260_v42 = vmul.f32 %v250_v41, %v233_v40  ;;  %v253_v43 = vmul.f32 %v250_v41, %v250_v41 }
 0x3ff   :  { %261 = vadd.xlane.f32.xlu1 %v260_v42  ;;  %254 = vadd.xlane.f32.xlu0 %v253_v43  ;;  %v370_v42 = vld [vmem:[#allocation0 + $0xa] ss:$0 sm:$0xff] }
 0x41c   :  { %v241_v44 = vpop.xlane.xlu1 %240 }
 0x41d   :  { %v242_v45 = vsub.f32 %v508_v16, %v241_v44 }
 0x41f   :  { %v243_v46 = vmul.f32 %v473_v37, %v242_v45 }
 0x421   :  { %v244_v47 = vsel %vm213_vm13, %v243_v46, 0.0  ;;  %vm391_vm13 = vcmask 97368  }
 0x422   :  { %v245_v48 = vadd.f32 %v244_v47, %v210_v30  ;;  %vm411_vm5 = vmand %vm391_vm13, %vm160_vm8 }
 0x424   :  { %v274_v49 = vmul.f32 %v250_v41, %v245_v48 }
 0x426   :  { %275 = vadd.xlane.f32.xlu0 %v274_v49 }
 0x488   :  { %v255_v51 = vpop.xlane.xlu0 %254  ;;  %v262_v53 = vpop.xlane.xlu1 %261 }
 0x489   :  { %v256_v52 = vsub.f32 %v252_v50, %v255_v51  ;;  %v263_v54 = vsub.f32 %v500_v4, %v262_v53 }
 0x48b   :  { %474 = vrsqrt.f32 %v256_v52 }
 0x498   :  { %v475_v55 = vpop.eup %474 }
 0x499   :  { %v264_v56 = vmul.f32 %v475_v55, %v263_v54 }
 0x49b   :  { %v267_v57 = vsel %vm266_vm3, %v264_v56, 0.0 }
 0x49c   :  { %v537_v58 = vadd.f32 %v267_v57, %v233_v40 }
 0x49e   :  { %269 = vst [vmem:[#allocation1] sm:$0xff] %v537_v58 }
 0x4a5   :  { %v285_v59 = vld [vmem:[#allocation1 + $0x7] ss:$0 sm:$0xff] }
 0x4a6   :  { %v288_v60 = vmul.f32 %v285_v59, %v285_v59  ;;  %v295_v41 = vmul.f32 %v285_v59, %v537_v58 }
 0x4a8   :  { %289 = vadd.xlane.f32.xlu1 %v288_v60 }
 0x4af   :  { %v276_v61 = vpop.xlane.xlu0 %275 }
 0x4b0   :  { %v277_v62 = vsub.f32 %v508_v16, %v276_v61 }
 0x4b2   :  { %v278_v63 = vmul.f32 %v475_v55, %v277_v62 }
 0x4b4   :  { %v279_v0 = vsel %vm248_vm0, %v278_v63, 0.0 }
 0x4b5   :  { %v280_v1 = vadd.f32 %v279_v0, %v245_v48 }
 0x4b7   :  { %v309_v2 = vmul.f32 %v285_v59, %v280_v1 }
 0x4b9   :  { %310 = vadd.xlane.f32.xlu0 %v309_v2 }
 0x531   :  { %v290_v5 = vpop.xlane.xlu1 %289 }
 0x532   :  { %v291_v6 = vsub.f32 %v287_v3, %v290_v5 }
 0x534   :  { %476 = vrsqrt.f32 %v291_v6 }
 0x541   :  { %v477_v9 = vpop.eup %476 }
 0x542   :  { %v311_v7 = vpop.xlane.xlu0 %310 }
 0x543   :  { %v312_v8 = vsub.f32 %v508_v16, %v311_v7 }
 0x545   :  { %v313_v10 = vmul.f32 %v477_v9, %v312_v8 }
 0x547   :  { %v314_v11 = vsel %vm283_vm4, %v313_v10, 0.0 }
 0x548   :  { %v315_v12 = vadd.f32 %v314_v11, %v280_v1 }
 0x54a   :  { %317 = vst [vmem:[#allocation1 + $0x8] sm:$0xff] %v315_v12 }
 0x551   :  { %v320_v13 = vld [vmem:[#allocation1 + $0x8] ss:$0 sm:$0xff] }
 0x552   :  { %v332_v14 = vmul.f32 %v320_v13, %v315_v12  ;;  %v323_v15 = vmul.f32 %v320_v13, %v320_v13 }
 0x554   :  { %333 = vadd.xlane.f32.xlu0 %v332_v14  ;;  %324 = vadd.xlane.f32.xlu1 %v323_v15 }
 0x5dd   :  { %v325_v18 = vpop.xlane.xlu1 %324  ;;  %v334_v20 = vpop.xlane.xlu0 %333 }
 0x5de   :  { %v326_v19 = vsub.f32 %v322_v17, %v325_v18  ;;  %v335_v21 = vsub.f32 %v508_v16, %v334_v20 }
 0x5e0   :  { %478 = vrsqrt.f32 %v326_v19 }
 0x5ed   :  { %v479_v22 = vpop.eup %478 }
 0x5ee   :  { %v336_v23 = vmul.f32 %v479_v22, %v335_v21 }
 0x5f0   :  { %v337_v24 = vsel %vm318_vm6, %v336_v23, 0.0 }
 0x5f1   :  { %v338_v25 = vadd.f32 %v337_v24, %v315_v12 }
 0x5f3   :  { %340 = vst [vmem:[#allocation1 + $0x8] sm:$0xff] %v338_v25 }
 0x5fa   :  { %v343_v26 = vld [vmem:[#allocation1 + $0x9] ss:$0 sm:$0xff] }
 0x5fb   :  { %v355_v27 = vmul.f32 %v343_v26, %v338_v25  ;;  %v346_v28 = vmul.f32 %v343_v26, %v343_v26 }
 0x5fd   :  { %356 = vadd.xlane.f32.xlu0 %v355_v27  ;;  %347 = vadd.xlane.f32.xlu1 %v346_v28 }
 0x686   :  { %v348_v30 = vpop.xlane.xlu1 %347  ;;  %v357_v32 = vpop.xlane.xlu0 %356 }
 0x687   :  { %v349_v31 = vsub.f32 %v345_v29, %v348_v30  ;;  %v358_v33 = vsub.f32 %v508_v16, %v357_v32 }
 0x689   :  { %480 = vrsqrt.f32 %v349_v31 }
 0x696   :  { %v481_v34 = vpop.eup %480 }
 0x697   :  { %v359_v35 = vmul.f32 %v481_v34, %v358_v33 }
 0x699   :  { %v362_v36 = vsel %vm361_vm9, %v359_v35, 0.0 }
 0x69a   :  { %v363_v37 = vadd.f32 %v362_v36, %v338_v25 }
 0x69c   :  { %365 = vst [vmem:[#allocation1 + $0x8] sm:$0xff] %v363_v37 }
 0x6a3   :  { %v368_v38 = vld [vmem:[#allocation1 + $0xa] ss:$0 sm:$0xff] }
 0x6a4   :  { %v380_v39 = vmul.f32 %v368_v38, %v363_v37  ;;  %v371_v40 = vmul.f32 %v368_v38, %v368_v38 }
 0x6a6   :  { %381 = vadd.xlane.f32.xlu0 %v380_v39  ;;  %372 = vadd.xlane.f32.xlu1 %v371_v40 }
 0x6aa   :  { %296 = vadd.xlane.f32.xlu0 %v295_v41 }
 0x72f   :  { %v382_v43 = vpop.xlane.xlu0 %381  ;;  %v373_v44 = vpop.xlane.xlu1 %372 }
 0x730   :  { %v374_v45 = vsub.f32 %v370_v42, %v373_v44  ;;  %v383_v51 = vsub.f32 %v508_v16, %v382_v43 }
 0x732   :  { %482 = vrsqrt.f32 %v374_v45 }
 0x733   :  { %v297_v46 = vpop.xlane.xlu0 %296 }
 0x734   :  { %v298_v47 = vsub.f32 %v500_v4, %v297_v46 }
 0x736   :  { %v299_v48 = vmul.f32 %v477_v9, %v298_v47 }
 0x738   :  { %v302_v49 = vsel %vm301_vm2, %v299_v48, 0.0 }
 0x739   :  { %v303_v50 = vadd.f32 %v302_v49, %v537_v58  ;;  %v395_v58 = vld [vmem:[#allocation0 + $0xb] ss:$0 sm:$0xff] }
 0x73b   :  { %304 = vst [vmem:[#allocation1] sm:$0xff] %v303_v50  ;;  %447 = vst [vmem:[%s561_s1] sm:$0xff] %v303_v50 }
 0x73f   :  { %v483_v52 = vpop.eup %482 }
 0x740   :  { %v384_v53 = vmul.f32 %v483_v52, %v383_v51 }
 0x742   :  { %v387_v54 = vsel %vm386_vm12, %v384_v53, 0.0 }
 0x743   :  { %v388_v4 = vadd.f32 %v387_v54, %v363_v37 }
 0x745   :  { %390 = vst [vmem:[#allocation1 + $0x8] sm:$0xff] %v388_v4 }
 0x74c   :  { %v393_v55 = vld [vmem:[#allocation1 + $0xb] ss:$0 sm:$0xff] }
 0x74d   :  { %v396_v56 = vmul.f32 %v393_v55, %v393_v55  ;;  %v405_v57 = vmul.f32 %v393_v55, %v388_v4 }
 0x74f   :  { %397 = vadd.xlane.f32.xlu1 %v396_v56 }
 0x753   :  { %406 = vadd.xlane.f32.xlu1 %v405_v57 }
 0x7d8   :  { %v398_v59 = vpop.xlane.xlu1 %397 }
 0x7d9   :  { %v399_v60 = vsub.f32 %v395_v58, %v398_v59 }
 0x7db   :  { %484 = vrsqrt.f32 %v399_v60 }
 0x7dc   :  { %v407_v61 = vpop.xlane.xlu1 %406 }
 0x7dd   :  { %v408_v62 = vsub.f32 %v508_v16, %v407_v61 }
 0x7e8   :  { %v485_v63 = vpop.eup %484 }
 0x7e9   :  { %v409_v0 = vmul.f32 %v485_v63, %v408_v62 }
 0x7eb   :  { %v412_v1 = vsel %vm411_vm5, %v409_v0, 0.0 }
 0x7ec   :  { %v413_v2 = vadd.f32 %v412_v1, %v388_v4 }
 0x7ee   :  { %415 = vst [vmem:[#allocation1 + $0x8] sm:$0xff] %v413_v2  ;;  %449 = vst [vmem:[%s561_s1 + $0x8] sm:$0xff] %v413_v2 }

// kernel: custom-call.7
= control target key start
LH: loop header
LB: loop body
LE: loop exit
PB: predicated region body
PF: predicated region fallthrough
CT: control target
= control target key end

     0   :  { %v39_v0 = vlaneseq  ;;  %v293_v10 = vmov -1.0   ;;  %v294_v32 = vmov 0.0   ;;  %s358_s0 = inlined_call_operand.vmem [shape: f32[1,12,12], index: 0, kind: input, shape index: {}]   ;;  %s359_s1 = inlined_call_operand.vmem [shape: f32[1,12,12], index: 1, kind: output, shape index: {}]  }
   0x1   :  { %v34_v3 = vld [vmem:[%s358_s0 + $0x8] sm:$0xff]  ;;  %v32_v21 = vld [vmem:[%s358_s0] sm:$0xff] }
   0x2   :  { %v305_v1 = vand.u32 127, %v39_v0  ;;  %v43_v2 = vshrl.u32 %v39_v0, 7 }
   0x4   :  { %vm41_vm0 = vcmp.lt.s32.totalorder %v305_v1, 12  ;;  %v60_v4 = vadd.s32 8, %v43_v2  ;;  %vm87_vm4 = vcmp.eq.s32.totalorder %v305_v1, 11  ;;  %vm95_vm6 = vcmp.eq.s32.totalorder %v305_v1, 10 }
   0x5   :  { %v88_v11 = vsel %vm87_vm4, 1.0, %v293_v10  ;;  %vm45_vm7 = vcmp.eq.s32.totalorder %v43_v2, %v305_v1  ;;  %vm105_vm8 = vcmp.eq.s32.totalorder %v305_v1, 9  ;;  %vm50_vm9 = vcmp.le.s32.totalorder %v43_v2, %v305_v1 }
   0x6   :  { %vm61_vm1 = vcmp.eq.s32.totalorder %v60_v4, %v305_v1  ;;  %vm66_vm2 = vcmp.le.s32.totalorder %v60_v4, %v305_v1  ;;  %vm84_vm5 = vcmp.eq.s32.totalorder %v305_v1, %v60_v4  ;;  %v47_v22 = vsel %vm45_vm7, %v32_v21, 0.0  ;;  %vm51_vm10 = vmand %vm50_vm9, %vm41_vm0 }
   0x7   :  { %v63_v5 = vsel %vm61_vm1, %v34_v3, 0.0  ;;  %vm67_vm3 = vmand %vm66_vm2, %vm41_vm0  ;;  %v89_v12 = vsel %vm84_vm5, %v88_v11, 0.0  ;;  %v52_v29 = vsel %vm51_vm10, %v32_v21, 0.0  ;;  %vm77_vm11 = vcmp.eq.s32.totalorder %v305_v1, %v43_v2 }
   0x8   :  { %v68_v6 = vsel %vm67_vm3, %v34_v3, 0.0  ;;  %64 = vadd.xlane.f32.xlu0 %v63_v5  ;;  %v78_v33 = vsel %vm77_vm11, -1.0, %v294_v32  ;;  %vm115_vm12 = vcmp.eq.s32.totalorder %v305_v1, 8  ;;  %vm125_vm13 = vcmp.eq.s32.totalorder %v305_v1, 7 }
   0x9   :  { %vm139_vm14 = vcmp.eq.s32.totalorder %v305_v1, 6  ;;  %vm153_vm15 = vcmp.eq.s32.totalorder %v305_v1, 5  ;;  %vm167_vm0 = vcmp.eq.s32.totalorder %v305_v1, 4  ;;  %vm181_vm1 = vcmp.eq.s32.totalorder %v305_v1, 3 }
   0xa   :  { %vm195_vm2 = vcmp.eq.s32.totalorder %v305_v1, 2  ;;  %vm209_vm3 = vcmp.eq.s32.totalorder %v305_v1, 1  ;;  %vm222_vm4 = vcmp.eq.s32.totalorder %v305_v1, 0 }
  0x91   :  { %v315_v7 = vpop.xlane.xlu0 %64 }
  0x92   :  { %289 = vrcp.f32 %v315_v7 }
  0x9f   :  { %v318_v8 = vpop.eup %289 }
  0xa0   :  { %v70_v9 = vmul.f32 %v318_v8, %v68_v6 }
  0xa2   :  { %71 = vst [vmem:[#allocation2 + $0x8] sm:$0xff] %v70_v9 }
  0xa9   :  { %v91_v13 = vld [vmem:[#allocation2 + $0xa] ss:$0 sm:$0xff]  ;;  %v101_v16 = vld [vmem:[#allocation2 + $0x9] ss:$0 sm:$0xff]  ;;  %v111_v23 = vld [vmem:[#allocation2 + $0x8] ss:$0 sm:$0xff] }
  0xaa   :  { %v92_v14 = vxor.u32 2147483648, %v91_v13  ;;  %v102_v18 = vxor.u32 2147483648, %v101_v16  ;;  %v112_v25 = vxor.u32 2147483648, %v111_v23 }
  0xac   :  { %v96_v15 = vmul.f32 %v92_v14, %v89_v12 }
  0xae   :  { %97 = vadd.xlane.f32.xlu0 %v96_v15 }
 0x137   :  { %v98_v17 = vpop.xlane.xlu0 %97 }
 0x138   :  { %v99_v19 = vsel %vm95_vm6, %v98_v17, %v89_v12  ;;  %vm238_vm6 = vweird.f32 %v315_v7 }
 0x139   :  { %v106_v20 = vmul.f32 %v102_v18, %v99_v19 }
 0x13b   :  { %107 = vadd.xlane.f32.xlu1 %v106_v20 }
 0x13f   :  { %48 = vadd.xlane.f32.xlu1 %v47_v22 }
 0x1c4   :  { %v108_v24 = vpop.xlane.xlu1 %107 }
 0x1c5   :  { %v109_v26 = vsel %vm105_vm8, %v108_v24, %v99_v19 }
 0x1c6   :  { %v116_v27 = vmul.f32 %v112_v25, %v109_v26 }
 0x1c8   :  { %117 = vadd.xlane.f32.xlu0 %v116_v27  ;;  %v329_v28 = vpop.xlane.xlu1 %48 }
 0x1c9   :  { %291 = vrcp.f32 %v329_v28  ;;  %vm233_vm5 = vweird.f32 %v329_v28 }
 0x1d6   :  { %v335_v30 = vpop.eup %291 }
 0x1d7   :  { %v54_v31 = vmul.f32 %v335_v30, %v52_v29 }
 0x1d9   :  { %55 = vst [vmem:[#allocation2] sm:$0xff] %v54_v31 }
 0x1e0   :  { %v121_v34 = vld [vmem:[#allocation2 + $0x7] ss:$0 sm:$0xff]  ;;  %v135_v40 = vld [vmem:[#allocation2 + $0x6] ss:$0 sm:$0xff]  ;;  %v149_v48 = vld [vmem:[#allocation2 + $0x5] ss:$0 sm:$0xff] }
 0x1e1   :  { %v122_v35 = vxor.u32 2147483648, %v121_v34  ;;  %v136_v42 = vxor.u32 2147483648, %v135_v40  ;;  %v150_v50 = vxor.u32 2147483648, %v149_v48  ;;  %v163_v56 = vld [vmem:[#allocation2 + $0x4] ss:$0 sm:$0xff] }
 0x1e2   :  { %v164_v58 = vxor.u32 2147483648, %v163_v56  ;;  %v177_v0 = vld [vmem:[#allocation2 + $0x3] ss:$0 sm:$0xff]  ;;  %v191_v11 = vld [vmem:[#allocation2 + $0x2] ss:$0 sm:$0xff] }
 0x1e3   :  { %v126_v36 = vmul.f32 %v122_v35, %v78_v33  ;;  %v178_v3 = vxor.u32 2147483648, %v177_v0  ;;  %v192_v13 = vxor.u32 2147483648, %v191_v11  ;;  %v205_v19 = vld [vmem:[#allocation2 + $0x1] ss:$0 sm:$0xff]  ;;  %v218_v27 = vld [vmem:[#allocation2] ss:$0 sm:$0xff] }
 0x1e4   :  { %v206_v21 = vxor.u32 2147483648, %v205_v19  ;;  %v219_v31 = vxor.u32 2147483648, %v218_v27 }
 0x1e5   :  { %127 = vadd.xlane.f32.xlu1 %v126_v36 }
 0x251   :  { %v118_v37 = vpop.xlane.xlu0 %117 }
 0x252   :  { %v119_v38 = vsel %vm115_vm12, %v118_v37, %v109_v26 }
 0x253   :  { %v130_v39 = vmul.f32 %v122_v35, %v119_v38 }
 0x255   :  { %131 = vadd.xlane.f32.xlu0 %v130_v39 }
 0x26e   :  { %v128_v41 = vpop.xlane.xlu1 %127 }
 0x26f   :  { %v129_v43 = vsel %vm125_vm13, %v128_v41, %v78_v33 }
 0x270   :  { %v140_v44 = vmul.f32 %v136_v42, %v129_v43 }
 0x272   :  { %141 = vadd.xlane.f32.xlu1 %v140_v44 }
 0x2de   :  { %v132_v45 = vpop.xlane.xlu0 %131 }
 0x2df   :  { %v133_v46 = vsel %vm125_vm13, %v132_v45, %v119_v38 }
 0x2e0   :  { %v144_v47 = vmul.f32 %v136_v42, %v133_v46 }
 0x2e2   :  { %145 = vadd.xlane.f32.xlu0 %v144_v47 }
 0x2fb   :  { %v142_v49 = vpop.xlane.xlu1 %141 }
 0x2fc   :  { %v143_v51 = vsel %vm139_vm14, %v142_v49, %v129_v43 }
 0x2fd   :  { %v154_v52 = vmul.f32 %v150_v50, %v143_v51 }
 0x2ff   :  { %155 = vadd.xlane.f32.xlu1 %v154_v52 }
 0x36b   :  { %v146_v53 = vpop.xlane.xlu0 %145 }
 0x36c   :  { %v147_v54 = vsel %vm139_vm14, %v146_v53, %v133_v46 }
 0x36d   :  { %v158_v55 = vmul.f32 %v150_v50, %v147_v54 }
 0x36f   :  { %159 = vadd.xlane.f32.xlu0 %v158_v55 }
 0x388   :  { %v156_v57 = vpop.xlane.xlu1 %155 }
 0x389   :  { %v157_v59 = vsel %vm153_vm15, %v156_v57, %v143_v51 }
 0x38a   :  { %v168_v60 = vmul.f32 %v164_v58, %v157_v59 }
 0x38c   :  { %169 = vadd.xlane.f32.xlu1 %v168_v60 }
 0x3f8   :  { %v160_v61 = vpop.xlane.xlu0 %159 }
 0x3f9   :  { %v161_v62 = vsel %vm153_vm15, %v160_v61, %v147_v54 }
 0x3fa   :  { %v172_v63 = vmul.f32 %v164_v58, %v161_v62 }
 0x3fc   :  { %173 = vadd.xlane.f32.xlu0 %v172_v63 }
 0x415   :  { %v170_v2 = vpop.xlane.xlu1 %169 }
 0x416   :  { %v171_v4 = vsel %vm167_vm0, %v170_v2, %v157_v59 }
 0x417   :  { %v182_v5 = vmul.f32 %v178_v3, %v171_v4 }
 0x419   :  { %183 = vadd.xlane.f32.xlu1 %v182_v5 }
 0x485   :  { %v174_v6 = vpop.xlane.xlu0 %173 }
 0x486   :  { %v175_v9 = vsel %vm167_vm0, %v174_v6, %v161_v62 }
 0x487   :  { %v186_v10 = vmul.f32 %v178_v3, %v175_v9 }
 0x489   :  { %187 = vadd.xlane.f32.xlu0 %v186_v10 }
 0x4a2   :  { %v184_v12 = vpop.xlane.xlu1 %183 }
 0x4a3   :  { %v185_v14 = vsel %vm181_vm1, %v184_v12, %v171_v4 }
 0x4a4   :  { %v196_v15 = vmul.f32 %v192_v13, %v185_v14 }
 0x4a6   :  { %197 = vadd.xlane.f32.xlu1 %v196_v15 }
 0x512   :  { %v188_v16 = vpop.xlane.xlu0 %187 }
 0x513   :  { %v189_v17 = vsel %vm181_vm1, %v188_v16, %v175_v9 }
 0x514   :  { %v200_v18 = vmul.f32 %v192_v13, %v189_v17 }
 0x516   :  { %201 = vadd.xlane.f32.xlu0 %v200_v18 }
 0x52f   :  { %v198_v20 = vpop.xlane.xlu1 %197 }
 0x530   :  { %v199_v22 = vsel %vm195_vm2, %v198_v20, %v185_v14 }
 0x531   :  { %v210_v23 = vmul.f32 %v206_v21, %v199_v22 }
 0x533   :  { %211 = vadd.xlane.f32.xlu1 %v210_v23 }
 0x59f   :  { %v202_v24 = vpop.xlane.xlu0 %201 }
 0x5a0   :  { %v203_v25 = vsel %vm195_vm2, %v202_v24, %v189_v17 }
 0x5a1   :  { %v214_v26 = vmul.f32 %v206_v21, %v203_v25 }
 0x5a3   :  { %215 = vadd.xlane.f32.xlu0 %v214_v26 }
 0x5bc   :  { %v212_v29 = vpop.xlane.xlu1 %211 }
 0x5bd   :  { %v213_v32 = vsel %vm209_vm3, %v212_v29, %v199_v22 }
 0x5be   :  { %v223_v33 = vmul.f32 %v219_v31, %v213_v32 }
 0x5c0   :  { %224 = vadd.xlane.f32.xlu1 %v223_v33 }
 0x62c   :  { %v216_v34 = vpop.xlane.xlu0 %215 }
 0x62d   :  { %v217_v35 = vsel %vm209_vm3, %v216_v34, %v203_v25 }
 0x62e   :  { %v227_v36 = vmul.f32 %v219_v31, %v217_v35 }
 0x630   :  { %228 = vadd.xlane.f32.xlu0 %v227_v36 }
 0x649   :  { %v225_v37 = vpop.xlane.xlu1 %224 }
 0x64a   :  { %v226_v38 = vsel %vm222_vm4, %v225_v37, %v213_v32 }
 0x64b   :  { %v232_v39 = vmul.f32 %v335_v30, %v226_v38 }
 0x64d   :  { %v234_v40 = vsel %vm233_vm5, %v226_v38, %v232_v39 }
 0x64e   :  { %273 = vst [vmem:[%s359_s1] sm:$0xff] %v234_v40 }
 0x6b9   :  { %v229_v41 = vpop.xlane.xlu0 %228 }
 0x6ba   :  { %v230_v42 = vsel %vm222_vm4, %v229_v41, %v217_v35 }
 0x6bb   :  { %v237_v43 = vmul.f32 %v318_v8, %v230_v42 }
 0x6bd   :  { %v239_v44 = vsel %vm238_vm6, %v230_v42, %v237_v43 }
 0x6be   :  { %275 = vst [vmem:[%s359_s1 + $0x8] sm:$0xff] %v239_v44 }

// kernel: manifold_loss.4
= control target key start
LH: loop header
LB: loop body
LE: loop exit
PB: predicated region body
PF: predicated region fallthrough
CT: control target
= control target key end

     0   :  { %s771_s0 = inlined_call_operand.vmem [shape: f32[128,128], index: 0, kind: input, shape index: {}]   ;;  %s772_s1 = inlined_call_operand.vmem [shape: bf16[128,128], index: 1, kind: output, shape index: {}]  }
   0x1   :  { %v488_v0 = vld [vmem:[%s771_s0 + $0x10] sm:$0xff]  ;;  %v493_v1 = vld [vmem:[%s771_s0] sm:$0xff]  ;;  %v498_v2 = vld [vmem:[%s771_s0 + $0x18] sm:$0xff] }
   0x2   :  { %v26_v3 = vmul.f32 %v488_v0, %v488_v0  ;;  %v24_v4 = vmul.f32 %v493_v1, %v493_v1  ;;  %v507_v5 = vld [vmem:[%s771_s0 + $0x8] sm:$0xff]  ;;  %v27_v6 = vmul.f32 %v498_v2, %v498_v2  ;;  %v521_v9 = vld [vmem:[%s771_s0 + $0x20] sm:$0xff]  ;;  %v530_v12 = vld [vmem:[%s771_s0 + $0x38] sm:$0xff] }
   0x3   :  { %v25_v7 = vmul.f32 %v507_v5, %v507_v5  ;;  %v516_v8 = vld [vmem:[%s771_s0 + $0x28] sm:$0xff]  ;;  %v28_v11 = vmul.f32 %v521_v9, %v521_v9  ;;  %v535_v13 = vld [vmem:[%s771_s0 + $0x30] sm:$0xff]  ;;  %v31_v14 = vmul.f32 %v530_v12, %v530_v12  ;;  %v549_v17 = vld [vmem:[%s771_s0 + $0x40] sm:$0xff] }
   0x4   :  { %44 = vadd.xlane.f32.xlu1 %v26_v3  ;;  %40 = vadd.xlane.f32.xlu0 %v24_v4  ;;  %v29_v10 = vmul.f32 %v516_v8, %v516_v8  ;;  %v30_v15 = vmul.f32 %v535_v13, %v535_v13  ;;  %v544_v16 = vld [vmem:[%s771_s0 + $0x48] sm:$0xff]  ;;  %v32_v19 = vmul.f32 %v549_v17, %v549_v17  ;;  %v558_v20 = vld [vmem:[%s771_s0 + $0x58] sm:$0xff]  ;;  %v563_v21 = vld [vmem:[%s771_s0 + $0x50] sm:$0xff] }
   0x5   :  { %v33_v18 = vmul.f32 %v544_v16, %v544_v16  ;;  %v35_v22 = vmul.f32 %v558_v20, %v558_v20  ;;  %v34_v23 = vmul.f32 %v563_v21, %v563_v21  ;;  %v572_v24 = vld [vmem:[%s771_s0 + $0x68] sm:$0xff]  ;;  %v577_v25 = vld [vmem:[%s771_s0 + $0x60] sm:$0xff]  ;;  %v586_v28 = vld [vmem:[%s771_s0 + $0x78] sm:$0xff] }
   0x6   :  { %v37_v26 = vmul.f32 %v572_v24, %v572_v24  ;;  %v36_v27 = vmul.f32 %v577_v25, %v577_v25  ;;  %v591_v29 = vld [vmem:[%s771_s0 + $0x70] sm:$0xff]  ;;  %v39_v30 = vmul.f32 %v586_v28, %v586_v28 }
   0x7   :  { %v38_v31 = vmul.f32 %v591_v29, %v591_v29 }
   0x8   :  { %46 = vadd.xlane.f32.xlu1 %v27_v6  ;;  %42 = vadd.xlane.f32.xlu0 %v25_v7 }
   0xc   :  { %50 = vadd.xlane.f32.xlu1 %v29_v10  ;;  %48 = vadd.xlane.f32.xlu0 %v28_v11 }
  0x10   :  { %54 = vadd.xlane.f32.xlu1 %v31_v14  ;;  %52 = vadd.xlane.f32.xlu0 %v30_v15 }
  0x14   :  { %58 = vadd.xlane.f32.xlu1 %v33_v18  ;;  %56 = vadd.xlane.f32.xlu0 %v32_v19 }
  0x18   :  { %62 = vadd.xlane.f32.xlu1 %v35_v22  ;;  %60 = vadd.xlane.f32.xlu0 %v34_v23 }
  0x1c   :  { %66 = vadd.xlane.f32.xlu1 %v37_v26  ;;  %64 = vadd.xlane.f32.xlu0 %v36_v27 }
  0x20   :  { %70 = vadd.xlane.f32.xlu1 %v39_v30  ;;  %68 = vadd.xlane.f32.xlu0 %v38_v31 }
  0x8d   :  { %v45_v32 = vpop.xlane.xlu1 %44  ;;  %v41_v33 = vpop.xlane.xlu0 %40 }
  0x8e   :  { %411 = vrsqrt.f32 %v45_v32  ;;  %vm88_vm0 = vcmp.eq.f32.partialorder %v45_v32, inf  ;;  %vm90_vm1 = vcmp.eq.f32.partialorder %v45_v32, 0.0  ;;  %v91_v40 = vand.u32 2147483648, %v45_v32 }
  0x8f   :  { %413 = vrsqrt.f32 %v41_v33  ;;  %vm74_vm2 = vcmp.eq.f32.partialorder %v41_v33, inf  ;;  %vm76_vm3 = vcmp.eq.f32.partialorder %v41_v33, 0.0  ;;  %v77_v42 = vand.u32 2147483648, %v41_v33 }
  0x91   :  { %v47_v34 = vpop.xlane.xlu1 %46  ;;  %v597_v35 = vpop.xlane.xlu0 %42 }
  0x92   :  { %415 = vrsqrt.f32 %v47_v34  ;;  %vm95_vm4 = vcmp.eq.f32.partialorder %v47_v34, inf  ;;  %vm97_vm5 = vcmp.eq.f32.partialorder %v47_v34, 0.0  ;;  %v98_v45 = vand.u32 2147483648, %v47_v34 }
  0x93   :  { %417 = vrsqrt.f32 %v597_v35  ;;  %vm81_vm6 = vcmp.eq.f32.partialorder %v597_v35, inf  ;;  %vm83_vm7 = vcmp.eq.f32.partialorder %v597_v35, 0.0  ;;  %v84_v47 = vand.u32 2147483648, %v597_v35 }
  0x95   :  { %v600_v36 = vpop.xlane.xlu1 %50  ;;  %v602_v37 = vpop.xlane.xlu0 %48 }
  0x96   :  { %419 = vrsqrt.f32 %v600_v36  ;;  %vm109_vm8 = vcmp.eq.f32.partialorder %v600_v36, inf  ;;  %vm111_vm9 = vcmp.eq.f32.partialorder %v600_v36, 0.0  ;;  %v112_v51 = vand.u32 2147483648, %v600_v36 }
  0x97   :  { %421 = vrsqrt.f32 %v602_v37  ;;  %vm102_vm10 = vcmp.eq.f32.partialorder %v602_v37, inf  ;;  %vm104_vm11 = vcmp.eq.f32.partialorder %v602_v37, 0.0  ;;  %v105_v58 = vand.u32 2147483648, %v602_v37 }
  0x99   :  { %v606_v38 = vpop.xlane.xlu1 %54  ;;  %v608_v39 = vpop.xlane.xlu0 %52 }
  0x9a   :  { %423 = vrsqrt.f32 %v606_v38  ;;  %vm123_vm14 = vcmp.eq.f32.partialorder %v606_v38, inf  ;;  %vm125_vm15 = vcmp.eq.f32.partialorder %v606_v38, 0.0  ;;  %v126_v3 = vand.u32 2147483648, %v606_v38 }
  0x9b   :  { %v412_v41 = vpop.eup %411  ;;  %425 = vrsqrt.f32 %v608_v39  ;;  %v119_v31 = vand.u32 2147483648, %v608_v39 }
  0x9c   :  { %v414_v43 = vpop.eup %413  ;;  %v87_v44 = vmul.f32 %v412_v41, %v45_v32 }
  0x9d   :  { %v73_v46 = vmul.f32 %v414_v43, %v41_v33  ;;  %v616_v48 = vpop.xlane.xlu1 %58  ;;  %v618_v49 = vpop.xlane.xlu0 %56 }
  0x9e   :  { %v89_v50 = vsel %vm88_vm0, %v45_v32, %v87_v44  ;;  %427 = vrsqrt.f32 %v616_v48  ;;  %vm116_vm0 = vcmp.eq.f32.partialorder %v608_v39, inf }
  0x9f   :  { %v416_v52 = vpop.eup %415  ;;  %v92_v53 = vsel %vm90_vm1, %v91_v40, %v89_v50  ;;  %v75_v54 = vsel %vm74_vm2, %v41_v33, %v73_v46  ;;  %429 = vrsqrt.f32 %v618_v49 }
  0xa0   :  { %v418_v55 = vpop.eup %417  ;;  %vm186_vm12 = vcmp.eq.f32.partialorder %v92_v53, 0.0  ;;  %v78_v56 = vsel %vm76_vm3, %v77_v42, %v75_v54  ;;  %v94_v57 = vmul.f32 %v416_v52, %v47_v34  ;;  %vm118_vm3 = vcmp.eq.f32.partialorder %v608_v39, 0.0 }
  0xa1   :  { %v202_v59 = vsel %vm186_vm12, 1.0, %v92_v53  ;;  %vm184_vm13 = vcmp.eq.f32.partialorder %v78_v56, 0.0  ;;  %v80_v60 = vmul.f32 %v418_v55, %v597_v35  ;;  %v633_v61 = vpop.xlane.xlu1 %62  ;;  %v648_v19 = vpop.xlane.xlu0 %60 }
  0xa2   :  { %v200_v62 = vsel %vm184_vm13, 1.0, %v78_v56  ;;  %v96_v63 = vsel %vm95_vm4, %v47_v34, %v94_v57  ;;  %431 = vrcp.f32 %v202_v59 }
  0xa3   :  { %v420_v4 = vpop.eup %419  ;;  %v99_v6 = vsel %vm97_vm5, %v98_v45, %v96_v63  ;;  %v82_v7 = vsel %vm81_vm6, %v597_v35, %v80_v60  ;;  %433 = vrsqrt.f32 %v633_v61  ;;  %vm137_vm6 = vcmp.eq.f32.partialorder %v616_v48, inf }
  0xa4   :  { %v422_v10 = vpop.eup %421  ;;  %vm187_vm1 = vcmp.eq.f32.partialorder %v99_v6, 0.0  ;;  %v85_v11 = vsel %vm83_vm7, %v84_v47, %v82_v7  ;;  %v108_v14 = vmul.f32 %v420_v4, %v600_v36  ;;  %435 = vrcp.f32 %v200_v62 }
  0xa5   :  { %v203_v15 = vsel %vm187_vm1, 1.0, %v99_v6  ;;  %vm185_vm2 = vcmp.eq.f32.partialorder %v85_v11, 0.0  ;;  %v101_v18 = vmul.f32 %v422_v10, %v602_v37  ;;  %v666_v40 = vpop.xlane.xlu1 %66  ;;  %vm139_vm7 = vcmp.eq.f32.partialorder %v616_v48, 0.0 }
  0xa6   :  { %437 = vrcp.f32 %v203_v15  ;;  %v201_v22 = vsel %vm185_vm2, 1.0, %v85_v11  ;;  %v110_v23 = vsel %vm109_vm8, %v600_v36, %v108_v14  ;;  %v140_v45 = vand.u32 2147483648, %v616_v48 }
  0xa7   :  { %v424_v26 = vpop.eup %423  ;;  %439 = vrcp.f32 %v201_v22  ;;  %v113_v27 = vsel %vm111_vm9, %v112_v51, %v110_v23  ;;  %v103_v30 = vsel %vm102_vm10, %v602_v37, %v101_v18  ;;  %v682_v51 = vpop.xlane.xlu0 %64  ;;  %vm130_vm10 = vcmp.eq.f32.partialorder %v618_v49, inf }
  0xa8   :  { %v426_v32 = vpop.eup %425  ;;  %vm189_vm4 = vcmp.eq.f32.partialorder %v113_v27, 0.0  ;;  %v106_v33 = vsel %vm104_vm11, %v105_v58, %v103_v30  ;;  %v122_v34 = vmul.f32 %v424_v26, %v606_v38  ;;  %441 = vrsqrt.f32 %v648_v19 }
  0xa9   :  { %v205_v35 = vsel %vm189_vm4, 1.0, %v113_v27  ;;  %vm188_vm5 = vcmp.eq.f32.partialorder %v106_v33, 0.0  ;;  %v115_v36 = vmul.f32 %v426_v32, %v608_v39  ;;  %vm132_vm11 = vcmp.eq.f32.partialorder %v618_v49, 0.0  ;;  %v695_v62 = vpop.xlane.xlu1 %70 }
  0xaa   :  { %443 = vrcp.f32 %v205_v35  ;;  %v204_v41 = vsel %vm188_vm5, 1.0, %v106_v33  ;;  %v124_v42 = vsel %vm123_vm14, %v606_v38, %v122_v34  ;;  %vm151_vm14 = vcmp.eq.f32.partialorder %v633_v61, inf }
  0xab   :  { %v428_v37 = vpop.eup %427  ;;  %445 = vrcp.f32 %v204_v41  ;;  %v127_v43 = vsel %vm125_vm15, %v126_v3, %v124_v42  ;;  %v117_v44 = vsel %vm116_vm0, %v608_v39, %v115_v36  ;;  %v133_v39 = vand.u32 2147483648, %v618_v49  ;;  %v698_v4 = vpop.xlane.xlu0 %68 }
  0xac   :  { %v430_v46 = vpop.eup %429  ;;  %vm191_vm8 = vcmp.eq.f32.partialorder %v127_v43, 0.0  ;;  %v120_v47 = vsel %vm118_vm3, %v119_v31, %v117_v44  ;;  %v136_v50 = vmul.f32 %v428_v37, %v616_v48  ;;  %447 = vrsqrt.f32 %v666_v40 }
  0xad   :  { %v207_v52 = vsel %vm191_vm8, 1.0, %v127_v43  ;;  %vm190_vm9 = vcmp.eq.f32.partialorder %v120_v47, 0.0  ;;  %v129_v38 = vmul.f32 %v430_v46, %v618_v49  ;;  %vm153_vm15 = vcmp.eq.f32.partialorder %v633_v61, 0.0 }
  0xae   :  { %449 = vrcp.f32 %v207_v52  ;;  %v206_v53 = vsel %vm190_vm9, 1.0, %v120_v47  ;;  %v138_v54 = vsel %vm137_vm6, %v616_v48, %v136_v50  ;;  %vm144_vm1 = vcmp.eq.f32.partialorder %v648_v19, inf }
  0xaf   :  { %451 = vrcp.f32 %v206_v53  ;;  %v141_v55 = vsel %vm139_vm7, %v140_v45, %v138_v54  ;;  %v131_v56 = vsel %vm130_vm10, %v618_v49, %v129_v38  ;;  %v432_v57 = vpop.eup %431  ;;  %v154_v49 = vand.u32 2147483648, %v633_v61 }
  0xb0   :  { %vm193_vm12 = vcmp.eq.f32.partialorder %v141_v55, 0.0  ;;  %v134_v58 = vsel %vm132_vm11, %v133_v39, %v131_v56  ;;  %453 = vrsqrt.f32 %v682_v51  ;;  %v434_v59 = vpop.eup %433  ;;  %v221_v10 = vmul.f32 %v432_v57, %v488_v0 }
  0xb1   :  { %v209_v60 = vsel %vm193_vm12, 1.0, %v141_v55  ;;  %vm192_vm13 = vcmp.eq.f32.partialorder %v134_v58, 0.0  ;;  %v436_v63 = vpop.eup %435  ;;  %v150_v48 = vmul.f32 %v434_v59, %v633_v61  ;;  %vm146_vm2 = vcmp.eq.f32.partialorder %v648_v19, 0.0 }
  0xb2   :  { %455 = vrcp.f32 %v209_v60  ;;  %v208_v3 = vsel %vm192_vm13, 1.0, %v134_v58  ;;  %v217_v18 = vmul.f32 %v436_v63, %v493_v1  ;;  %vm165_vm4 = vcmp.eq.f32.partialorder %v666_v40, inf }
  0xb3   :  { %v438_v6 = vpop.eup %437  ;;  %457 = vrcp.f32 %v208_v3  ;;  %v152_v14 = vsel %vm151_vm14, %v633_v61, %v150_v48  ;;  %vm167_vm5 = vcmp.eq.f32.partialorder %v666_v40, 0.0  ;;  %vm158_vm7 = vcmp.eq.f32.partialorder %v682_v51, inf }
  0xb4   :  { %v440_v7 = vpop.eup %439  ;;  %v223_v11 = vmul.f32 %v438_v6, %v498_v2  ;;  %459 = vrsqrt.f32 %v695_v62  ;;  %v155_v23 = vsel %vm153_vm15, %v154_v49, %v152_v14  ;;  %v147_v2 = vand.u32 2147483648, %v648_v19 }
  0xb5   :  { %v442_v15 = vpop.eup %441  ;;  %v219_v22 = vmul.f32 %v440_v7, %v507_v5  ;;  %461 = vrsqrt.f32 %v698_v4  ;;  %vm195_vm0 = vcmp.eq.f32.partialorder %v155_v23, 0.0  ;;  %vm160_vm8 = vcmp.eq.f32.partialorder %v682_v51, 0.0 }
  0xb6   :  { %v372_v26 = vpack.c.bf16 %v223_v11, %v221_v10  ;;  %v143_v27 = vmul.f32 %v442_v15, %v648_v19  ;;  %v211_v31 = vsel %vm195_vm0, 1.0, %v155_v23  ;;  %vm179_vm10 = vcmp.eq.f32.partialorder %v695_v62, inf }
  0xb7   :  { %v444_v30 = vpop.eup %443  ;;  %v367_v0 = vpack.c.bf16 %v219_v22, %v217_v18  ;;  %463 = vrcp.f32 %v211_v31  ;;  %vm181_vm11 = vcmp.eq.f32.partialorder %v695_v62, 0.0  ;;  %vm172_vm12 = vcmp.eq.f32.partialorder %v698_v4, inf }
  0xb8   :  { %v446_v61 = vpop.eup %445  ;;  %404 = vst [vmem:[%s772_s1 + $0x8] sm:$0xff] %v372_v26   ;;  %v227_v1 = vmul.f32 %v444_v30, %v516_v8  ;;  %v145_v5 = vsel %vm144_vm1, %v648_v19, %v143_v27  ;;  %v168_v8 = vand.u32 2147483648, %v666_v40  ;;  %vm174_vm13 = vcmp.eq.f32.partialorder %v698_v4, 0.0 }
  0xb9   :  { %v448_v32 = vpop.eup %447  ;;  %368 = vst [vmem:[%s772_s1] sm:$0xff] %v367_v0   ;;  %v225_v33 = vmul.f32 %v446_v61, %v521_v9  ;;  %v148_v34 = vsel %vm146_vm2, %v147_v2, %v145_v5 }
  0xba   :  { %vm194_vm3 = vcmp.eq.f32.partialorder %v148_v34, 0.0  ;;  %v164_v35 = vmul.f32 %v448_v32, %v666_v40 }
  0xbb   :  { %v450_v36 = vpop.eup %449  ;;  %v377_v41 = vpack.c.bf16 %v227_v1, %v225_v33  ;;  %v210_v42 = vsel %vm194_vm3, 1.0, %v148_v34 }
  0xbc   :  { %v452_v37 = vpop.eup %451  ;;  %v231_v19 = vmul.f32 %v450_v36, %v530_v12  ;;  %465 = vrcp.f32 %v210_v42  ;;  %v166_v43 = vsel %vm165_vm4, %v666_v40, %v164_v35  ;;  %v161_v12 = vand.u32 2147483648, %v682_v51 }
  0xbd   :  { %v454_v9 = vpop.eup %453  ;;  %405 = vst [vmem:[%s772_s1 + $0x10] sm:$0xff] %v377_v41   ;;  %v229_v44 = vmul.f32 %v452_v37, %v535_v13  ;;  %v169_v45 = vsel %vm167_vm5, %v168_v8, %v166_v43 }
  0xbe   :  { %vm197_vm6 = vcmp.eq.f32.partialorder %v169_v45, 0.0  ;;  %v157_v46 = vmul.f32 %v454_v9, %v682_v51 }
  0xbf   :  { %v456_v47 = vpop.eup %455  ;;  %v382_v50 = vpack.c.bf16 %v231_v19, %v229_v44  ;;  %v213_v52 = vsel %vm197_vm6, 1.0, %v169_v45 }
  0xc0   :  { %v458_v38 = vpop.eup %457  ;;  %v235_v40 = vmul.f32 %v456_v47, %v544_v16  ;;  %467 = vrcp.f32 %v213_v52  ;;  %v159_v53 = vsel %vm158_vm7, %v682_v51, %v157_v46  ;;  %v182_v51 = vand.u32 2147483648, %v695_v62 }
  0xc1   :  { %v460_v13 = vpop.eup %459  ;;  %406 = vst [vmem:[%s772_s1 + $0x18] sm:$0xff] %v382_v50   ;;  %v233_v54 = vmul.f32 %v458_v38, %v549_v17  ;;  %v162_v39 = vsel %vm160_vm8, %v161_v12, %v159_v53  ;;  %v175_v17 = vand.u32 2147483648, %v698_v4 }
  0xc2   :  { %v462_v55 = vpop.eup %461  ;;  %vm196_vm9 = vcmp.eq.f32.partialorder %v162_v39, 0.0  ;;  %v178_v56 = vmul.f32 %v460_v13, %v695_v62 }
  0xc3   :  { %v387_v16 = vpack.c.bf16 %v235_v40, %v233_v54  ;;  %v212_v57 = vsel %vm196_vm9, 1.0, %v162_v39  ;;  %v171_v58 = vmul.f32 %v462_v55, %v698_v4 }
  0xc4   :  { %469 = vrcp.f32 %v212_v57  ;;  %v180_v59 = vsel %vm179_vm10, %v695_v62, %v178_v56  ;;  %v464_v60 = vpop.eup %463 }
  0xc5   :  { %407 = vst [vmem:[%s772_s1 + $0x20] sm:$0xff] %v387_v16   ;;  %v183_v63 = vsel %vm181_vm11, %v182_v51, %v180_v59  ;;  %v173_v3 = vsel %vm172_vm12, %v698_v4, %v171_v58  ;;  %v239_v62 = vmul.f32 %v464_v60, %v558_v20 }
  0xc6   :  { %vm199_vm14 = vcmp.eq.f32.partialorder %v183_v63, 0.0  ;;  %v176_v48 = vsel %vm174_vm13, %v175_v17, %v173_v3 }
  0xc7   :  { %v215_v6 = vsel %vm199_vm14, 1.0, %v183_v63  ;;  %vm198_vm15 = vcmp.eq.f32.partialorder %v176_v48, 0.0 }
  0xc8   :  { %471 = vrcp.f32 %v215_v6  ;;  %v214_v49 = vsel %vm198_vm15, 1.0, %v176_v48 }
  0xc9   :  { %v466_v7 = vpop.eup %465  ;;  %473 = vrcp.f32 %v214_v49 }
  0xca   :  { %v237_v10 = vmul.f32 %v466_v7, %v563_v21 }
  0xcc   :  { %v392_v11 = vpack.c.bf16 %v239_v62, %v237_v10 }
  0xcd   :  { %v468_v14 = vpop.eup %467 }
  0xce   :  { %408 = vst [vmem:[%s772_s1 + $0x28] sm:$0xff] %v392_v11   ;;  %v243_v4 = vmul.f32 %v468_v14, %v572_v24 }
  0xd1   :  { %v470_v15 = vpop.eup %469 }
  0xd2   :  { %v241_v18 = vmul.f32 %v470_v15, %v577_v25 }
  0xd4   :  { %v397_v22 = vpack.c.bf16 %v243_v4, %v241_v18 }
  0xd5   :  { %v472_v23 = vpop.eup %471 }
  0xd6   :  { %v474_v20 = vpop.eup %473  ;;  %409 = vst [vmem:[%s772_s1 + $0x30] sm:$0xff] %v397_v22   ;;  %v247_v21 = vmul.f32 %v472_v23, %v586_v28 }
  0xd7   :  { %v245_v26 = vmul.f32 %v474_v20, %v591_v29 }
  0xd9   :  { %v402_v27 = vpack.c.bf16 %v247_v21, %v245_v26 }
  0xdb   :  { %410 = vst [vmem:[%s772_s1 + $0x38] sm:$0xff] %v402_v27  }

// kernel: manifold_loss.6
= control target key start
LH: loop header
LB: loop body
LE: loop exit
PB: predicated region body
PF: predicated region fallthrough
CT: control target
= control target key end

     0   :  { %v681_v1 = vmov 0   ;;  %v458_v36 = vlaneseq  ;;  %s1019_s1 = inlined_call_operand.vmem [shape: bf16[128,128], index: 1, kind: input, shape index: {}, may-alias: {0,1}]   ;;  %s1020_s0 = inlined_call_operand.vmem [shape: bf16[128,128], index: 0, kind: input, shape index: {}, may-alias: {0,1}]   ;;  %s1021_s2 = inlined_call_operand.vmem [shape: f32[128,1], index: 2, kind: input, shape index: {}]   ;;  %s1022_s3 = inlined_call_operand.vmem [shape: f32[1,128], index: 3, kind: input, shape index: {}]   ;;  %s1023_s4 = inlined_call_operand.vmem [shape: f32[128,128], index: 4, kind: output, shape index: {}]  }
   0x1   :  { %v633_v0 = vld [vmem:[%s1019_s1 + $0x38] sm:$0xff]   ;;  %632 = vset.pattern.permute.xlu1 %v681_v1  ;;  %631 = vset.pattern.permute.xlu0 %v681_v1  ;;  %v634_v2 = vld [vmem:[%s1019_s1 + $0x30] sm:$0xff]   ;;  %v635_v3 = vld [vmem:[%s1019_s1 + $0x28] sm:$0xff]  }
   0x2   :  { %582 = vmatprep.subr.bf16.mxu0 %v633_v0  ;;  %614 = vmatprep.subr.bf16.mxu1 %v633_v0  ;;  %v641_v4 = vld [vmem:[%s1020_s0] sm:$0xff]   ;;  %v309_v7 = vld [vmem:[%s1021_s2 + $0x10] sm:$0xff]  ;;  %v310_v9 = vld [vmem:[%s1021_s2 + $0x18] sm:$0xff]  ;;  %v813_v40 = vshrl.u32 %v458_v36, 7  ;;  %v822_v59 = vand.u32 127, %v458_v36 }
   0x3   :  { %583 = vmatpush3.bf16.xpose.msra.mxu0 %v633_v0  ;;  %622 = vmatpush3.bf16.xpose.msra.mxu1 %v633_v0  ;;  %v642_v5 = vld [vmem:[%s1020_s0 + $0x20] sm:$0xff]   ;;  %v308_v10 = vld [vmem:[%s1021_s2 + $0x8] sm:$0xff]  ;;  %v637_v13 = vld [vmem:[%s1019_s1 + $0x18] sm:$0xff]  }
   0x4   :  { %584 = vmatprep.subr.bf16.mxu0 %v634_v2  ;;  %615 = vmatprep.subr.bf16.mxu1 %v634_v2  ;;  %v636_v6 = vld [vmem:[%s1019_s1 + $0x20] sm:$0xff]   ;;  %v312_v11 = vld [vmem:[%s1021_s2 + $0x28] sm:$0xff]  ;;  %v314_v14 = vld [vmem:[%s1021_s2 + $0x38] sm:$0xff]  ;;  %v818_v51 = vadd.s32 16, %v813_v40  ;;  %v825_v60 = vadd.s32 80, %v813_v40  ;;  %vm478_vm2 = vcmp.eq.s32.totalorder %v813_v40, %v822_v59 }
   0x5   :  { %598 = vmatprep.mubr.bf16.mxu0 %v641_v4  ;;  %606 = vmatprep.mubr.bf16.mxu1 %v642_v5  ;;  %v307_v8 = vld [vmem:[%s1021_s2] sm:$0xff]  ;;  %v313_v15 = vld [vmem:[%s1021_s2 + $0x30] sm:$0xff]  ;;  %v316_v16 = vld [vmem:[%s1021_s2 + $0x48] sm:$0xff] }
   0x6   :  { %335 = vperm.xlu1 %632, %v309_v7   ;;  %325 = vperm.xlu0 %631, %v307_v8   ;;  %v311_v12 = vld [vmem:[%s1021_s2 + $0x20] sm:$0xff]  ;;  %v638_v18 = vld [vmem:[%s1019_s1 + $0x10] sm:$0xff]   ;;  %v318_v19 = vld [vmem:[%s1021_s2 + $0x58] sm:$0xff]  ;;  %vm480_vm0 = vcmp.eq.s32.totalorder %v818_v51, %v822_v59  ;;  %vm488_vm1 = vcmp.eq.s32.totalorder %v825_v60, %v822_v59 }
   0x7   :  { %v315_v17 = vld [vmem:[%s1021_s2 + $0x40] sm:$0xff]  ;;  %v317_v20 = vld [vmem:[%s1021_s2 + $0x50] sm:$0xff]  ;;  %v320_v21 = vld [vmem:[%s1021_s2 + $0x68] sm:$0xff] }
   0x8   :  { %v319_v22 = vld [vmem:[%s1021_s2 + $0x60] sm:$0xff]  ;;  %v639_v23 = vld [vmem:[%s1019_s1 + $0x8] sm:$0xff]   ;;  %v322_v24 = vld [vmem:[%s1021_s2 + $0x78] sm:$0xff] }
   0x9   :  { %v321_v25 = vld [vmem:[%s1021_s2 + $0x70] sm:$0xff]  ;;  %v640_v26 = vld [vmem:[%s1019_s1] sm:$0xff]   ;;  %v643_v27 = vld [vmem:[%s1020_s0 + $0x8] sm:$0xff]  }
   0xa   :  { %340 = vperm.xlu1 %632, %v310_v9   ;;  %330 = vperm.xlu0 %631, %v308_v10   ;;  %v644_v28 = vld [vmem:[%s1020_s0 + $0x28] sm:$0xff]   ;;  %v645_v29 = vld [vmem:[%s1020_s0 + $0x10] sm:$0xff]   ;;  %v647_v31 = vld [vmem:[%s1020_s0 + $0x18] sm:$0xff]  }
   0xb   :  { %585 = vmatpush3.bf16.xpose.msra.mxu0 %v634_v2  ;;  %623 = vmatpush3.bf16.xpose.msra.mxu1 %v634_v2  ;;  %v646_v30 = vld [vmem:[%s1020_s0 + $0x30] sm:$0xff]   ;;  %v648_v32 = vld [vmem:[%s1020_s0 + $0x38] sm:$0xff]  }
   0xc   :  { %586 = vmatprep.subr.bf16.mxu0 %v635_v3  ;;  %616 = vmatprep.subr.bf16.mxu1 %v635_v3 }
   0xe   :  { %350 = vperm.xlu1 %632, %v312_v11   ;;  %345 = vperm.xlu0 %631, %v311_v12  }
  0x12   :  { %360 = vperm.xlu1 %632, %v314_v14   ;;  %355 = vperm.xlu0 %631, %v313_v15  }
  0x13   :  { %587 = vmatpush3.bf16.xpose.msra.mxu0 %v635_v3  ;;  %624 = vmatpush3.bf16.xpose.msra.mxu1 %v635_v3 }
  0x14   :  { %588 = vmatprep.subr.bf16.mxu0 %v636_v6  ;;  %617 = vmatprep.subr.bf16.mxu1 %v636_v6 }
  0x16   :  { %370 = vperm.xlu1 %632, %v316_v16   ;;  %365 = vperm.xlu0 %631, %v315_v17  }
  0x1a   :  { %380 = vperm.xlu1 %632, %v318_v19   ;;  %375 = vperm.xlu0 %631, %v317_v20  }
  0x1b   :  { %589 = vmatpush3.bf16.xpose.msra.mxu0 %v636_v6  ;;  %625 = vmatpush3.bf16.xpose.msra.mxu1 %v636_v6 }
  0x1c   :  { %590 = vmatprep.subr.bf16.mxu0 %v637_v13  ;;  %618 = vmatprep.subr.bf16.mxu1 %v637_v13 }
  0x1e   :  { %390 = vperm.xlu1 %632, %v320_v21   ;;  %385 = vperm.xlu0 %631, %v319_v22  }
  0x22   :  { %400 = vperm.xlu1 %632, %v322_v24   ;;  %395 = vperm.xlu0 %631, %v321_v25  }
  0x23   :  { %591 = vmatpush3.bf16.xpose.msra.mxu0 %v637_v13  ;;  %626 = vmatpush3.bf16.xpose.msra.mxu1 %v637_v13 }
  0x24   :  { %592 = vmatprep.subr.bf16.mxu0 %v638_v18  ;;  %619 = vmatprep.subr.bf16.mxu1 %v638_v18 }
  0x2b   :  { %593 = vmatpush3.bf16.xpose.msra.mxu0 %v638_v18  ;;  %627 = vmatpush3.bf16.xpose.msra.mxu1 %v638_v18 }
  0x2c   :  { %594 = vmatprep.subr.bf16.mxu0 %v639_v23  ;;  %620 = vmatprep.subr.bf16.mxu1 %v639_v23 }
  0x33   :  { %595 = vmatpush3.bf16.xpose.msra.mxu0 %v639_v23  ;;  %628 = vmatpush3.bf16.xpose.msra.mxu1 %v639_v23  ;;  %v832_v23 = vadd.s32 64, %v813_v40 }
  0x34   :  { %596 = vmatprep.subr.bf16.mxu0 %v640_v26  ;;  %621 = vmatprep.subr.bf16.mxu1 %v640_v26 }
  0x35   :  { %vm486_vm3 = vcmp.eq.s32.totalorder %v832_v23, %v822_v59 }
  0x3b   :  { %597 = vmatpush3.bf16.xpose.msra.mxu0 %v640_v26  ;;  %629 = vmatpush3.bf16.xpose.msra.mxu1 %v640_v26 }
  0x42   :  { %599 = vmatmul.mubr.bf16.vlgmr.msra.gmra.mxu0 %v643_v27  ;;  %607 = vmatmul.mubr.bf16.vlgmr.msra.gmra.mxu1 %v644_v28 }
  0x43   :  { %602 = vmatprep.mubr.bf16.mxu0 %v645_v29  ;;  %610 = vmatprep.mubr.bf16.mxu1 %v646_v30 }
  0x4a   :  { %603 = vmatmul.mubr.bf16.gmra.mxu0 %v647_v31  ;;  %611 = vmatmul.mubr.bf16.gmra.mxu1 %v648_v32 }
  0x81   :  { %v803_v33 = vpop.permute.xlu0 %325  ;;  %v805_v34 = vpop.permute.xlu1 %335 }
  0x85   :  { %v807_v35 = vpop.permute.xlu0 %330  ;;  %v809_v37 = vpop.permute.xlu1 %340 }
  0x89   :  { %v811_v38 = vpop.permute.xlu0 %345  ;;  %v815_v46 = vpop.permute.xlu1 %350 }
  0x8d   :  { %v820_v54 = vpop.permute.xlu0 %355  ;;  %v827_v9 = vpop.permute.xlu1 %360 }
  0x91   :  { %v829_v18 = vpop.permute.xlu0 %365 }
 0x102   :  { %v600_v39 = vpop.f32.mrf.mxu0  ;;  %v608_v41 = vpop.f32.mrf.mxu1 }
 0x103   :  { %v245_v42 = vmax.f32 %v600_v39, 0.0  ;;  %v253_v43 = vmax.f32 %v608_v41, 0.0 }
 0x104   :  { %v180_v44 = vpop.f32.mrf.mxu0  ;;  %v212_v45 = vpop.f32.mrf.mxu1 }
 0x105   :  { %v261_v47 = vmul.f32 2.0, %v245_v42  ;;  %v269_v48 = vmul.f32 2.0, %v253_v43  ;;  %v243_v49 = vmax.f32 %v180_v44, 0.0  ;;  %v251_v50 = vmax.f32 %v212_v45, 0.0  ;;  %v834_v45 = vpop.permute.xlu1 %370 }
 0x106   :  { %v601_v52 = vpop.f32.mrf.mxu0  ;;  %v609_v53 = vpop.f32.mrf.mxu1 }
 0x107   :  { %v279_v55 = vmul.f32 1.442695, %v261_v47  ;;  %v295_v56 = vmul.f32 1.442695, %v269_v48  ;;  %v259_v57 = vmul.f32 2.0, %v243_v49  ;;  %v267_v58 = vmul.f32 2.0, %v251_v50 }
 0x108   :  { %v246_v61 = vmax.f32 %v601_v52, 0.0  ;;  %v254_v62 = vmax.f32 %v609_v53, 0.0  ;;  %v183_v63 = vpop.f32.mrf.mxu0  ;;  %v215_v0 = vpop.f32.mrf.mxu1  ;;  %v841_v50 = vadd.s32 24, %v813_v40 }
 0x109   :  { %649 = vpow2.f32 %v279_v55  ;;  %v275_v1 = vmul.f32 1.442695, %v259_v57  ;;  %v291_v2 = vmul.f32 1.442695, %v267_v58  ;;  %v244_v3 = vmax.f32 %v183_v63, 0.0  ;;  %v376_v55 = vpop.permute.xlu0 %375 }
 0x10a   :  { %651 = vpow2.f32 %v295_v56  ;;  %v262_v4 = vmul.f32 2.0, %v246_v61  ;;  %v270_v5 = vmul.f32 2.0, %v254_v62  ;;  %v252_v6 = vmax.f32 %v215_v0, 0.0  ;;  %v604_v7 = vpop.f32.mrf.mxu0  ;;  %v612_v8 = vpop.f32.mrf.mxu1 }
 0x10b   :  { %653 = vpow2.f32 %v275_v1  ;;  %v260_v10 = vmul.f32 2.0, %v244_v3  ;;  %v249_v11 = vmax.f32 %v604_v7, 0.0  ;;  %v257_v12 = vmax.f32 %v612_v8, 0.0  ;;  %v852_v1 = vld [vmem:[%s1022_s3] ss:$0 sm:$0xff]  ;;  %v381_v7 = vpop.permute.xlu1 %380 }
 0x10c   :  { %655 = vpow2.f32 %v291_v2  ;;  %v281_v13 = vmul.f32 1.442695, %v262_v4  ;;  %v297_v14 = vmul.f32 1.442695, %v270_v5  ;;  %v268_v15 = vmul.f32 2.0, %v252_v6  ;;  %v196_v16 = vpop.f32.mrf.mxu0  ;;  %v228_v17 = vpop.f32.mrf.mxu1 }
 0x10d   :  { %v277_v19 = vmul.f32 1.442695, %v260_v10  ;;  %v265_v20 = vmul.f32 2.0, %v249_v11  ;;  %v273_v21 = vmul.f32 2.0, %v257_v12  ;;  %v247_v22 = vmax.f32 %v196_v16, 0.0 }
 0x10e   :  { %657 = vpow2.f32 %v281_v13  ;;  %v293_v24 = vmul.f32 1.442695, %v268_v15  ;;  %v255_v25 = vmax.f32 %v228_v17, 0.0  ;;  %v605_v26 = vpop.f32.mrf.mxu0  ;;  %v613_v27 = vpop.f32.mrf.mxu1  ;;  %v844_v56 = vadd.s32 88, %v813_v40 }
 0x10f   :  { %659 = vpow2.f32 %v297_v14  ;;  %v287_v28 = vmul.f32 1.442695, %v265_v20  ;;  %v303_v29 = vmul.f32 1.442695, %v273_v21  ;;  %v263_v30 = vmul.f32 2.0, %v247_v22  ;;  %v386_v15 = vpop.permute.xlu0 %385 }
 0x110   :  { %661 = vpow2.f32 %v277_v19  ;;  %v271_v31 = vmul.f32 2.0, %v255_v25  ;;  %v250_v32 = vmax.f32 %v605_v26, 0.0  ;;  %v258_v36 = vmax.f32 %v613_v27, 0.0  ;;  %v199_v39 = vpop.f32.mrf.mxu0  ;;  %v231_v41 = vpop.f32.mrf.mxu1 }
 0x111   :  { %663 = vpow2.f32 %v293_v24  ;;  %v283_v42 = vmul.f32 1.442695, %v263_v30  ;;  %v248_v43 = vmax.f32 %v199_v39, 0.0  ;;  %v256_v44 = vmax.f32 %v231_v41, 0.0 }
 0x112   :  { %665 = vpow2.f32 %v287_v28  ;;  %v299_v47 = vmul.f32 1.442695, %v271_v31  ;;  %v266_v48 = vmul.f32 2.0, %v250_v32  ;;  %v274_v49 = vmul.f32 2.0, %v258_v36  ;;  %v391_v32 = vpop.permute.xlu1 %390 }
 0x113   :  { %667 = vpow2.f32 %v303_v29  ;;  %v264_v52 = vmul.f32 2.0, %v248_v43  ;;  %v272_v53 = vmul.f32 2.0, %v256_v44  ;;  %v847_v61 = vadd.s32 8, %v813_v40 }
 0x114   :  { %669 = vpow2.f32 %v283_v42  ;;  %v289_v57 = vmul.f32 1.442695, %v266_v48  ;;  %v305_v58 = vmul.f32 1.442695, %v274_v49  ;;  %v859_v2 = vadd.s32 72, %v813_v40  ;;  %v396_v49 = vpop.permute.xlu0 %395 }
 0x115   :  { %671 = vpow2.f32 %v299_v47  ;;  %v285_v62 = vmul.f32 1.442695, %v264_v52  ;;  %v301_v63 = vmul.f32 1.442695, %v272_v53  ;;  %vm481_vm4 = vcmp.eq.s32.totalorder %v841_v50, %v822_v59 }
 0x116   :  { %v650_v0 = vpop.eup %649  ;;  %673 = vpow2.f32 %v289_v57  ;;  %v865_v5 = vadd.s32 48, %v813_v40  ;;  %vm489_vm5 = vcmp.eq.s32.totalorder %v844_v56, %v822_v59  ;;  %v870_v10 = vadd.s32 112, %v813_v40 }
 0x117   :  { %v652_v3 = vpop.eup %651  ;;  %v405_v4 = vmul.f32 %v650_v0, %v805_v34  ;;  %675 = vpow2.f32 %v305_v58  ;;  %vm479_vm6 = vcmp.eq.s32.totalorder %v847_v61, %v822_v59  ;;  %v877_v13 = vadd.s32 32, %v813_v40 }
 0x118   :  { %v654_v6 = vpop.eup %653  ;;  %v413_v8 = vmul.f32 %v652_v3, %v376_v55  ;;  %677 = vpow2.f32 %v285_v62  ;;  %vm487_vm7 = vcmp.eq.s32.totalorder %v859_v2, %v822_v59  ;;  %v884_v17 = vadd.s32 96, %v813_v40 }
 0x119   :  { %v656_v11 = vpop.eup %655  ;;  %v428_v34 = vmul.f32 %v852_v1, %v405_v4  ;;  %v403_v12 = vmul.f32 %v654_v6, %v803_v33  ;;  %679 = vpow2.f32 %v301_v63  ;;  %vm484_vm8 = vcmp.eq.s32.totalorder %v865_v5, %v822_v59 }
 0x11a   :  { %v436_v14 = vmul.f32 %v852_v1, %v413_v8  ;;  %v411_v16 = vmul.f32 %v656_v11, %v829_v18  ;;  %v890_v21 = vadd.s32 56, %v813_v40  ;;  %vm492_vm9 = vcmp.eq.s32.totalorder %v870_v10, %v822_v59  ;;  %v401_v11 = vpop.permute.xlu1 %400 }
 0x11b   :  { %v658_v19 = vpop.eup %657  ;;  %v444_v33 = vmul.f32 -0.5, %v428_v34  ;;  %v426_v20 = vmul.f32 %v852_v1, %v403_v12  ;;  %vm482_vm10 = vcmp.eq.s32.totalorder %v877_v13, %v822_v59  ;;  %v902_v30 = vadd.s32 120, %v813_v40 }
 0x11c   :  { %v660_v22 = vpop.eup %659  ;;  %v452_v24 = vmul.f32 -0.5, %v436_v14  ;;  %v434_v18 = vmul.f32 %v852_v1, %v411_v16  ;;  %v406_v25 = vmul.f32 %v658_v19, %v809_v37  ;;  %vm490_vm11 = vcmp.eq.s32.totalorder %v884_v17, %v822_v59 }
 0x11d   :  { %v662_v26 = vpop.eup %661  ;;  %v515_v27 = vsel %vm480_vm0, 1.0, %v444_v33  ;;  %v442_v28 = vmul.f32 -0.5, %v426_v20  ;;  %v414_v29 = vmul.f32 %v660_v22, %v381_v7  ;;  %vm485_vm12 = vcmp.eq.s32.totalorder %v890_v21, %v822_v59 }
 0x11e   :  { %v664_v31 = vpop.eup %663  ;;  %531 = vst [vmem:[%s1023_s4 + $0x10] sm:$0xff] %v515_v27  ;;  %v523_v37 = vsel %vm488_vm1, 1.0, %v452_v24  ;;  %v450_v51 = vmul.f32 -0.5, %v434_v18  ;;  %v429_v36 = vmul.f32 %v852_v1, %v406_v25  ;;  %v404_v39 = vmul.f32 %v662_v26, %v807_v35 }
 0x11f   :  { %v666_v41 = vpop.eup %665  ;;  %539 = vst [vmem:[%s1023_s4 + $0x50] sm:$0xff] %v523_v37  ;;  %v513_v42 = vsel %vm478_vm2, 1.0, %v442_v28  ;;  %v437_v60 = vmul.f32 %v852_v1, %v414_v29  ;;  %v412_v43 = vmul.f32 %v664_v31, %v834_v45  ;;  %v925_v35 = vadd.s32 40, %v813_v40 }
 0x120   :  { %v668_v44 = vpop.eup %667  ;;  %529 = vst [vmem:[%s1023_s4] sm:$0xff] %v513_v42  ;;  %v521_v47 = vsel %vm486_vm3, 1.0, %v450_v51  ;;  %v445_v48 = vmul.f32 -0.5, %v429_v36  ;;  %v427_v52 = vmul.f32 %v852_v1, %v404_v39  ;;  %v409_v45 = vmul.f32 %v666_v41, %v820_v54 }
 0x121   :  { %v670_v53 = vpop.eup %669  ;;  %537 = vst [vmem:[%s1023_s4 + $0x40] sm:$0xff] %v521_v47  ;;  %v453_v55 = vmul.f32 -0.5, %v437_v60  ;;  %v435_v57 = vmul.f32 %v852_v1, %v412_v43  ;;  %v417_v58 = vmul.f32 %v668_v44, %v396_v49  ;;  %v472_v62 = vadd.s32 104, %v813_v40 }
 0x122   :  { %v672_v63 = vpop.eup %671  ;;  %v516_v23 = vsel %vm481_vm4, 1.0, %v445_v48  ;;  %v443_v0 = vmul.f32 -0.5, %v427_v52  ;;  %v432_v3 = vmul.f32 %v852_v1, %v409_v45  ;;  %v407_v54 = vmul.f32 %v670_v53, %v811_v38 }
 0x123   :  { %v674_v4 = vpop.eup %673  ;;  %532 = vst [vmem:[%s1023_s4 + $0x18] sm:$0xff] %v516_v23  ;;  %v524_v6 = vsel %vm489_vm5, 1.0, %v453_v55  ;;  %v451_v40 = vmul.f32 -0.5, %v435_v57  ;;  %v440_v7 = vmul.f32 %v852_v1, %v417_v58  ;;  %v415_v8 = vmul.f32 %v672_v63, %v386_v15 }
 0x124   :  { %v676_v50 = vpop.eup %675  ;;  %540 = vst [vmem:[%s1023_s4 + $0x58] sm:$0xff] %v524_v6  ;;  %v514_v38 = vsel %vm479_vm6, 1.0, %v443_v0  ;;  %v448_v34 = vmul.f32 -0.5, %v432_v3  ;;  %v430_v12 = vmul.f32 %v852_v1, %v407_v54  ;;  %v410_v56 = vmul.f32 %v674_v4, %v827_v9 }
 0x125   :  { %v678_v14 = vpop.eup %677  ;;  %530 = vst [vmem:[%s1023_s4 + $0x8] sm:$0xff] %v514_v38  ;;  %v522_v15 = vsel %vm487_vm7, 1.0, %v451_v40  ;;  %v456_v16 = vmul.f32 -0.5, %v440_v7  ;;  %v438_v19 = vmul.f32 %v852_v1, %v415_v8  ;;  %v418_v33 = vmul.f32 %v676_v50, %v401_v11 }
 0x126   :  { %v680_v61 = vpop.eup %679  ;;  %538 = vst [vmem:[%s1023_s4 + $0x48] sm:$0xff] %v522_v15  ;;  %v519_v9 = vsel %vm484_vm8, 1.0, %v448_v34  ;;  %v446_v20 = vmul.f32 -0.5, %v430_v12  ;;  %v433_v22 = vmul.f32 %v852_v1, %v410_v56  ;;  %v408_v24 = vmul.f32 %v678_v14, %v815_v46 }
 0x127   :  { %535 = vst [vmem:[%s1023_s4 + $0x30] sm:$0xff] %v519_v9  ;;  %v527_v2 = vsel %vm492_vm9, 1.0, %v456_v16  ;;  %v454_v18 = vmul.f32 -0.5, %v438_v19  ;;  %v441_v25 = vmul.f32 %v852_v1, %v418_v33  ;;  %v416_v26 = vmul.f32 %v680_v61, %v391_v32 }
 0x128   :  { %543 = vst [vmem:[%s1023_s4 + $0x70] sm:$0xff] %v527_v2  ;;  %v517_v46 = vsel %vm482_vm10, 1.0, %v446_v20  ;;  %v449_v5 = vmul.f32 -0.5, %v433_v22  ;;  %vm493_vm13 = vcmp.eq.s32.totalorder %v902_v30, %v822_v59  ;;  %v431_v27 = vmul.f32 %v852_v1, %v408_v24 }
 0x129   :  { %533 = vst [vmem:[%s1023_s4 + $0x20] sm:$0xff] %v517_v46  ;;  %v525_v10 = vsel %vm490_vm11, 1.0, %v454_v18  ;;  %v457_v28 = vmul.f32 -0.5, %v441_v25  ;;  %vm483_vm14 = vcmp.eq.s32.totalorder %v925_v35, %v822_v59  ;;  %v439_v13 = vmul.f32 %v852_v1, %v416_v26 }
 0x12a   :  { %541 = vst [vmem:[%s1023_s4 + $0x60] sm:$0xff] %v525_v10  ;;  %v520_v29 = vsel %vm485_vm12, 1.0, %v449_v5  ;;  %v447_v30 = vmul.f32 -0.5, %v431_v27  ;;  %vm491_vm15 = vcmp.eq.s32.totalorder %v472_v62, %v822_v59 }
 0x12b   :  { %536 = vst [vmem:[%s1023_s4 + $0x38] sm:$0xff] %v520_v29  ;;  %v528_v17 = vsel %vm493_vm13, 1.0, %v457_v28  ;;  %v455_v31 = vmul.f32 -0.5, %v439_v13 }
 0x12c   :  { %544 = vst [vmem:[%s1023_s4 + $0x78] sm:$0xff] %v528_v17  ;;  %v518_v1 = vsel %vm483_vm14, 1.0, %v447_v30 }
 0x12d   :  { %534 = vst [vmem:[%s1023_s4 + $0x28] sm:$0xff] %v518_v1  ;;  %v526_v21 = vsel %vm491_vm15, 1.0, %v455_v31 }
 0x12e   :  { %542 = vst [vmem:[%s1023_s4 + $0x68] sm:$0xff] %v526_v21 }

// kernel: manifold_loss.5
= control target key start
LH: loop header
LB: loop body
LE: loop exit
PB: predicated region body
PF: predicated region fallthrough
CT: control target
= control target key end

     0   :  { %vm400_vm0 = vcmask 7168   ;;  %v631_v16 = vmov 0.0   ;;  %v301_v29 = vlaneseq  ;;  %s947_s1 = inlined_call_operand.vmem [shape: bf16[128,128], index: 1, kind: input, shape index: {}, may-alias: {0,1}]   ;;  %s948_s0 = inlined_call_operand.vmem [shape: bf16[128,128], index: 0, kind: input, shape index: {}, may-alias: {0,1}]   ;;  %s949_s2 = inlined_call_operand.vmem [shape: f32[128,1], index: 2, kind: output, shape index: {}]  }
   0x1   :  { %v583_v0 = vld [vmem:[%s947_s1 + $0x38] sm:$0xff]   ;;  %v584_v1 = vld [vmem:[%s947_s1 + $0x30] sm:$0xff]   ;;  %v585_v2 = vld [vmem:[%s947_s1 + $0x28] sm:$0xff]   ;;  %411 = vst.msk [vmem:[%s949_s2 + $0x50] sm:$0xff] %vm400_vm0, %v631_v16 }
   0x2   :  { %534 = vmatprep.subr.bf16.mxu0 %v583_v0  ;;  %566 = vmatprep.subr.bf16.mxu1 %v583_v0  ;;  %v591_v3 = vld [vmem:[%s948_s0] sm:$0xff]   ;;  %v587_v6 = vld [vmem:[%s947_s1 + $0x18] sm:$0xff]   ;;  %v588_v7 = vld [vmem:[%s947_s1 + $0x10] sm:$0xff]   ;;  %401 = vst.msk [vmem:[%s949_s2] sm:$0xff] %vm400_vm0, %v631_v16  ;;  %v759_v48 = vshrl.u32 %v301_v29, 7 }
   0x3   :  { %535 = vmatpush3.bf16.xpose.msra.mxu0 %v583_v0  ;;  %574 = vmatpush3.bf16.xpose.msra.mxu1 %v583_v0  ;;  %v592_v4 = vld [vmem:[%s948_s0 + $0x20] sm:$0xff]   ;;  %v589_v8 = vld [vmem:[%s947_s1 + $0x8] sm:$0xff]   ;;  %v595_v12 = vld [vmem:[%s948_s0 + $0x10] sm:$0xff]   ;;  %402 = vst.msk [vmem:[%s949_s2 + $0x8] sm:$0xff] %vm400_vm0, %v631_v16 }
   0x4   :  { %536 = vmatprep.subr.bf16.mxu0 %v584_v1  ;;  %567 = vmatprep.subr.bf16.mxu1 %v584_v1  ;;  %v586_v5 = vld [vmem:[%s947_s1 + $0x20] sm:$0xff]   ;;  %v593_v10 = vld [vmem:[%s948_s0 + $0x8] sm:$0xff]   ;;  %v597_v13 = vld [vmem:[%s948_s0 + $0x30] sm:$0xff]   ;;  %403 = vst.msk [vmem:[%s949_s2 + $0x10] sm:$0xff] %vm400_vm0, %v631_v16  ;;  %v312_v61 = vadd.s32 80, %v759_v48 }
   0x5   :  { %550 = vmatprep.mubr.bf16.mxu0 %v591_v3  ;;  %558 = vmatprep.mubr.bf16.mxu1 %v592_v4  ;;  %v590_v9 = vld [vmem:[%s947_s1] sm:$0xff]   ;;  %v594_v11 = vld [vmem:[%s948_s0 + $0x28] sm:$0xff]   ;;  %v596_v14 = vld [vmem:[%s948_s0 + $0x18] sm:$0xff]   ;;  %404 = vst.msk [vmem:[%s949_s2 + $0x18] sm:$0xff] %vm400_vm0, %v631_v16  ;;  %v304_v3 = vadd.s32 16, %v759_v48 }
   0x6   :  { %v598_v15 = vld [vmem:[%s948_s0 + $0x38] sm:$0xff]   ;;  %405 = vst.msk [vmem:[%s949_s2 + $0x20] sm:$0xff] %vm400_vm0, %v631_v16  ;;  %406 = vst.msk [vmem:[%s949_s2 + $0x28] sm:$0xff] %vm400_vm0, %v631_v16 }
   0x7   :  { %407 = vst.msk [vmem:[%s949_s2 + $0x30] sm:$0xff] %vm400_vm0, %v631_v16  ;;  %408 = vst.msk [vmem:[%s949_s2 + $0x38] sm:$0xff] %vm400_vm0, %v631_v16 }
   0x8   :  { %409 = vst.msk [vmem:[%s949_s2 + $0x40] sm:$0xff] %vm400_vm0, %v631_v16  ;;  %410 = vst.msk [vmem:[%s949_s2 + $0x48] sm:$0xff] %vm400_vm0, %v631_v16 }
   0x9   :  { %412 = vst.msk [vmem:[%s949_s2 + $0x58] sm:$0xff] %vm400_vm0, %v631_v16  ;;  %413 = vst.msk [vmem:[%s949_s2 + $0x60] sm:$0xff] %vm400_vm0, %v631_v16 }
   0xa   :  { %414 = vst.msk [vmem:[%s949_s2 + $0x68] sm:$0xff] %vm400_vm0, %v631_v16  ;;  %415 = vst.msk [vmem:[%s949_s2 + $0x70] sm:$0xff] %vm400_vm0, %v631_v16 }
   0xb   :  { %537 = vmatpush3.bf16.xpose.msra.mxu0 %v584_v1  ;;  %575 = vmatpush3.bf16.xpose.msra.mxu1 %v584_v1  ;;  %416 = vst.msk [vmem:[%s949_s2 + $0x78] sm:$0xff] %vm400_vm0, %v631_v16 }
   0xc   :  { %538 = vmatprep.subr.bf16.mxu0 %v585_v2  ;;  %568 = vmatprep.subr.bf16.mxu1 %v585_v2 }
  0x13   :  { %539 = vmatpush3.bf16.xpose.msra.mxu0 %v585_v2  ;;  %576 = vmatpush3.bf16.xpose.msra.mxu1 %v585_v2  ;;  %v762_v2 = vand.u32 127, %v301_v29 }
  0x14   :  { %540 = vmatprep.subr.bf16.mxu0 %v586_v5  ;;  %569 = vmatprep.subr.bf16.mxu1 %v586_v5 }
  0x15   :  { %vm331_vm1 = vcmp.eq.s32.totalorder %v312_v61, %v762_v2  ;;  %vm376_vm2 = vcmp.ge.s32.totalorder %v762_v2, 12  ;;  %vm323_vm3 = vcmp.eq.s32.totalorder %v304_v3, %v762_v2  ;;  %vm321_vm4 = vcmp.eq.s32.totalorder %v759_v48, %v762_v2 }
  0x1b   :  { %541 = vmatpush3.bf16.xpose.msra.mxu0 %v586_v5  ;;  %577 = vmatpush3.bf16.xpose.msra.mxu1 %v586_v5 }
  0x1c   :  { %542 = vmatprep.subr.bf16.mxu0 %v587_v6  ;;  %570 = vmatprep.subr.bf16.mxu1 %v587_v6 }
  0x23   :  { %543 = vmatpush3.bf16.xpose.msra.mxu0 %v587_v6  ;;  %578 = vmatpush3.bf16.xpose.msra.mxu1 %v587_v6 }
  0x24   :  { %544 = vmatprep.subr.bf16.mxu0 %v588_v7  ;;  %571 = vmatprep.subr.bf16.mxu1 %v588_v7 }
  0x2b   :  { %545 = vmatpush3.bf16.xpose.msra.mxu0 %v588_v7  ;;  %579 = vmatpush3.bf16.xpose.msra.mxu1 %v588_v7 }
  0x2c   :  { %546 = vmatprep.subr.bf16.mxu0 %v589_v8  ;;  %572 = vmatprep.subr.bf16.mxu1 %v589_v8 }
  0x33   :  { %547 = vmatpush3.bf16.xpose.msra.mxu0 %v589_v8  ;;  %580 = vmatpush3.bf16.xpose.msra.mxu1 %v589_v8 }
  0x34   :  { %548 = vmatprep.subr.bf16.mxu0 %v590_v9  ;;  %573 = vmatprep.subr.bf16.mxu1 %v590_v9 }
  0x3b   :  { %549 = vmatpush3.bf16.xpose.msra.mxu0 %v590_v9  ;;  %581 = vmatpush3.bf16.xpose.msra.mxu1 %v590_v9 }
  0x42   :  { %551 = vmatmul.mubr.bf16.vlgmr.msra.gmra.mxu0 %v593_v10  ;;  %559 = vmatmul.mubr.bf16.vlgmr.msra.gmra.mxu1 %v594_v11  ;;  %v305_v10 = vadd.s32 24, %v759_v48 }
  0x43   :  { %554 = vmatprep.mubr.bf16.mxu0 %v595_v12  ;;  %562 = vmatprep.mubr.bf16.mxu1 %v597_v13 }
  0x44   :  { %vm324_vm5 = vcmp.eq.s32.totalorder %v305_v10, %v762_v2 }
  0x4a   :  { %555 = vmatmul.mubr.bf16.gmra.mxu0 %v596_v14  ;;  %563 = vmatmul.mubr.bf16.gmra.mxu1 %v598_v15 }
 0x102   :  { %v552_v17 = vpop.f32.mrf.mxu0  ;;  %v560_v18 = vpop.f32.mrf.mxu1 }
 0x103   :  { %v239_v19 = vmax.f32 %v552_v17, 0.0  ;;  %v247_v20 = vmax.f32 %v560_v18, 0.0 }
 0x104   :  { %v174_v21 = vpop.f32.mrf.mxu0  ;;  %v206_v22 = vpop.f32.mrf.mxu1 }
 0x105   :  { %v255_v23 = vmul.f32 2.0, %v239_v19  ;;  %v263_v24 = vmul.f32 2.0, %v247_v20  ;;  %v237_v25 = vmax.f32 %v174_v21, 0.0  ;;  %v245_v26 = vmax.f32 %v206_v22, 0.0 }
 0x106   :  { %v553_v27 = vpop.f32.mrf.mxu0  ;;  %v561_v28 = vpop.f32.mrf.mxu1  ;;  %v310_v20 = vadd.s32 64, %v759_v48  ;;  %v313_v21 = vadd.s32 88, %v759_v48 }
 0x107   :  { %v273_v30 = vmul.f32 1.442695, %v255_v23  ;;  %v289_v31 = vmul.f32 1.442695, %v263_v24  ;;  %v253_v32 = vmul.f32 2.0, %v237_v25  ;;  %v261_v33 = vmul.f32 2.0, %v245_v26 }
 0x108   :  { %v240_v34 = vmax.f32 %v553_v27, 0.0  ;;  %v248_v35 = vmax.f32 %v561_v28, 0.0  ;;  %v177_v36 = vpop.f32.mrf.mxu0  ;;  %v209_v37 = vpop.f32.mrf.mxu1  ;;  %vm329_vm6 = vcmp.eq.s32.totalorder %v310_v20, %v762_v2  ;;  %vm332_vm7 = vcmp.eq.s32.totalorder %v313_v21, %v762_v2  ;;  %v419_v20 = vld [vmem:[%s949_s2 + $0x10] sm:$0xff] }
 0x109   :  { %599 = vpow2.f32 %v273_v30  ;;  %v269_v38 = vmul.f32 1.442695, %v253_v32  ;;  %v285_v39 = vmul.f32 1.442695, %v261_v33  ;;  %v238_v40 = vmax.f32 %v177_v36, 0.0  ;;  %v427_v21 = vld [vmem:[%s949_s2 + $0x50] sm:$0xff] }
 0x10a   :  { %601 = vpow2.f32 %v289_v31  ;;  %v256_v41 = vmul.f32 2.0, %v240_v34  ;;  %v264_v42 = vmul.f32 2.0, %v248_v35  ;;  %v246_v43 = vmax.f32 %v209_v37, 0.0  ;;  %v556_v44 = vpop.f32.mrf.mxu0  ;;  %v564_v45 = vpop.f32.mrf.mxu1 }
 0x10b   :  { %603 = vpow2.f32 %v269_v38  ;;  %v254_v46 = vmul.f32 2.0, %v238_v40  ;;  %v243_v47 = vmax.f32 %v556_v44, 0.0  ;;  %v251_v12 = vmax.f32 %v564_v45, 0.0 }
 0x10c   :  { %v275_v49 = vmul.f32 1.442695, %v256_v41  ;;  %v291_v50 = vmul.f32 1.442695, %v264_v42  ;;  %v262_v51 = vmul.f32 2.0, %v246_v43  ;;  %v190_v52 = vpop.f32.mrf.mxu0  ;;  %v222_v53 = vpop.f32.mrf.mxu1  ;;  %605 = vpow2.f32 %v285_v39 }
 0x10d   :  { %v271_v54 = vmul.f32 1.442695, %v254_v46  ;;  %v259_v55 = vmul.f32 2.0, %v243_v47  ;;  %v241_v56 = vmax.f32 %v190_v52, 0.0  ;;  %v249_v0 = vmax.f32 %v222_v53, 0.0 }
 0x10e   :  { %607 = vpow2.f32 %v275_v49  ;;  %v287_v57 = vmul.f32 1.442695, %v262_v51  ;;  %v557_v58 = vpop.f32.mrf.mxu0  ;;  %v565_v59 = vpop.f32.mrf.mxu1  ;;  %v267_v25 = vmul.f32 2.0, %v251_v12  ;;  %v311_v33 = vadd.s32 72, %v759_v48 }
 0x10f   :  { %609 = vpow2.f32 %v291_v50  ;;  %v244_v60 = vmax.f32 %v557_v58, 0.0  ;;  %v281_v62 = vmul.f32 1.442695, %v259_v55  ;;  %v257_v4 = vmul.f32 2.0, %v241_v56 }
 0x110   :  { %v193_v63 = vpop.f32.mrf.mxu0  ;;  %v225_v1 = vpop.f32.mrf.mxu1  ;;  %611 = vpow2.f32 %v271_v54  ;;  %v265_v13 = vmul.f32 2.0, %v249_v0  ;;  %v252_v16 = vmax.f32 %v565_v59, 0.0  ;;  %v303_v34 = vadd.s32 8, %v759_v48 }
 0x111   :  { %v260_v5 = vmul.f32 2.0, %v244_v60  ;;  %v242_v6 = vmax.f32 %v193_v63, 0.0  ;;  %613 = vpow2.f32 %v287_v57  ;;  %v250_v7 = vmax.f32 %v225_v1, 0.0 }
 0x112   :  { %615 = vpow2.f32 %v281_v62  ;;  %v277_v11 = vmul.f32 1.442695, %v257_v4  ;;  %v293_v26 = vmul.f32 1.442695, %v265_v13  ;;  %v268_v29 = vmul.f32 2.0, %v252_v16 }
 0x113   :  { %v283_v8 = vmul.f32 1.442695, %v260_v5  ;;  %v258_v9 = vmul.f32 2.0, %v242_v6  ;;  %v266_v17 = vmul.f32 2.0, %v250_v7  ;;  %v297_v37 = vmul.f32 1.442695, %v267_v25 }
 0x114   :  { %v299_v41 = vmul.f32 1.442695, %v268_v29  ;;  %vm330_vm8 = vcmp.eq.s32.totalorder %v311_v33, %v762_v2  ;;  %vm322_vm9 = vcmp.eq.s32.totalorder %v303_v34, %v762_v2  ;;  %v308_v45 = vadd.s32 48, %v759_v48 }
 0x115   :  { %617 = vpow2.f32 %v283_v8  ;;  %v279_v15 = vmul.f32 1.442695, %v258_v9  ;;  %v295_v30 = vmul.f32 1.442695, %v266_v17  ;;  %v309_v46 = vadd.s32 56, %v759_v48 }
 0x116   :  { %v600_v14 = vpop.eup %599  ;;  %619 = vpow2.f32 %v277_v11  ;;  %vm327_vm10 = vcmp.eq.s32.totalorder %v308_v45, %v762_v2  ;;  %v306_v54 = vadd.s32 32, %v759_v48  ;;  %v307_v55 = vadd.s32 40, %v759_v48 }
 0x117   :  { %v602_v18 = vpop.eup %601  ;;  %v358_v19 = vsel %vm323_vm3, 0.0, %v600_v14  ;;  %621 = vpow2.f32 %v279_v15  ;;  %vm328_vm11 = vcmp.eq.s32.totalorder %v309_v46, %v762_v2  ;;  %v314_v62 = vadd.s32 96, %v759_v48 }
 0x118   :  { %v604_v22 = vpop.eup %603  ;;  %v366_v23 = vsel %vm331_vm1, 0.0, %v602_v18  ;;  %v383_v24 = vsel %vm376_vm2, 0.0, %v358_v19  ;;  %623 = vpow2.f32 %v293_v26  ;;  %vm325_vm12 = vcmp.eq.s32.totalorder %v306_v54, %v762_v2  ;;  %v420_v26 = vld [vmem:[%s949_s2 + $0x18] sm:$0xff] }
 0x119   :  { %v391_v27 = vsel %vm376_vm2, 0.0, %v366_v23  ;;  %437 = vadd.xlane.f32.xlu1 %v383_v24  ;;  %v606_v28 = vpop.eup %605  ;;  %v356_v31 = vsel %vm321_vm4, 0.0, %v604_v22  ;;  %625 = vpow2.f32 %v295_v30  ;;  %vm326_vm13 = vcmp.eq.s32.totalorder %v307_v55, %v762_v2 }
 0x11a   :  { %453 = vadd.xlane.f32.xlu0 %v391_v27  ;;  %v381_v38 = vsel %vm376_vm2, 0.0, %v356_v31  ;;  %v364_v42 = vsel %vm329_vm6, 0.0, %v606_v28  ;;  %627 = vpow2.f32 %v297_v37  ;;  %v315_v63 = vadd.s32 104, %v759_v48  ;;  %v425_v31 = vld [vmem:[%s949_s2 + $0x40] sm:$0xff]  ;;  %v426_v37 = vld [vmem:[%s949_s2 + $0x48] sm:$0xff] }
 0x11b   :  { %v608_v32 = vpop.eup %607  ;;  %v389_v47 = vsel %vm376_vm2, 0.0, %v364_v42  ;;  %629 = vpow2.f32 %v299_v41  ;;  %vm333_vm14 = vcmp.eq.s32.totalorder %v314_v62, %v762_v2  ;;  %v316_v7 = vadd.s32 112, %v759_v48  ;;  %v431_v62 = vld [vmem:[%s949_s2 + $0x70] sm:$0xff] }
 0x11c   :  { %v610_v35 = vpop.eup %609  ;;  %v359_v36 = vsel %vm324_vm5, 0.0, %v608_v32  ;;  %vm334_vm15 = vcmp.eq.s32.totalorder %v315_v63, %v762_v2  ;;  %v317_v8 = vadd.s32 120, %v759_v48  ;;  %v428_v32 = vld [vmem:[%s949_s2 + $0x58] sm:$0xff] }
 0x11d   :  { %v384_v39 = vsel %vm376_vm2, 0.0, %v359_v36  ;;  %v612_v40 = vpop.eup %611  ;;  %v367_v43 = vsel %vm332_vm7, 0.0, %v610_v35  ;;  %vm335_vm1 = vcmp.eq.s32.totalorder %v316_v7, %v762_v2  ;;  %v432_v63 = vld [vmem:[%s949_s2 + $0x78] sm:$0xff] }
 0x11e   :  { %433 = vadd.xlane.f32.xlu0 %v381_v38  ;;  %439 = vadd.xlane.f32.xlu1 %v384_v39  ;;  %v614_v44 = vpop.eup %613  ;;  %v392_v49 = vsel %vm376_vm2, 0.0, %v367_v43  ;;  %v357_v52 = vsel %vm322_vm9, 0.0, %v612_v40  ;;  %vm336_vm3 = vcmp.eq.s32.totalorder %v317_v8, %v762_v2  ;;  %v417_v2 = vld [vmem:[%s949_s2] sm:$0xff]  ;;  %v418_v38 = vld [vmem:[%s949_s2 + $0x8] sm:$0xff]  ;;  %v423_v43 = vld [vmem:[%s949_s2 + $0x30] sm:$0xff] }
 0x11f   :  { %v616_v50 = vpop.eup %615  ;;  %v365_v51 = vsel %vm330_vm8, 0.0, %v614_v44  ;;  %v382_v57 = vsel %vm376_vm2, 0.0, %v357_v52  ;;  %v424_v44 = vld [vmem:[%s949_s2 + $0x38] sm:$0xff] }
 0x120   :  { %v390_v56 = vsel %vm376_vm2, 0.0, %v365_v51  ;;  %v362_v59 = vsel %vm327_vm10, 0.0, %v616_v50  ;;  %v421_v50 = vld [vmem:[%s949_s2 + $0x20] sm:$0xff]  ;;  %v422_v51 = vld [vmem:[%s949_s2 + $0x28] sm:$0xff] }
 0x121   :  { %v387_v0 = vsel %vm376_vm2, 0.0, %v362_v59 }
 0x122   :  { %449 = vadd.xlane.f32.xlu0 %v389_v47  ;;  %455 = vadd.xlane.f32.xlu1 %v392_v49  ;;  %v618_v53 = vpop.eup %617 }
 0x123   :  { %v620_v58 = vpop.eup %619  ;;  %v363_v60 = vsel %vm328_vm11, 0.0, %v618_v53 }
 0x124   :  { %v622_v61 = vpop.eup %621  ;;  %v388_v1 = vsel %vm376_vm2, 0.0, %v363_v60  ;;  %v360_v4 = vsel %vm325_vm12, 0.0, %v620_v58 }
 0x125   :  { %v624_v3 = vpop.eup %623  ;;  %v361_v5 = vsel %vm326_vm13, 0.0, %v622_v61  ;;  %v385_v9 = vsel %vm376_vm2, 0.0, %v360_v4 }
 0x126   :  { %451 = vadd.xlane.f32.xlu1 %v390_v56  ;;  %435 = vadd.xlane.f32.xlu0 %v382_v57  ;;  %v626_v6 = vpop.eup %625  ;;  %v386_v10 = vsel %vm376_vm2, 0.0, %v361_v5  ;;  %v368_v12 = vsel %vm333_vm14, 0.0, %v624_v3  ;;  %v429_v56 = vld [vmem:[%s949_s2 + $0x60] sm:$0xff]  ;;  %v430_v57 = vld [vmem:[%s949_s2 + $0x68] sm:$0xff] }
 0x127   :  { %v628_v11 = vpop.eup %627  ;;  %v369_v13 = vsel %vm334_vm15, 0.0, %v626_v6  ;;  %v393_v15 = vsel %vm376_vm2, 0.0, %v368_v12 }
 0x128   :  { %v630_v14 = vpop.eup %629  ;;  %v394_v48 = vsel %vm376_vm2, 0.0, %v369_v13  ;;  %v370_v16 = vsel %vm335_vm1, 0.0, %v628_v11 }
 0x129   :  { %v371_v17 = vsel %vm336_vm3, 0.0, %v630_v14  ;;  %v395_v18 = vsel %vm376_vm2, 0.0, %v370_v16 }
 0x12a   :  { %445 = vadd.xlane.f32.xlu0 %v387_v0  ;;  %447 = vadd.xlane.f32.xlu1 %v388_v1  ;;  %v396_v19 = vsel %vm376_vm2, 0.0, %v371_v17 }
 0x12e   :  { %441 = vadd.xlane.f32.xlu0 %v385_v9  ;;  %443 = vadd.xlane.f32.xlu1 %v386_v10 }
 0x132   :  { %457 = vadd.xlane.f32.xlu0 %v393_v15  ;;  %459 = vadd.xlane.f32.xlu1 %v394_v48 }
 0x136   :  { %461 = vadd.xlane.f32.xlu0 %v395_v18  ;;  %463 = vadd.xlane.f32.xlu1 %v396_v19 }
 0x1a2   :  { %v438_v22 = vpop.xlane.xlu1 %437 }
 0x1a3   :  { %v454_v23 = vpop.xlane.xlu0 %453  ;;  %v467_v24 = vadd.f32 %v438_v22, %v419_v20 }
 0x1a4   :  { %v475_v25 = vadd.f32 %v454_v23, %v427_v21 }
 0x1a5   :  { %484 = vst.msk [vmem:[%s949_s2 + $0x10] sm:$0xff] %vm400_vm0, %v467_v24 }
 0x1a6   :  { %492 = vst.msk [vmem:[%s949_s2 + $0x50] sm:$0xff] %vm400_vm0, %v475_v25 }
 0x1a7   :  { %v434_v27 = vpop.xlane.xlu0 %433  ;;  %v440_v28 = vpop.xlane.xlu1 %439 }
 0x1a8   :  { %v465_v29 = vadd.f32 %v434_v27, %v417_v2  ;;  %v468_v30 = vadd.f32 %v440_v28, %v420_v26 }
 0x1aa   :  { %482 = vst.msk [vmem:[%s949_s2] sm:$0xff] %vm400_vm0, %v465_v29  ;;  %485 = vst.msk [vmem:[%s949_s2 + $0x18] sm:$0xff] %vm400_vm0, %v468_v30 }
 0x1ab   :  { %v450_v33 = vpop.xlane.xlu0 %449  ;;  %v456_v34 = vpop.xlane.xlu1 %455 }
 0x1ac   :  { %v473_v35 = vadd.f32 %v450_v33, %v425_v31  ;;  %v476_v36 = vadd.f32 %v456_v34, %v428_v32 }
 0x1ae   :  { %490 = vst.msk [vmem:[%s949_s2 + $0x40] sm:$0xff] %vm400_vm0, %v473_v35  ;;  %493 = vst.msk [vmem:[%s949_s2 + $0x58] sm:$0xff] %vm400_vm0, %v476_v36 }
 0x1af   :  { %v452_v39 = vpop.xlane.xlu1 %451  ;;  %v436_v40 = vpop.xlane.xlu0 %435 }
 0x1b0   :  { %v474_v41 = vadd.f32 %v452_v39, %v426_v37  ;;  %v466_v42 = vadd.f32 %v436_v40, %v418_v38 }
 0x1b2   :  { %491 = vst.msk [vmem:[%s949_s2 + $0x48] sm:$0xff] %vm400_vm0, %v474_v41  ;;  %483 = vst.msk [vmem:[%s949_s2 + $0x8] sm:$0xff] %vm400_vm0, %v466_v42 }
 0x1b3   :  { %v446_v45 = vpop.xlane.xlu0 %445  ;;  %v448_v46 = vpop.xlane.xlu1 %447 }
 0x1b4   :  { %v471_v47 = vadd.f32 %v446_v45, %v423_v43  ;;  %v472_v49 = vadd.f32 %v448_v46, %v424_v44 }
 0x1b6   :  { %488 = vst.msk [vmem:[%s949_s2 + $0x30] sm:$0xff] %vm400_vm0, %v471_v47  ;;  %489 = vst.msk [vmem:[%s949_s2 + $0x38] sm:$0xff] %vm400_vm0, %v472_v49 }
 0x1b7   :  { %v442_v52 = vpop.xlane.xlu0 %441  ;;  %v444_v53 = vpop.xlane.xlu1 %443 }
 0x1b8   :  { %v469_v54 = vadd.f32 %v442_v52, %v421_v50  ;;  %v470_v55 = vadd.f32 %v444_v53, %v422_v51 }
 0x1ba   :  { %486 = vst.msk [vmem:[%s949_s2 + $0x20] sm:$0xff] %vm400_vm0, %v469_v54  ;;  %487 = vst.msk [vmem:[%s949_s2 + $0x28] sm:$0xff] %vm400_vm0, %v470_v55 }
 0x1bb   :  { %v458_v58 = vpop.xlane.xlu0 %457  ;;  %v460_v59 = vpop.xlane.xlu1 %459 }
 0x1bc   :  { %v477_v60 = vadd.f32 %v458_v58, %v429_v56  ;;  %v478_v61 = vadd.f32 %v460_v59, %v430_v57 }
 0x1be   :  { %494 = vst.msk [vmem:[%s949_s2 + $0x60] sm:$0xff] %vm400_vm0, %v477_v60  ;;  %495 = vst.msk [vmem:[%s949_s2 + $0x68] sm:$0xff] %vm400_vm0, %v478_v61 }
 0x1bf   :  { %v462_v0 = vpop.xlane.xlu0 %461  ;;  %v464_v1 = vpop.xlane.xlu1 %463 }
 0x1c0   :  { %v479_v3 = vadd.f32 %v462_v0, %v431_v62  ;;  %v480_v4 = vadd.f32 %v464_v1, %v432_v63 }
 0x1c2   :  { %496 = vst.msk [vmem:[%s949_s2 + $0x70] sm:$0xff] %vm400_vm0, %v479_v3  ;;  %497 = vst.msk [vmem:[%s949_s2 + $0x78] sm:$0xff] %vm400_vm0, %v480_v4 }

// kernel: manifold_loss.7
= control target key start
LH: loop header
LB: loop body
LE: loop exit
PB: predicated region body
PF: predicated region fallthrough
CT: control target
= control target key end

     0   :  { %v1398_v3 = vmov 0   ;;  %s2669_s0 = inlined_call_operand.vmem [shape: f32[128,128], index: 0, kind: input, shape index: {}]   ;;  %s2670_s1 = inlined_call_operand.vmem [shape: f32[128,128], index: 1, kind: input, shape index: {}]   ;;  %s2671_s3 = inlined_call_operand.vmem [shape: s32[128,1], index: 3, kind: input, shape index: {}]   ;;  %s2672_s2 = inlined_call_operand.vmem [shape: f32[128,128], index: 2, kind: input, shape index: {}]   ;;  %s2673_s4 = inlined_call_operand.vmem [shape: f32[128,128], index: 4, kind: output, shape index: {}]  }
   0x1   :  { %v1429_v0 = vld [vmem:[%s2669_s0 + $0x8] sm:$0xff]  ;;  %v1434_v1 = vld [vmem:[%s2669_s0] sm:$0xff]  ;;  %1205 = vset.pattern.permute.xlu1 %v1398_v3  ;;  %1204 = vset.pattern.permute.xlu0 %v1398_v3  ;;  %v1457_v9 = vld [vmem:[%s2669_s0 + $0x50] sm:$0xff] }
   0x2   :  { %v1439_v2 = vld [vmem:[%s2669_s0 + $0x48] sm:$0xff]  ;;  %v82_v4 = vmul.f32 %v1429_v0, %v1429_v0  ;;  %v81_v5 = vmul.f32 %v1434_v1, %v1434_v1  ;;  %v1448_v6 = vld [vmem:[%s2669_s0 + $0x40] sm:$0xff]  ;;  %v1462_v10 = vld [vmem:[%s2669_s0 + $0x10] sm:$0xff]  ;;  %v91_v11 = vmul.f32 %v1457_v9, %v1457_v9 }
   0x3   :  { %v90_v7 = vmul.f32 %v1439_v2, %v1439_v2  ;;  %v89_v8 = vmul.f32 %v1448_v6, %v1448_v6  ;;  %v83_v12 = vmul.f32 %v1462_v10, %v1462_v10  ;;  %v1471_v13 = vld [vmem:[%s2669_s0 + $0x58] sm:$0xff]  ;;  %v47_v18 = vld [vmem:[%s2670_s1 + $0x70] sm:$0xff]  ;;  %v1491_v19 = vld [vmem:[%s2669_s0 + $0x60] sm:$0xff] }
   0x4   :  { %99 = vadd.xlane.f32.xlu1 %v82_v4  ;;  %97 = vadd.xlane.f32.xlu0 %v81_v5  ;;  %v1476_v14 = vld [vmem:[%s2669_s0 + $0x18] sm:$0xff]  ;;  %v92_v16 = vmul.f32 %v1471_v13, %v1471_v13  ;;  %v1496_v20 = vld [vmem:[%s2669_s0 + $0x20] sm:$0xff]  ;;  %v93_v21 = vmul.f32 %v1491_v19, %v1491_v19  ;;  %v46_v23 = vld [vmem:[%s2670_s1 + $0x68] sm:$0xff] }
   0x5   :  { %v48_v15 = vld [vmem:[%s2670_s1 + $0x78] sm:$0xff]  ;;  %v84_v17 = vmul.f32 %v1476_v14, %v1476_v14  ;;  %v85_v22 = vmul.f32 %v1496_v20, %v1496_v20  ;;  %v1508_v24 = vld [vmem:[%s2669_s0 + $0x68] sm:$0xff]  ;;  %v45_v28 = vld [vmem:[%s2670_s1 + $0x60] sm:$0xff] }
   0x6   :  { %1113 = vmatprep.subr.mxu0 %v48_v15  ;;  %1169 = vmatprep.subr.mxu1 %v48_v15  ;;  %v1513_v25 = vld [vmem:[%s2669_s0 + $0x28] sm:$0xff]  ;;  %v94_v26 = vmul.f32 %v1508_v24, %v1508_v24  ;;  %v1525_v29 = vld [vmem:[%s2669_s0 + $0x70] sm:$0xff]  ;;  %v44_v33 = vld [vmem:[%s2670_s1 + $0x58] sm:$0xff] }
   0x7   :  { %1114 = vmatpush3.xpose.msra.mxu0 %v48_v15  ;;  %1185 = vmatpush3.xpose.msra.mxu1 %v48_v15  ;;  %v86_v27 = vmul.f32 %v1513_v25, %v1513_v25  ;;  %v1530_v30 = vld [vmem:[%s2669_s0 + $0x30] sm:$0xff]  ;;  %v95_v31 = vmul.f32 %v1525_v29, %v1525_v29  ;;  %v1542_v34 = vld [vmem:[%s2669_s0 + $0x78] sm:$0xff]  ;;  %v42_v39 = vld [vmem:[%s2670_s1 + $0x48] sm:$0xff]  ;;  %v450_v15 = vlaneseq }
   0x8   :  { %115 = vadd.xlane.f32.xlu1 %v90_v7  ;;  %113 = vadd.xlane.f32.xlu0 %v89_v8  ;;  %v87_v32 = vmul.f32 %v1530_v30, %v1530_v30  ;;  %v1547_v35 = vld [vmem:[%s2669_s0 + $0x38] sm:$0xff]  ;;  %v96_v36 = vmul.f32 %v1542_v34, %v1542_v34  ;;  %v43_v38 = vld [vmem:[%s2670_s1 + $0x50] sm:$0xff]  ;;  %v41_v40 = vld [vmem:[%s2670_s1 + $0x40] sm:$0xff] }
   0x9   :  { %1115 = vmatprep.subr.mxu0 %v47_v18  ;;  %1170 = vmatprep.subr.mxu1 %v47_v18  ;;  %v88_v37 = vmul.f32 %v1547_v35, %v1547_v35  ;;  %v40_v41 = vld [vmem:[%s2670_s1 + $0x38] sm:$0xff]  ;;  %v39_v42 = vld [vmem:[%s2670_s1 + $0x30] sm:$0xff]  ;;  %v66_v43 = vld [vmem:[%s2671_s3 + $0x8] sm:$0xff] }
   0xa   :  { %v38_v44 = vld [vmem:[%s2670_s1 + $0x28] sm:$0xff]  ;;  %v67_v45 = vld [vmem:[%s2671_s3 + $0x10] sm:$0xff]  ;;  %v65_v46 = vld [vmem:[%s2671_s3] sm:$0xff] }
   0xb   :  { %1116 = vmatpush3.xpose.msra.mxu0 %v47_v18  ;;  %1186 = vmatpush3.xpose.msra.mxu1 %v47_v18  ;;  %v37_v47 = vld [vmem:[%s2670_s1 + $0x20] sm:$0xff]  ;;  %v68_v48 = vld [vmem:[%s2671_s3 + $0x18] sm:$0xff]  ;;  %v74_v49 = vld [vmem:[%s2671_s3 + $0x48] sm:$0xff]  ;;  %v1651_v18 = vand.u32 127, %v450_v15 }
   0xc   :  { %117 = vadd.xlane.f32.xlu1 %v91_v11  ;;  %101 = vadd.xlane.f32.xlu0 %v83_v12  ;;  %v36_v50 = vld [vmem:[%s2670_s1 + $0x18] sm:$0xff]  ;;  %v69_v51 = vld [vmem:[%s2671_s3 + $0x20] sm:$0xff]  ;;  %v35_v53 = vld [vmem:[%s2670_s1 + $0x10] sm:$0xff] }
   0xd   :  { %1117 = vmatprep.subr.mxu0 %v46_v23  ;;  %1171 = vmatprep.subr.mxu1 %v46_v23  ;;  %v76_v52 = vld [vmem:[%s2671_s3 + $0x58] sm:$0xff]  ;;  %v70_v54 = vld [vmem:[%s2671_s3 + $0x28] sm:$0xff]  ;;  %v71_v57 = vld [vmem:[%s2671_s3 + $0x30] sm:$0xff] }
   0xe   :  { %v78_v55 = vld [vmem:[%s2671_s3 + $0x68] sm:$0xff]  ;;  %v80_v58 = vld [vmem:[%s2671_s3 + $0x78] sm:$0xff]  ;;  %v33_v59 = vld [vmem:[%s2670_s1] sm:$0xff] }
   0xf   :  { %1118 = vmatpush3.xpose.msra.mxu0 %v46_v23  ;;  %1187 = vmatpush3.xpose.msra.mxu1 %v46_v23  ;;  %v34_v56 = vld [vmem:[%s2670_s1 + $0x8] sm:$0xff]  ;;  %v72_v60 = vld [vmem:[%s2671_s3 + $0x38] sm:$0xff]  ;;  %v73_v61 = vld [vmem:[%s2671_s3 + $0x40] sm:$0xff] }
  0x10   :  { %119 = vadd.xlane.f32.xlu1 %v92_v16  ;;  %103 = vadd.xlane.f32.xlu0 %v84_v17  ;;  %v75_v62 = vld [vmem:[%s2671_s3 + $0x50] sm:$0xff]  ;;  %v77_v63 = vld [vmem:[%s2671_s3 + $0x60] sm:$0xff] }
  0x11   :  { %1119 = vmatprep.subr.mxu0 %v45_v28  ;;  %1172 = vmatprep.subr.mxu1 %v45_v28  ;;  %v79_v3 = vld [vmem:[%s2671_s3 + $0x70] sm:$0xff] }
  0x13   :  { %1120 = vmatpush3.xpose.msra.mxu0 %v45_v28  ;;  %1188 = vmatpush3.xpose.msra.mxu1 %v45_v28 }
  0x14   :  { %121 = vadd.xlane.f32.xlu1 %v93_v21  ;;  %105 = vadd.xlane.f32.xlu0 %v85_v22 }
  0x15   :  { %1121 = vmatprep.subr.mxu0 %v44_v33  ;;  %1173 = vmatprep.subr.mxu1 %v44_v33 }
  0x17   :  { %1122 = vmatpush3.xpose.msra.mxu0 %v44_v33  ;;  %1189 = vmatpush3.xpose.msra.mxu1 %v44_v33 }
  0x18   :  { %123 = vadd.xlane.f32.xlu1 %v94_v26  ;;  %107 = vadd.xlane.f32.xlu0 %v86_v27 }
  0x19   :  { %1123 = vmatprep.subr.mxu0 %v43_v38  ;;  %1174 = vmatprep.subr.mxu1 %v43_v38 }
  0x1b   :  { %1124 = vmatpush3.xpose.msra.mxu0 %v43_v38  ;;  %1190 = vmatpush3.xpose.msra.mxu1 %v43_v38 }
  0x1c   :  { %125 = vadd.xlane.f32.xlu1 %v95_v31  ;;  %109 = vadd.xlane.f32.xlu0 %v87_v32 }
  0x1d   :  { %1125 = vmatprep.subr.mxu0 %v42_v39  ;;  %1175 = vmatprep.subr.mxu1 %v42_v39 }
  0x1f   :  { %1126 = vmatpush3.xpose.msra.mxu0 %v42_v39  ;;  %1191 = vmatpush3.xpose.msra.mxu1 %v42_v39 }
  0x20   :  { %127 = vadd.xlane.f32.xlu1 %v96_v36  ;;  %111 = vadd.xlane.f32.xlu0 %v88_v37 }
  0x21   :  { %1127 = vmatprep.subr.mxu0 %v41_v40  ;;  %1176 = vmatprep.subr.mxu1 %v41_v40 }
  0x23   :  { %1128 = vmatpush3.xpose.msra.mxu0 %v41_v40  ;;  %1192 = vmatpush3.xpose.msra.mxu1 %v41_v40 }
  0x24   :  { %1129 = vmatprep.subr.mxu0 %v40_v41  ;;  %1177 = vmatprep.subr.mxu1 %v40_v41 }
  0x27   :  { %1130 = vmatpush3.xpose.msra.mxu0 %v40_v41  ;;  %1193 = vmatpush3.xpose.msra.mxu1 %v40_v41 }
  0x28   :  { %1131 = vmatprep.subr.mxu0 %v39_v42  ;;  %1178 = vmatprep.subr.mxu1 %v39_v42 }
  0x2b   :  { %1132 = vmatpush3.xpose.msra.mxu0 %v39_v42  ;;  %1194 = vmatpush3.xpose.msra.mxu1 %v39_v42 }
  0x2c   :  { %1133 = vmatprep.subr.mxu0 %v38_v44  ;;  %1179 = vmatprep.subr.mxu1 %v38_v44 }
  0x2f   :  { %1134 = vmatpush3.xpose.msra.mxu0 %v38_v44  ;;  %1195 = vmatpush3.xpose.msra.mxu1 %v38_v44 }
  0x30   :  { %1135 = vmatprep.subr.mxu0 %v37_v47  ;;  %1180 = vmatprep.subr.mxu1 %v37_v47 }
  0x31   :  { %456 = vperm.xlu1 %1205, %v66_v43  }
  0x33   :  { %1136 = vmatpush3.xpose.msra.mxu0 %v37_v47  ;;  %1196 = vmatpush3.xpose.msra.mxu1 %v37_v47 }
  0x34   :  { %1137 = vmatprep.subr.mxu0 %v36_v50  ;;  %1181 = vmatprep.subr.mxu1 %v36_v50 }
  0x35   :  { %459 = vperm.xlu1 %1205, %v67_v45  }
  0x36   :  { %453 = vperm.xlu0 %1204, %v65_v46  }
  0x37   :  { %1138 = vmatpush3.xpose.msra.mxu0 %v36_v50  ;;  %1197 = vmatpush3.xpose.msra.mxu1 %v36_v50 }
  0x38   :  { %1139 = vmatprep.subr.mxu0 %v35_v53  ;;  %1182 = vmatprep.subr.mxu1 %v35_v53 }
  0x39   :  { %462 = vperm.xlu1 %1205, %v68_v48  }
  0x3a   :  { %480 = vperm.xlu0 %1204, %v74_v49  }
  0x3b   :  { %1140 = vmatpush3.xpose.msra.mxu0 %v35_v53  ;;  %1198 = vmatpush3.xpose.msra.mxu1 %v35_v53 }
  0x3c   :  { %1141 = vmatprep.subr.mxu0 %v34_v56  ;;  %1183 = vmatprep.subr.mxu1 %v34_v56 }
  0x3d   :  { %465 = vperm.xlu1 %1205, %v69_v51  }
  0x3e   :  { %486 = vperm.xlu0 %1204, %v76_v52  }
  0x3f   :  { %1142 = vmatpush3.xpose.msra.mxu0 %v34_v56  ;;  %1199 = vmatpush3.xpose.msra.mxu1 %v34_v56 }
  0x40   :  { %1143 = vmatprep.subr.mxu0 %v33_v59  ;;  %1184 = vmatprep.subr.mxu1 %v33_v59 }
  0x41   :  { %468 = vperm.xlu1 %1205, %v70_v54  }
  0x42   :  { %492 = vperm.xlu0 %1204, %v78_v55  }
  0x43   :  { %1144 = vmatpush3.xpose.msra.mxu0 %v33_v59  ;;  %1200 = vmatpush3.xpose.msra.mxu1 %v33_v59 }
  0x45   :  { %471 = vperm.xlu1 %1205, %v71_v57  }
  0x46   :  { %498 = vperm.xlu0 %1204, %v80_v58  }
  0x49   :  { %474 = vperm.xlu1 %1205, %v72_v60  }
  0x4d   :  { %477 = vperm.xlu1 %1205, %v73_v61  }
  0x51   :  { %483 = vperm.xlu1 %1205, %v75_v62  }
  0x55   :  { %489 = vperm.xlu1 %1205, %v77_v63  }
  0x59   :  { %495 = vperm.xlu1 %1205, %v79_v3  }
  0x8d   :  { %v100_v4 = vpop.xlane.xlu1 %99  ;;  %v98_v5 = vpop.xlane.xlu0 %97 }
  0x8e   :  { %1206 = vrsqrt.f32 %v100_v4  ;;  %vm138_vm0 = vcmp.eq.f32.partialorder %v100_v4, inf  ;;  %vm140_vm1 = vcmp.eq.f32.partialorder %v100_v4, 0.0  ;;  %v141_v22 = vand.u32 2147483648, %v100_v4 }
  0x8f   :  { %1208 = vrsqrt.f32 %v98_v5  ;;  %vm131_vm2 = vcmp.eq.f32.partialorder %v98_v5, inf  ;;  %vm133_vm3 = vcmp.eq.f32.partialorder %v98_v5, 0.0  ;;  %v134_v27 = vand.u32 2147483648, %v98_v5 }
  0x91   :  { %v1634_v7 = vpop.xlane.xlu1 %115  ;;  %v1636_v8 = vpop.xlane.xlu0 %113 }
  0x92   :  { %1210 = vrsqrt.f32 %v1634_v7  ;;  %vm194_vm4 = vcmp.eq.f32.partialorder %v1634_v7, inf  ;;  %vm196_vm5 = vcmp.eq.f32.partialorder %v1634_v7, 0.0  ;;  %v197_v31 = vand.u32 2147483648, %v1634_v7 }
  0x93   :  { %1212 = vrsqrt.f32 %v1636_v8  ;;  %vm187_vm6 = vcmp.eq.f32.partialorder %v1636_v8, inf  ;;  %vm189_vm7 = vcmp.eq.f32.partialorder %v1636_v8, 0.0  ;;  %v190_v36 = vand.u32 2147483648, %v1636_v8 }
  0x95   :  { %v1640_v11 = vpop.xlane.xlu1 %117  ;;  %v1642_v12 = vpop.xlane.xlu0 %101 }
  0x96   :  { %1214 = vrsqrt.f32 %v1640_v11  ;;  %vm201_vm8 = vcmp.eq.f32.partialorder %v1640_v11, inf  ;;  %vm203_vm9 = vcmp.eq.f32.partialorder %v1640_v11, 0.0  ;;  %v204_v42 = vand.u32 2147483648, %v1640_v11 }
  0x97   :  { %1216 = vrsqrt.f32 %v1642_v12  ;;  %vm145_vm10 = vcmp.eq.f32.partialorder %v1642_v12, inf  ;;  %vm147_vm11 = vcmp.eq.f32.partialorder %v1642_v12, 0.0  ;;  %v148_v44 = vand.u32 2147483648, %v1642_v12 }
  0x99   :  { %v1646_v16 = vpop.xlane.xlu1 %119  ;;  %v1648_v17 = vpop.xlane.xlu0 %103 }
  0x9a   :  { %1218 = vrsqrt.f32 %v1646_v16  ;;  %vm208_vm12 = vcmp.eq.f32.partialorder %v1646_v16, inf  ;;  %vm210_vm13 = vcmp.eq.f32.partialorder %v1646_v16, 0.0  ;;  %v211_v48 = vand.u32 2147483648, %v1646_v16 }
  0x9b   :  { %v1207_v21 = vpop.eup %1206  ;;  %1220 = vrsqrt.f32 %v1648_v17  ;;  %vm152_vm14 = vcmp.eq.f32.partialorder %v1648_v17, inf  ;;  %vm154_vm15 = vcmp.eq.f32.partialorder %v1648_v17, 0.0  ;;  %v155_v55 = vand.u32 2147483648, %v1648_v17 }
  0x9c   :  { %v1209_v23 = vpop.eup %1208  ;;  %v137_v26 = vmul.f32 %v1207_v21, %v100_v4 }
  0x9d   :  { %v130_v28 = vmul.f32 %v1209_v23, %v98_v5  ;;  %v1657_v32 = vpop.xlane.xlu1 %121  ;;  %v1659_v33 = vpop.xlane.xlu0 %105 }
  0x9e   :  { %1222 = vrsqrt.f32 %v1657_v32  ;;  %v139_v38 = vsel %vm138_vm0, %v100_v4, %v137_v26  ;;  %vm215_vm0 = vcmp.eq.f32.partialorder %v1657_v32, inf  ;;  %v218_v58 = vand.u32 2147483648, %v1657_v32 }
  0x9f   :  { %v1211_v37 = vpop.eup %1210  ;;  %1224 = vrsqrt.f32 %v1659_v33  ;;  %v132_v40 = vsel %vm131_vm2, %v98_v5, %v130_v28  ;;  %v1682_v47 = vsel %vm140_vm1, %v141_v22, %v139_v38  ;;  %vm159_vm1 = vcmp.eq.f32.partialorder %v1659_v33, inf }
  0xa0   :  { %v1213_v39 = vpop.eup %1212  ;;  %v193_v41 = vmul.f32 %v1211_v37, %v1634_v7  ;;  %v1688_v50 = vsel %vm133_vm3, %v134_v27, %v132_v40  ;;  %v242_v56 = vmax.f32 %v1682_v47, 1e-08  ;;  %vm217_vm2 = vcmp.eq.f32.partialorder %v1657_v32, 0.0 }
  0xa1   :  { %v186_v43 = vmul.f32 %v1213_v39, %v1636_v8  ;;  %v1677_v45 = vpop.xlane.xlu1 %123  ;;  %v1679_v46 = vpop.xlane.xlu0 %107  ;;  %v241_v61 = vmax.f32 %v1688_v50, 1e-08  ;;  %vm161_vm3 = vcmp.eq.f32.partialorder %v1659_v33, 0.0  ;;  %v162_v26 = vand.u32 2147483648, %v1659_v33 }
  0xa2   :  { %1226 = vrsqrt.f32 %v1677_v45  ;;  %v195_v51 = vsel %vm194_vm4, %v1634_v7, %v193_v41  ;;  %v225_v27 = vand.u32 2147483648, %v1677_v45  ;;  %vm222_vm4 = vcmp.eq.f32.partialorder %v1677_v45, inf }
  0xa3   :  { %v1215_v49 = vpop.eup %1214  ;;  %1228 = vrsqrt.f32 %v1679_v46  ;;  %v188_v53 = vsel %vm187_vm6, %v1636_v8, %v186_v43  ;;  %v1712_v62 = vsel %vm196_vm5, %v197_v31, %v195_v51  ;;  %vm166_vm5 = vcmp.eq.f32.partialorder %v1679_v46, inf }
  0xa4   :  { %v1217_v52 = vpop.eup %1216  ;;  %v200_v54 = vmul.f32 %v1215_v49, %v1640_v11  ;;  %v1721_v4 = vsel %vm189_vm7, %v190_v36, %v188_v53  ;;  %vm168_vm6 = vcmp.eq.f32.partialorder %v1679_v46, 0.0  ;;  %v169_v41 = vand.u32 2147483648, %v1679_v46  ;;  %v1774_v53 = vld [vmem:[%s2672_s2 + $0x8] sm:$0xff] }
  0xa5   :  { %v144_v57 = vmul.f32 %v1217_v52, %v1642_v12  ;;  %v1705_v59 = vpop.xlane.xlu1 %125  ;;  %v1707_v60 = vpop.xlane.xlu0 %109  ;;  %v249_v31 = vmax.f32 %v1721_v4, 1e-08  ;;  %vm224_vm7 = vcmp.eq.f32.partialorder %v1677_v45, 0.0 }
  0xa6   :  { %v202_v63 = vsel %vm201_vm8, %v1640_v11, %v200_v54  ;;  %1230 = vrsqrt.f32 %v1705_v59  ;;  %v250_v11 = vmax.f32 %v1712_v62, 1e-08  ;;  %vm229_vm8 = vcmp.eq.f32.partialorder %v1705_v59, inf }
  0xa7   :  { %v1219_v3 = vpop.eup %1218  ;;  %v205_v5 = vsel %vm203_vm9, %v204_v42, %v202_v63  ;;  %v146_v7 = vsel %vm145_vm10, %v1642_v12, %v144_v57  ;;  %1232 = vrsqrt.f32 %v1707_v60  ;;  %vm231_vm9 = vcmp.eq.f32.partialorder %v1705_v59, 0.0 }
  0xa8   :  { %v1221_v15 = vpop.eup %1220  ;;  %v251_v21 = vmax.f32 %v205_v5, 1e-08  ;;  %v149_v22 = vsel %vm147_vm11, %v148_v44, %v146_v7  ;;  %v207_v8 = vmul.f32 %v1219_v3, %v1646_v16  ;;  %vm173_vm10 = vcmp.eq.f32.partialorder %v1707_v60, inf }
  0xa9   :  { %v151_v23 = vmul.f32 %v1221_v15, %v1648_v17  ;;  %v1738_v28 = vpop.xlane.xlu1 %127  ;;  %v243_v36 = vmax.f32 %v149_v22, 1e-08  ;;  %v1746_v37 = vpop.xlane.xlu0 %111  ;;  %vm175_vm11 = vcmp.eq.f32.partialorder %v1707_v60, 0.0  ;;  %v2679_v7 = vmov 0.0  }
  0xaa   :  { %v209_v12 = vsel %vm208_vm12, %v1646_v16, %v207_v8  ;;  %1234 = vrcp.f32 %v251_v21 }
  0xab   :  { %v1223_v38 = vpop.eup %1222  ;;  %v212_v39 = vsel %vm210_vm13, %v211_v48, %v209_v12  ;;  %v153_v40 = vsel %vm152_vm14, %v1648_v17, %v151_v23  ;;  %1236 = vrsqrt.f32 %v1738_v28  ;;  %v232_v48 = vand.u32 2147483648, %v1705_v59 }
  0xac   :  { %v1225_v42 = vpop.eup %1224  ;;  %v252_v43 = vmax.f32 %v212_v39, 1e-08  ;;  %v156_v44 = vsel %vm154_vm15, %v155_v55, %v153_v40  ;;  %v214_v49 = vmul.f32 %v1223_v38, %v1657_v32  ;;  %1238 = vrsqrt.f32 %v1746_v37  ;;  %v1827_v38 = vld [vmem:[%s2672_s2 + $0x10] sm:$0xff] }
  0xad   :  { %v158_v16 = vmul.f32 %v1225_v42, %v1659_v33  ;;  %v1764_v51 = vpop.permute.xlu1 %456  ;;  %1240 = vrcp.f32 %v243_v36  ;;  %v244_v52 = vmax.f32 %v156_v44, 1e-08 }
  0xae   :  { %v216_v17 = vsel %vm215_vm0, %v1657_v32, %v214_v49  ;;  %1242 = vrcp.f32 %v252_v43  ;;  %vm501_vm12 = vcmp.eq.s32.totalorder %v1651_v18, %v1764_v51  ;;  %vm236_vm0 = vcmp.eq.f32.partialorder %v1738_v28, inf }
  0xaf   :  { %v1227_v54 = vpop.eup %1226  ;;  %v160_v55 = vsel %vm159_vm1, %v1659_v33, %v158_v16  ;;  %v219_v63 = vsel %vm217_vm2, %v218_v58, %v216_v17  ;;  %v1791_v15 = vsel %vm501_vm12, 1.0, %v2679_v7  ;;  %1244 = vrcp.f32 %v241_v61  ;;  %v1810_v58 = vld [vmem:[%s2672_s2] sm:$0xff] }
  0xb0   :  { %v1229_v57 = vpop.eup %1228  ;;  %v163_v3 = vsel %vm161_vm3, %v162_v26, %v160_v55  ;;  %v221_v5 = vmul.f32 %v1227_v54, %v1677_v45  ;;  %v758_v32 = vmul.f32 %v1791_v15, %v1774_v53  ;;  %1246 = vrcp.f32 %v244_v52 }
  0xb1   :  { %v245_v21 = vmax.f32 %v163_v3, 1e-08  ;;  %v165_v22 = vmul.f32 %v1229_v57, %v1679_v46  ;;  %v1794_v8 = vpop.permute.xlu1 %459  ;;  %v1796_v23 = vpop.permute.xlu0 %453  ;;  %v176_v33 = vand.u32 2147483648, %v1707_v60  ;;  %v253_v50 = vmax.f32 %v219_v63, 1e-08 }
  0xb2   :  { %vm502_vm13 = vcmp.eq.s32.totalorder %v1651_v18, %v1794_v8  ;;  %vm500_vm14 = vcmp.eq.s32.totalorder %v1651_v18, %v1796_v23  ;;  %v223_v61 = vsel %vm222_vm4, %v1677_v45, %v221_v5  ;;  %775 = vadd.xlane.f32.xlu1 %v758_v32  ;;  %vm238_vm1 = vcmp.eq.f32.partialorder %v1738_v28, 0.0 }
  0xb3   :  { %v1231_v26 = vpop.eup %1230  ;;  %v167_v36 = vsel %vm166_vm5, %v1679_v46, %v165_v22  ;;  %v1822_v12 = vsel %vm502_vm13, 1.0, %v2679_v7  ;;  %1248 = vrcp.f32 %v245_v21  ;;  %v1836_v43 = vsel %vm500_vm14, 1.0, %v2679_v7 }
  0xb4   :  { %v1233_v39 = vpop.eup %1232  ;;  %v170_v40 = vsel %vm168_vm6, %v169_v41, %v167_v36  ;;  %v228_v42 = vmul.f32 %v1231_v26, %v1705_v59  ;;  %1250 = vrcp.f32 %v242_v56  ;;  %v757_v46 = vmul.f32 %v1836_v43, %v1810_v58  ;;  %v1848_v41 = vld [vmem:[%s2672_s2 + $0x18] sm:$0xff] }
  0xb5   :  { %v246_v44 = vmax.f32 %v170_v40, 1e-08  ;;  %v172_v49 = vmul.f32 %v1233_v39, %v1707_v60  ;;  %v1841_v16 = vpop.permute.xlu1 %462  ;;  %v1850_v52 = vpop.permute.xlu0 %480  ;;  %v226_v17 = vsel %vm224_vm7, %v225_v27, %v223_v61  ;;  %v759_v56 = vmul.f32 %v1822_v12, %v1827_v38 }
  0xb6   :  { %v230_v47 = vsel %vm229_vm8, %v1705_v59, %v228_v42  ;;  %vm503_vm15 = vcmp.eq.s32.totalorder %v1651_v18, %v1841_v16  ;;  %773 = vadd.xlane.f32.xlu0 %v757_v46  ;;  %v254_v63 = vmax.f32 %v226_v17, 1e-08  ;;  %vm180_vm3 = vcmp.eq.f32.partialorder %v1746_v37, inf }
  0xb7   :  { %1252 = vrcp.f32 %v246_v44  ;;  %v233_v54 = vsel %vm231_vm9, %v232_v48, %v230_v47  ;;  %v174_v55 = vsel %vm173_vm10, %v1707_v60, %v172_v49  ;;  %v1872_v45 = vsel %vm503_vm15, 1.0, %v2679_v7  ;;  %v1874_v27 = vpop.eup %1234  ;;  %v1891_v60 = vld [vmem:[%s2672_s2 + $0x20] sm:$0xff]  ;;  %v1924_v44 = vld [vmem:[%s2672_s2 + $0x28] sm:$0xff] }
  0xb8   :  { %v177_v57 = vsel %vm175_vm11, %v176_v33, %v174_v55  ;;  %1254 = vrcp.f32 %v249_v31  ;;  %v760_v59 = vmul.f32 %v1872_v45, %v1848_v41  ;;  %v1237_v48 = vpop.eup %1236  ;;  %v255_v21 = vmax.f32 %v233_v54, 1e-08 }
  0xb9   :  { %v247_v3 = vmax.f32 %v177_v57, 1e-08  ;;  %1256 = vrcp.f32 %v250_v11  ;;  %v1886_v5 = vpop.permute.xlu1 %465  ;;  %v1893_v4 = vpop.permute.xlu0 %486  ;;  %v235_v22 = vmul.f32 %v1237_v48, %v1738_v28  ;;  %v239_v11 = vand.u32 2147483648, %v1738_v28 }
  0xba   :  { %v1239_v31 = vpop.eup %1238  ;;  %1258 = vrcp.f32 %v253_v50  ;;  %vm504_vm2 = vcmp.eq.s32.totalorder %v1651_v18, %v1886_v5  ;;  %779 = vadd.xlane.f32.xlu1 %v760_v59  ;;  %777 = vadd.xlane.f32.xlu0 %v759_v56  ;;  %v183_v61 = vand.u32 2147483648, %v1746_v37  ;;  %vm182_vm4 = vcmp.eq.f32.partialorder %v1746_v37, 0.0 }
  0xbb   :  { %v1241_v62 = vpop.eup %1240  ;;  %1260 = vrcp.f32 %v247_v3  ;;  %v179_v32 = vmul.f32 %v1239_v31, %v1746_v37  ;;  %v1904_v33 = vsel %vm504_vm2, 1.0, %v2679_v7  ;;  %v237_v50 = vsel %vm236_vm0, %v1738_v28, %v235_v22 }
  0xbc   :  { %v1906_v26 = vpop.eup %1242  ;;  %v761_v36 = vmul.f32 %v1904_v33, %v1891_v60  ;;  %1262 = vrcp.f32 %v254_v63  ;;  %v240_v39 = vsel %vm238_vm1, %v239_v11, %v237_v50  ;;  %v291_v3 = vmul.f32 %v1241_v62, %v1462_v10  ;;  %v1977_v50 = vld [vmem:[%s2672_s2 + $0x38] sm:$0xff] }
  0xbd   :  { %v181_v40 = vsel %vm180_vm3, %v1746_v37, %v179_v32  ;;  %v1919_v42 = vpop.permute.xlu1 %468  ;;  %v1926_v49 = vpop.permute.xlu0 %492  ;;  %1264 = vrcp.f32 %v255_v21  ;;  %v256_v17 = vmax.f32 %v240_v39, 1e-08  ;;  %vm2686_vm8 = vcmp.lt.s32.totalorder %v1651_v18, 4 }
  0xbe   :  { %v1245_v46 = vpop.eup %1244  ;;  %v184_v47 = vsel %vm182_vm4, %v183_v61, %v181_v40  ;;  %vm505_vm5 = vcmp.eq.s32.totalorder %v1651_v18, %v1919_v42  ;;  %781 = vadd.xlane.f32.xlu0 %v761_v36  ;;  %vm2687_vm9 = vmmov 1   ;;  %vm2678_vm11 = vcmp.eq.s32.totalorder %v1651_v18, %v1850_v52 }
  0xbf   :  { %v1247_v28 = vpop.eup %1246  ;;  %v248_v56 = vmax.f32 %v184_v47, 1e-08  ;;  %v289_v37 = vmul.f32 %v1245_v46, %v1434_v1  ;;  %v1935_v54 = vsel %vm505_vm5, 1.0, %v2679_v7  ;;  %1266 = vrcp.f32 %v256_v17  ;;  %v1944_v1 = vld [vmem:[%s2672_s2 + $0x30] sm:$0xff] }
  0xc0   :  { %v762_v55 = vmul.f32 %v1935_v54, %v1924_v44  ;;  %v1249_v57 = vpop.eup %1248  ;;  %v292_v62 = vmul.f32 %v1247_v28, %v1476_v14  ;;  %v2698_v61 = vmov 0  ;;  %v300_v17 = vmul.f32 %v1906_v26, %v1471_v13 }
  0xc1   :  { %1268 = vrcp.f32 %v248_v56  ;;  %1145 = vmatprep.mubr.f32.mxu0 %v289_v37  ;;  %v1939_v59 = vpop.permute.xlu1 %471  ;;  %v1946_v48 = vpop.permute.xlu0 %498  ;;  %v293_v14 = vmul.f32 %v1249_v57, %v1496_v20  ;;  %vm2674_vm3 = vcmp.eq.s32.totalorder %v1651_v18, %v1893_v4  ;;  %v2019_v56 = vld [vmem:[%s2672_s2 + $0x40] sm:$0xff]  ;;  %v2708_v51 = vmov 0.0  }
  0xc2   :  { %v1251_v63 = vpop.eup %1250  ;;  %vm506_vm6 = vcmp.eq.s32.totalorder %v1651_v18, %v1939_v59  ;;  %783 = vadd.xlane.f32.xlu1 %v762_v55  ;;  %vm515_vm7 = vcmp.eq.s32.totalorder %v1651_v18, %v1946_v48  ;;  %v2715_v5 = vmov 0 }
  0xc3   :  { %v290_v31 = vmul.f32 %v1251_v63, %v1429_v0  ;;  %v1958_v21 = vsel %vm506_vm6, 1.0, %v2679_v7  ;;  %vm628_vm10 = vmxor %vm515_vm7, %vm2687_vm9  ;;  %v299_v0 = vmul.f32 %v1874_v27, %v1457_v9  ;;  %v1080_v23 = vsel %vm515_vm7, 1.0, %v2708_v51 }
  0xc4   :  { %v1253_v22 = vpop.eup %1252  ;;  %v763_v11 = vmul.f32 %v1958_v21, %v1944_v1  ;;  %vm1981_vm0 = vmand %vm628_vm10, %vm2686_vm8  ;;  %vm2675_vm10 = vcmp.eq.s32.totalorder %v1651_v18, %v1926_v49 }
  0xc5   :  { %v1255_v10 = vpop.eup %1254  ;;  %1146 = vmatmul.mubr.f32.vlgmr.msra.gmra.mxu0 %v290_v31  ;;  %v1970_v32 = vpop.permute.xlu1 %474  ;;  %v2699_v61 = vsel %vm1981_vm0, 4294967295, %v2698_v61  ;;  %v294_v47 = vmul.f32 %v1253_v22, %v1513_v25  ;;  %vm2274_vm7 = vmxor %vm505_vm5, %vm2687_vm9 }
  0xc6   :  { %2700 = vst [vmem:[#allocation2_spill] sm:$0xff] %v2699_v61  ;;  %v1257_v36 = vpop.eup %1256  ;;  %v297_v9 = vmul.f32 %v1255_v10, %v1448_v6  ;;  %1148 = vmatprep.mubr.f32.mxu0 %v291_v3  ;;  %vm507_vm1 = vcmp.eq.s32.totalorder %v1651_v18, %v1970_v32  ;;  %785 = vadd.xlane.f32.xlu0 %v763_v11  ;;  %v2000_v6 = vsel %vm2678_vm11, 1.0, %v2679_v7  ;;  %v2051_v11 = vld [vmem:[%s2672_s2 + $0x50] sm:$0xff] }
  0xc7   :  { %v1259_v27 = vpop.eup %1258  ;;  %v298_v39 = vmul.f32 %v1257_v36, %v1439_v2  ;;  %v1994_v40 = vsel %vm507_vm1, 1.0, %v2679_v7  ;;  %v2007_v2 = vld [vmem:[%s2672_s2 + $0x48] sm:$0xff] }
  0xc8   :  { %v1261_v46 = vpop.eup %1260  ;;  %1157 = vmatprep.mubr.f32.mxu1 %v297_v9  ;;  %v764_v20 = vmul.f32 %v1994_v40, %v1977_v50  ;;  %v301_v55 = vmul.f32 %v1259_v27, %v1491_v19  ;;  %v766_v57 = vmul.f32 %v2000_v6, %v2007_v2  ;;  %v2035_v19 = vsel %vm2674_vm3, 1.0, %v2679_v7 }
  0xc9   :  { %1158 = vmatmul.mubr.f32.vlgmr.msra.gmra.mxu1 %v298_v39  ;;  %1149 = vmatmul.mubr.f32.gmra.mxu0 %v292_v62  ;;  %v2012_v28 = vpop.permute.xlu1 %477  ;;  %v1263_v37 = vpop.eup %1262  ;;  %v295_v13 = vmul.f32 %v1261_v46, %v1530_v30  ;;  %v2041_v30 = vld [vmem:[%s2672_s2 + $0x58] sm:$0xff]  ;;  %v2081_v39 = vld [vmem:[%s2672_s2 + $0x60] sm:$0xff] }
  0xca   :  { %1160 = vmatprep.mubr.f32.mxu1 %v299_v0  ;;  %1151 = vmatprep.mubr.f32.mxu0 %v293_v14  ;;  %vm2685_vm4 = vcmp.eq.s32.totalorder %v1651_v18, %v2012_v28  ;;  %v1265_v25 = vpop.eup %1264  ;;  %v302_v31 = vmul.f32 %v1263_v37, %v1508_v24  ;;  %v768_v36 = vmul.f32 %v2035_v19, %v2041_v30  ;;  %v2073_v14 = vld [vmem:[%s2672_s2 + $0x68] sm:$0xff] }
  0xcb   :  { %v1073_v26 = vsel %vm2685_vm4, 1.0, %v2679_v7  ;;  %787 = vadd.xlane.f32.xlu1 %v764_v20  ;;  %v303_v0 = vmul.f32 %v1265_v25, %v1525_v29  ;;  %v2067_v29 = vsel %vm2675_vm10, 1.0, %v2679_v7  ;;  %vm2201_vm4 = vmxor %vm502_vm13, %vm2687_vm9 }
  0xcc   :  { %v765_v63 = vmul.f32 %v1073_v26, %v2019_v56  ;;  %v1267_v3 = vpop.eup %1266  ;;  %vm2226_vm13 = vmxor %vm503_vm15, %vm2687_vm9 }
  0xcd   :  { %1161 = vmatmul.mubr.f32.gmra.mxu1 %v300_v17  ;;  %1152 = vmatmul.mubr.f32.gmra.mxu0 %v294_v47  ;;  %v2044_v22 = vpop.permute.xlu1 %483  ;;  %v2701_v47 = vmov 0 }
  0xce   :  { %v1269_v10 = vpop.eup %1268  ;;  %1163 = vmatprep.mubr.f32.mxu1 %v301_v55  ;;  %1154 = vmatprep.mubr.f32.mxu0 %v295_v13  ;;  %vm2676_vm3 = vcmp.eq.s32.totalorder %v1651_v18, %v2044_v22 }
  0xcf   :  { %v1075_v24 = vsel %vm2676_vm3, 1.0, %v2679_v7  ;;  %v296_v62 = vmul.f32 %v1269_v10, %v1547_v35  ;;  %789 = vadd.xlane.f32.xlu0 %v765_v63  ;;  %791 = vadd.xlane.f32.xlu1 %v766_v57  ;;  %v304_v35 = vmul.f32 %v1267_v3, %v1542_v34  ;;  %v770_v34 = vmul.f32 %v2067_v29, %v2073_v14 }
  0xd0   :  { %v767_v9 = vmul.f32 %v1075_v24, %v2051_v11 }
  0xd1   :  { %1164 = vmatmul.mubr.f32.gmra.mxu1 %v302_v31  ;;  %1155 = vmatmul.mubr.f32.gmra.mxu0 %v296_v62  ;;  %v2076_v27 = vpop.permute.xlu1 %489 }
  0xd2   :  { %1166 = vmatprep.mubr.f32.mxu1 %v303_v0  ;;  %vm2677_vm10 = vcmp.eq.s32.totalorder %v1651_v18, %v2076_v27 }
  0xd3   :  { %v1077_v46 = vsel %vm2677_vm10, 1.0, %v2679_v7  ;;  %793 = vadd.xlane.f32.xlu0 %v767_v9  ;;  %795 = vadd.xlane.f32.xlu1 %v768_v36 }
  0xd4   :  { %v769_v20 = vmul.f32 %v1077_v46, %v2081_v39 }
  0xd5   :  { %1167 = vmatmul.mubr.f32.gmra.mxu1 %v304_v35  ;;  %v2092_v17 = vpop.permute.xlu1 %495 }
  0xd6   :  { %vm514_vm3 = vcmp.eq.s32.totalorder %v1651_v18, %v2092_v17 }
  0xd7   :  { %797 = vadd.xlane.f32.xlu0 %v769_v20  ;;  %799 = vadd.xlane.f32.xlu1 %v770_v34  ;;  %vm627_vm10 = vmxor %vm514_vm3, %vm2687_vm9 }
  0xd8   :  { %vm2102_vm11 = vmand %vm627_vm10, %vm2686_vm8 }
  0xd9   :  { %v2702_v47 = vsel %vm2102_vm11, 4294967295, %v2701_v47  ;;  %vm2193_vm10 = vmxor %vm501_vm12, %vm2687_vm9 }
  0xda   :  { %2703 = vst [vmem:[#allocation3_spill] sm:$0xff] %v2702_v47  ;;  %vm2217_vm12 = vmxor %vm500_vm14, %vm2687_vm9 }
  0xdb   :  { %vm2247_vm14 = vmxor %vm504_vm2, %vm2687_vm9 }
  0xdc   :  { %vm2265_vm15 = vmand %vm2217_vm12, %vm2686_vm8 }
  0xdd   :  { %v2716_v5 = vsel %vm2265_vm15, 4294967295, %v2715_v5 }
 0x13b   :  { %v776_v0 = vpop.xlane.xlu1 %775 }
 0x13f   :  { %v774_v63 = vpop.xlane.xlu0 %773 }
 0x185   :  { %v2106_v37 = vpop.f32.mrf.mxu0 }
 0x186   :  { %v550_v55 = vmul.f32 %v2106_v37, %v1791_v15 }
 0x187   :  { %v2110_v13 = vpop.f32.mrf.mxu0 }
 0x188   :  { %567 = vadd.xlane.f32.xlu0 %v550_v55  ;;  %v549_v36 = vmul.f32 %v1836_v43, %v2110_v13  ;;  %v780_v55 = vpop.xlane.xlu1 %779  ;;  %v2139_v43 = vsub.f32 %v1810_v58, %v774_v63 }
 0x189   :  { %v2112_v25 = vpop.f32.mrf.mxu1  ;;  %v2114_v57 = vpop.f32.mrf.mxu0 }
 0x18a   :  { %v558_v3 = vmul.f32 %v2112_v25, %v2000_v6  ;;  %v778_v6 = vpop.xlane.xlu0 %777  ;;  %v552_v34 = vmul.f32 %v2114_v57, %v1872_v45  ;;  %vm821_vm2 = vcmp.gt.f32.partialorder %v2139_v43, 0.0 }
 0x18b   :  { %v2118_v31 = vpop.f32.mrf.mxu1  ;;  %v2120_v10 = vpop.f32.mrf.mxu0  ;;  %v2156_v63 = vsub.f32 %v1827_v38, %v778_v6  ;;  %vm2295_vm12 = vmand %vm2265_vm15, %vm821_vm2  ;;  %vm2746_vm15 = vcmp.eq.s32.totalorder %v1651_v18, %v2044_v22  ;;  %v2751_v22 = vmov 0 }
 0x18c   :  { %583 = vadd.xlane.f32.xlu1 %v558_v3  ;;  %v557_v62 = vmul.f32 %v1073_v26, %v2118_v31  ;;  %v551_v9 = vmul.f32 %v1822_v12, %v2120_v10  ;;  %v784_v7 = vpop.xlane.xlu1 %783  ;;  %vm2315_vm2 = vmxor %vm506_vm6, %vm2687_vm9  ;;  %vm2729_vm6 = vcmp.lt.s32.totalorder %v1651_v18, 4 }
 0x18d   :  { %v2123_v15 = vpop.f32.mrf.mxu1  ;;  %v2129_v35 = vpop.f32.mrf.mxu0 }
 0x18e   :  { %581 = vadd.xlane.f32.xlu0 %v557_v62  ;;  %v782_v62 = vpop.xlane.xlu0 %781  ;;  %v554_v58 = vmul.f32 %v2129_v35, %v1935_v54 }
 0x18f   :  { %v2133_v20 = vpop.f32.mrf.mxu1  ;;  %v2135_v26 = vpop.f32.mrf.mxu0  ;;  %v2169_v38 = vsub.f32 %v1891_v60, %v782_v62 }
 0x190   :  { %565 = vadd.xlane.f32.xlu1 %v549_v36  ;;  %v559_v3 = vmul.f32 %v1075_v24, %v2133_v20  ;;  %v560_v36 = vmul.f32 %v2123_v15, %v2035_v19  ;;  %v553_v45 = vmul.f32 %v1904_v33, %v2135_v26  ;;  %v853_v24 = vmul.f32 1.442695, %v2139_v43 }
 0x191   :  { %v2141_v12 = vpop.f32.mrf.mxu1  ;;  %v861_v62 = vmul.f32 1.442695, %v2169_v38  ;;  %v2719_v43 = vmov 0 }
 0x192   :  { %569 = vadd.xlane.f32.xlu0 %v551_v9  ;;  %v2148_v9 = vsub.f32 %v1774_v53, %v776_v0  ;;  %v786_v19 = vpop.xlane.xlu0 %785  ;;  %v2162_v53 = vsub.f32 %v1848_v41, %v780_v55  ;;  %1270 = vpow2.f32 %v853_v24 }
 0x193   :  { %v2158_v47 = vpop.f32.mrf.mxu1 }
 0x194   :  { %571 = vadd.xlane.f32.xlu1 %v552_v34  ;;  %v2150_v34 = vpop.f32.mrf.mxu0  ;;  %v855_v33 = vmul.f32 1.442695, %v2148_v9  ;;  %v561_v54 = vmul.f32 %v1077_v46, %v2158_v47  ;;  %v859_v55 = vmul.f32 1.442695, %v2162_v53  ;;  %v2179_v46 = vsub.f32 %v1924_v44, %v784_v7 }
 0x195   :  { %v2171_v6 = vpop.f32.mrf.mxu1  ;;  %v556_v60 = vmul.f32 %v2150_v34, %v1994_v40  ;;  %v1079_v40 = vsel %vm514_vm3, 1.0, %v2708_v51  ;;  %vm2287_vm3 = vmand %vm2193_vm10, %vm2686_vm8  ;;  %vm822_vm5 = vcmp.gt.f32.partialorder %v2148_v9, 0.0  ;;  %vm2733_vm8 = vcmp.eq.s32.totalorder %v1651_v18, %v2012_v28 }
 0x196   :  { %585 = vadd.xlane.f32.xlu0 %v559_v3  ;;  %v788_v3 = vpop.xlane.xlu1 %787  ;;  %v2164_v0 = vpop.f32.mrf.mxu0  ;;  %1272 = vpow2.f32 %v855_v33  ;;  %v2720_v43 = vsel %vm2287_vm3, 4294967295, %v2719_v43  ;;  %vm2303_vm10 = vmxor %vm507_vm1, %vm2687_vm9  ;;  %v2737_v28 = vmov 0 }
 0x197   :  { %v790_v61 = vpop.xlane.xlu0 %789  ;;  %v555_v41 = vmul.f32 %v1958_v21, %v2164_v0  ;;  %v2187_v24 = vpop.f32.mrf.mxu1  ;;  %v2207_v21 = vsub.f32 %v1977_v50, %v788_v3  ;;  %vm2321_vm1 = vmand %vm2287_vm3, %vm822_vm5  ;;  %vm2732_vm5 = vmmov 1  }
 0x198   :  { %587 = vadd.xlane.f32.xlu1 %v560_v36  ;;  %v857_v36 = vmul.f32 1.442695, %v2156_v63  ;;  %v563_v33 = vmul.f32 %v1079_v40, %v2187_v24  ;;  %v2236_v3 = vsub.f32 %v2019_v56, %v790_v61  ;;  %vm2336_vm9 = vmand %vm2201_vm4, %vm2729_vm6 }
 0x199   :  { %v867_v61 = vmul.f32 1.442695, %v2207_v21  ;;  %vm2344_vm11 = vmxor %vm2733_vm8, %vm2732_vm5 }
 0x19a   :  { %573 = vadd.xlane.f32.xlu0 %v553_v45  ;;  %v562_v45 = vmul.f32 %v2141_v12, %v2067_v29  ;;  %1274 = vpow2.f32 %v857_v36  ;;  %v2185_v29 = vsub.f32 %v1944_v1, %v786_v19  ;;  %v863_v1 = vmul.f32 1.442695, %v2179_v46  ;;  %vm2736_vm4 = vmmov %vm2729_vm6 }
 0x19b   :  { %1276 = vpow2.f32 %v859_v55  ;;  %v794_v19 = vpop.xlane.xlu0 %793  ;;  %v564_v36 = vmul.f32 %v2171_v6, %v1080_v23  ;;  %v869_v55 = vmul.f32 1.442695, %v2236_v3  ;;  %vm2359_vm8 = vmand %vm2226_vm13, %vm2736_vm4  ;;  %vm2739_vm6 = vcmp.eq.s32.totalorder %v1651_v18, %v1850_v52 }
 0x19c   :  { %575 = vadd.xlane.f32.xlu1 %v554_v58  ;;  %v792_v58 = vpop.xlane.xlu1 %791  ;;  %1278 = vpow2.f32 %v861_v62  ;;  %v865_v17 = vmul.f32 1.442695, %v2185_v29  ;;  %v2738_v28 = vsel %vm2359_vm8, 4294967295, %v2737_v28  ;;  %vm2743_vm13 = vmmov %vm2736_vm4  ;;  %v2744_v52 = vmov 0 }
 0x19d   :  { %1280 = vpow2.f32 %v863_v1  ;;  %v2254_v56 = vsub.f32 %v2007_v2, %v792_v58  ;;  %v2281_v58 = vsub.f32 %v2051_v11, %v794_v19  ;;  %vm2380_vm4 = vmand %vm2247_vm14, %vm2743_vm13  ;;  %vm827_vm3 = vcmp.gt.f32.partialorder %v2185_v29, 0.0 }
 0x19e   :  { %589 = vadd.xlane.f32.xlu0 %v561_v54  ;;  %v2241_v54 = vld [vmem:[%s2672_s2 + $0x70] sm:$0xff]  ;;  %1282 = vpow2.f32 %v865_v17  ;;  %v2745_v52 = vsel %vm2380_vm4, 4294967295, %v2744_v52  ;;  %vm2750_vm14 = vmmov %vm2743_vm13 }
 0x19f   :  { %v1271_v42 = vpop.eup %1270  ;;  %1284 = vpow2.f32 %v867_v61  ;;  %v871_v9 = vmul.f32 1.442695, %v2254_v56  ;;  %vm2402_vm13 = vmand %vm2274_vm7, %vm2750_vm14 }
 0x1a0   :  { %591 = vadd.xlane.f32.xlu1 %v562_v45  ;;  %v796_v48 = vpop.xlane.xlu1 %795  ;;  %v2259_v45 = vld [vmem:[%s2672_s2 + $0x78] sm:$0xff]  ;;  %1286 = vpow2.f32 %v869_v55  ;;  %v885_v59 = vsel %vm2295_vm12, %v1271_v42, 0.0  ;;  %vm2367_vm12 = vmxor %vm2739_vm6, %vm2732_vm5  ;;  %vm825_vm6 = vcmp.gt.f32.partialorder %v2169_v38, 0.0  ;;  %v2752_v22 = vsel %vm2402_vm13, 4294967295, %v2751_v22 }
 0x1a1   :  { %v772_v62 = vmul.f32 %v1080_v23, %v2259_v45  ;;  %v2309_v1 = vsub.f32 %v2041_v30, %v796_v48  ;;  %v873_v30 = vmul.f32 1.442695, %v2281_v58  ;;  %1288 = vpow2.f32 %v871_v9  ;;  %vm2756_vm7 = vmmov %vm2750_vm14 }
 0x1a2   :  { %577 = vadd.xlane.f32.xlu0 %v555_v41  ;;  %v771_v41 = vmul.f32 %v1079_v40, %v2241_v54  ;;  %vm2421_vm14 = vmand %vm2303_vm10, %vm2756_vm7  ;;  %vm2762_vm10 = vcmp.eq.s32.totalorder %v1651_v18, %v2076_v27 }
 0x1a3   :  { %v1273_v51 = vpop.eup %1272  ;;  %1290 = vpow2.f32 %v873_v30 }
 0x1a4   :  { %579 = vadd.xlane.f32.xlu1 %v556_v60  ;;  %v798_v60 = vpop.xlane.xlu0 %797  ;;  %v800_v32 = vpop.xlane.xlu1 %799  ;;  %v886_v48 = vsel %vm2321_vm1, %v1273_v51, 0.0  ;;  %vm2742_vm1 = vcmp.gt.f32.partialorder %v2156_v63, 0.0 }
 0x1a5   :  { %v2328_v19 = vsub.f32 %v2081_v39, %v798_v60  ;;  %v875_v39 = vmul.f32 1.442695, %v2309_v1  ;;  %v2351_v44 = vsub.f32 %v2073_v14, %v800_v32  ;;  %vm839_vm0 = vmand %vm2336_vm9, %vm2742_vm1  ;;  %v2760_v60 = vmov 0 }
 0x1a6   :  { %593 = vadd.xlane.f32.xlu0 %v563_v33  ;;  %v2730_v33 = vmov 0  ;;  %vm2389_vm1 = vmxor %vm2746_vm15, %vm2732_vm5  ;;  %vm826_vm15 = vcmp.gt.f32.partialorder %v2179_v46, 0.0 }
 0x1a7   :  { %v2731_v33 = vsel %vm2336_vm9, 4294967295, %v2730_v33  ;;  %v1275_v23 = vpop.eup %1274  ;;  %v877_v14 = vmul.f32 1.442695, %v2328_v19  ;;  %1292 = vpow2.f32 %v875_v39  ;;  %v879_v16 = vmul.f32 1.442695, %v2351_v44 }
 0x1a8   :  { %595 = vadd.xlane.f32.xlu1 %v564_v36  ;;  %v1277_v36 = vpop.eup %1276  ;;  %v887_v50 = vsel %vm839_vm0, %v1275_v23, 0.0  ;;  %vm2749_vm0 = vcmp.gt.f32.partialorder %v2162_v53, 0.0 }
 0x1a9   :  { %vm840_vm9 = vmand %vm2359_vm8, %vm2749_vm0  ;;  %vm2753_vm0 = vcmp.eq.s32.totalorder %v1651_v18, %v1893_v4  ;;  %1294 = vpow2.f32 %v877_v14 }
 0x1aa   :  { %801 = vadd.xlane.f32.xlu0 %v771_v41  ;;  %v1279_v41 = vpop.eup %1278  ;;  %v888_v55 = vsel %vm840_vm9, %v1277_v36, 0.0  ;;  %vm2411_vm8 = vmxor %vm2753_vm0, %vm2732_vm5  ;;  %1296 = vpow2.f32 %v879_v16 }
 0x1ab   :  { %v1281_v38 = vpop.eup %1280  ;;  %vm841_vm9 = vmand %vm2380_vm4, %vm825_vm6  ;;  %vm828_vm6 = vcmp.gt.f32.partialorder %v2207_v21, 0.0 }
 0x1ac   :  { %803 = vadd.xlane.f32.xlu1 %v772_v62  ;;  %v889_v2 = vsel %vm841_vm9, %v1279_v41, 0.0  ;;  %v1283_v4 = vpop.eup %1282  ;;  %vm842_vm0 = vmand %vm2402_vm13, %vm826_vm15 }
 0x1ad   :  { %v890_v42 = vsel %vm842_vm0, %v1281_v38, 0.0  ;;  %vm2759_vm9 = vmmov %vm2756_vm7  ;;  %v1285_v62 = vpop.eup %1284 }
 0x1ae   :  { %901 = vadd.xlane.f32.xlu0 %v885_v59  ;;  %vm2433_vm4 = vmand %vm2315_vm2, %vm2759_vm9  ;;  %v1287_v27 = vpop.eup %1286 }
 0x1af   :  { %v2761_v60 = vsel %vm2433_vm4, 4294967295, %v2760_v60  ;;  %vm2441_vm7 = vmxor %vm2762_vm10, %vm2732_vm5  ;;  %v1289_v51 = vpop.eup %1288 }
 0x1b0   :  { %903 = vadd.xlane.f32.xlu1 %v886_v48  ;;  %vm843_vm15 = vmand %vm2433_vm4, %vm827_vm3  ;;  %v1291_v32 = vpop.eup %1290  ;;  %vm2778_vm4 = vcmp.lt.s32.totalorder %v1651_v18, 4 }
 0x1b1   :  { %v891_v21 = vsel %vm843_vm15, %v1283_v4, 0.0  ;;  %vm2765_vm0 = vmmov %vm2759_vm9  ;;  %vm829_vm9 = vcmp.gt.f32.partialorder %v2236_v3, 0.0 }
 0x1b2   :  { %905 = vadd.xlane.f32.xlu0 %v887_v50  ;;  %vm2451_vm2 = vmand %vm2344_vm11, %vm2765_vm0  ;;  %vm830_vm11 = vcmp.gt.f32.partialorder %v2254_v56, 0.0 }
 0x1b3   :  { %vm844_vm10 = vmand %vm2421_vm14, %vm828_vm6 }
 0x1b4   :  { %907 = vadd.xlane.f32.xlu1 %v888_v55  ;;  %v892_v7 = vsel %vm844_vm10, %v1285_v62, 0.0  ;;  %vm2768_vm13 = vmmov %vm2765_vm0  ;;  %v1293_v30 = vpop.eup %1292 }
 0x1b5   :  { %vm2462_vm3 = vmand %vm2367_vm12, %vm2768_vm13  ;;  %vm831_vm12 = vcmp.gt.f32.partialorder %v2281_v58, 0.0 }
 0x1b6   :  { %909 = vadd.xlane.f32.xlu0 %v889_v2  ;;  %vm845_vm15 = vmand %vm2451_vm2, %vm829_vm9  ;;  %v1295_v59 = vpop.eup %1294 }
 0x1b7   :  { %v893_v3 = vsel %vm845_vm15, %v1287_v27, 0.0  ;;  %vm2771_vm6 = vmmov %vm2765_vm0 }
 0x1b8   :  { %911 = vadd.xlane.f32.xlu1 %v890_v42  ;;  %vm2473_vm0 = vmand %vm2389_vm1, %vm2771_vm6  ;;  %vm832_vm1 = vcmp.gt.f32.partialorder %v2309_v1, 0.0 }
 0x1b9   :  { %vm846_vm13 = vmand %vm2462_vm3, %vm830_vm11  ;;  %vm2777_vm11 = vcmp.eq.s32.totalorder %v1651_v18, %v1926_v49  ;;  %v1297_v49 = vpop.eup %1296 }
 0x1ba   :  { %913 = vadd.xlane.f32.xlu0 %v891_v21  ;;  %v894_v56 = vsel %vm846_vm13, %v1289_v51, 0.0  ;;  %vm2774_vm10 = vmmov %vm2771_vm6  ;;  %vm833_vm13 = vcmp.gt.f32.partialorder %v2328_v19, 0.0 }
 0x1bb   :  { %vm2484_vm9 = vmand %vm2411_vm8, %vm2774_vm10  ;;  %vm834_vm10 = vcmp.gt.f32.partialorder %v2351_v44, 0.0 }
 0x1bc   :  { %915 = vadd.xlane.f32.xlu1 %v892_v7  ;;  %vm847_vm15 = vmand %vm2473_vm0, %vm831_vm12 }
 0x1bd   :  { %vm626_vm6 = vmxor %vm2777_vm11, %vm2732_vm5  ;;  %v895_v58 = vsel %vm847_vm15, %v1291_v32, 0.0 }
 0x1be   :  { %917 = vadd.xlane.f32.xlu0 %v893_v3  ;;  %vm848_vm8 = vmand %vm2484_vm9, %vm832_vm1 }
 0x1bf   :  { %v896_v23 = vsel %vm848_vm8, %v1293_v30, 0.0  ;;  %vm2503_vm12 = vmand %vm2441_vm7, %vm2778_vm4  ;;  %vm2784_vm7 = vnez %v2720_v43 }
 0x1c0   :  { %919 = vadd.xlane.f32.xlu1 %v894_v56  ;;  %vm849_vm5 = vmand %vm2503_vm12, %vm833_vm13 }
 0x1c1   :  { %vm2781_vm15 = vmmov %vm2778_vm4  ;;  %v897_v17 = vsel %vm849_vm5, %v1295_v59, 0.0 }
 0x1c2   :  { %921 = vadd.xlane.f32.xlu0 %v895_v58  ;;  %vm2511_vm1 = vmand %vm626_vm6, %vm2781_vm15 }
 0x1c3   :  { %vm850_vm11 = vmand %vm2511_vm1, %vm834_vm10 }
 0x1c4   :  { %923 = vadd.xlane.f32.xlu1 %v896_v23  ;;  %v898_v39 = vsel %vm850_vm11, %v1297_v49, 0.0 }
 0x1c6   :  { %925 = vadd.xlane.f32.xlu0 %v897_v17 }
 0x1c8   :  { %927 = vadd.xlane.f32.xlu1 %v898_v39 }
 0x211   :  { %v568_v44 = vpop.xlane.xlu0 %567 }
 0x212   :  { %v598_v48 = vsub.f32 %v2106_v37, %v568_v44 }
 0x214   :  { %v679_v36 = vmul.f32 1.442695, %v598_v48  ;;  %vm646_vm4 = vcmp.gt.f32.partialorder %v598_v48, 0.0 }
 0x215   :  { %v584_v61 = vpop.xlane.xlu1 %583  ;;  %vm662_vm6 = vmand %vm2784_vm7, %vm646_vm4  ;;  %vm2786_vm7 = vnez %v2738_v28 }
 0x216   :  { %1298 = vpow2.f32 %v679_v36  ;;  %v606_v14 = vsub.f32 %v2112_v25, %v584_v61 }
 0x217   :  { %v582_v18 = vpop.xlane.xlu0 %581 }
 0x218   :  { %v695_v50 = vmul.f32 1.442695, %v606_v14  ;;  %v605_v41 = vsub.f32 %v2118_v31, %v582_v18  ;;  %vm654_vm13 = vcmp.gt.f32.partialorder %v606_v14, 0.0 }
 0x219   :  { %v566_v63 = vpop.xlane.xlu1 %565  ;;  %vm670_vm8 = vmand %vm2462_vm3, %vm654_vm13  ;;  %vm2785_vm3 = vnez %v2716_v5 }
 0x21a   :  { %1300 = vpow2.f32 %v695_v50  ;;  %v597_v16 = vsub.f32 %v2110_v13, %v566_v63  ;;  %v693_v55 = vmul.f32 1.442695, %v605_v41  ;;  %vm653_vm11 = vcmp.gt.f32.partialorder %v605_v41, 0.0 }
 0x21b   :  { %v570_v38 = vpop.xlane.xlu0 %569  ;;  %vm669_vm4 = vmand %vm2451_vm2, %vm653_vm11  ;;  %vm2787_vm2 = vnez %v2731_v33  ;;  %vm2788_vm11 = vnez %v2752_v22 }
 0x21c   :  { %v677_v53 = vmul.f32 1.442695, %v597_v16  ;;  %v2522_v2 = vsub.f32 %v2120_v10, %v570_v38  ;;  %vm645_vm10 = vcmp.gt.f32.partialorder %v597_v16, 0.0 }
 0x21d   :  { %v572_v37 = vpop.xlane.xlu1 %571  ;;  %vm661_vm5 = vmand %vm2785_vm3, %vm645_vm10 }
 0x21e   :  { %1302 = vpow2.f32 %v677_v53  ;;  %v600_v4 = vsub.f32 %v2114_v57, %v572_v37  ;;  %v681_v25 = vmul.f32 1.442695, %v2522_v2 }
 0x21f   :  { %1304 = vpow2.f32 %v693_v55  ;;  %v586_v42 = vpop.xlane.xlu0 %585 }
 0x220   :  { %v683_v62 = vmul.f32 1.442695, %v600_v4  ;;  %v2527_v31 = vsub.f32 %v2133_v20, %v586_v42  ;;  %vm648_vm15 = vcmp.gt.f32.partialorder %v600_v4, 0.0 }
 0x221   :  { %v588_v13 = vpop.xlane.xlu1 %587 }
 0x222   :  { %1306 = vpow2.f32 %v683_v62  ;;  %v608_v29 = vsub.f32 %v2123_v15, %v588_v13  ;;  %v697_v10 = vmul.f32 1.442695, %v2527_v31 }
 0x223   :  { %v1299_v21 = vpop.eup %1298  ;;  %1308 = vpow2.f32 %v681_v25  ;;  %v574_v57 = vpop.xlane.xlu0 %573 }
 0x224   :  { %v699_v27 = vmul.f32 1.442695, %v608_v29  ;;  %v710_v7 = vsel %vm662_vm6, %v1299_v21, 0.0  ;;  %v2534_v51 = vsub.f32 %v2135_v26, %v574_v57  ;;  %vm664_vm6 = vmand %vm2786_vm7, %vm648_vm15  ;;  %vm656_vm13 = vcmp.gt.f32.partialorder %v608_v29, 0.0  ;;  %v2791_v29 = vld [vmem:[#allocation2_spill] sm:$0xff] }
 0x225   :  { %v576_v20 = vpop.xlane.xlu1 %575  ;;  %727 = vadd.xlane.f32.xlu1 %v710_v7  ;;  %vm672_vm3 = vmand %vm2484_vm9, %vm656_vm13  ;;  %vm655_vm15 = vcmp.gt.f32.partialorder %v2527_v31, 0.0 }
 0x226   :  { %1310 = vpow2.f32 %v699_v27  ;;  %v2537_v3 = vsub.f32 %v2129_v35, %v576_v20  ;;  %v685_v56 = vmul.f32 1.442695, %v2534_v51  ;;  %vm671_vm9 = vmand %vm2473_vm0, %vm655_vm15  ;;  %vm2789_vm0 = vnez %v2745_v52 }
 0x227   :  { %v1301_v15 = vpop.eup %1300  ;;  %1312 = vpow2.f32 %v697_v10  ;;  %v590_v43 = vpop.xlane.xlu0 %589  ;;  %v2793_v10 = vld [vmem:[#allocation3_spill] sm:$0xff] }
 0x228   :  { %v687_v32 = vmul.f32 1.442695, %v2537_v3  ;;  %v718_v26 = vsel %vm670_vm8, %v1301_v15, 0.0  ;;  %v2544_v30 = vsub.f32 %v2158_v47, %v590_v43  ;;  %vm647_vm8 = vcmp.gt.f32.partialorder %v2522_v2, 0.0 }
 0x229   :  { %v592_v58 = vpop.xlane.xlu1 %591  ;;  %743 = vadd.xlane.f32.xlu1 %v718_v26  ;;  %vm663_vm10 = vmand %vm2787_vm2, %vm647_vm8 }
 0x22a   :  { %1314 = vpow2.f32 %v687_v32  ;;  %v2547_v35 = vsub.f32 %v2141_v12, %v592_v58  ;;  %v701_v9 = vmul.f32 1.442695, %v2544_v30  ;;  %vm657_vm2 = vcmp.gt.f32.partialorder %v2544_v30, 0.0 }
 0x22b   :  { %v1303_v59 = vpop.eup %1302  ;;  %v578_v23 = vpop.xlane.xlu0 %577  ;;  %1316 = vpow2.f32 %v685_v56 }
 0x22c   :  { %v1305_v49 = vpop.eup %1304  ;;  %v703_v47 = vmul.f32 1.442695, %v2547_v35  ;;  %v709_v17 = vsel %vm661_vm5, %v1303_v59, 0.0  ;;  %v2554_v39 = vsub.f32 %v2164_v0, %v578_v23  ;;  %vm650_vm5 = vcmp.gt.f32.partialorder %v2537_v3, 0.0 }
 0x22d   :  { %v580_v44 = vpop.xlane.xlu1 %579  ;;  %725 = vadd.xlane.f32.xlu0 %v709_v17  ;;  %v717_v48 = vsel %vm669_vm4, %v1305_v49, 0.0  ;;  %vm666_vm4 = vmand %vm2788_vm11, %vm650_vm5  ;;  %vm658_vm7 = vcmp.gt.f32.partialorder %v2547_v35, 0.0 }
 0x22e   :  { %1318 = vpow2.f32 %v703_v47  ;;  %v2557_v12 = vsub.f32 %v2150_v34, %v580_v44  ;;  %v689_v14 = vmul.f32 1.442695, %v2554_v39  ;;  %vm674_vm8 = vmand %vm2511_vm1, %vm658_vm7  ;;  %vm651_vm15 = vcmp.gt.f32.partialorder %v2554_v39, 0.0 }
 0x22f   :  { %v1307_v5 = vpop.eup %1306  ;;  %1320 = vpow2.f32 %v701_v9  ;;  %v594_v36 = vpop.xlane.xlu0 %593 }
 0x230   :  { %v1309_v0 = vpop.eup %1308  ;;  %v691_v61 = vmul.f32 1.442695, %v2557_v12  ;;  %v712_v34 = vsel %vm664_vm6, %v1307_v5, 0.0  ;;  %v2567_v18 = vsub.f32 %v2187_v24, %v594_v36  ;;  %vm649_vm6 = vcmp.gt.f32.partialorder %v2534_v51, 0.0 }
 0x231   :  { %v596_v11 = vpop.xlane.xlu1 %595  ;;  %731 = vadd.xlane.f32.xlu1 %v712_v34  ;;  %741 = vadd.xlane.f32.xlu0 %v717_v48  ;;  %v711_v41 = vsel %vm663_vm10, %v1309_v0, 0.0  ;;  %vm665_vm13 = vmand %vm2789_vm0, %vm649_vm6  ;;  %vm652_vm10 = vcmp.gt.f32.partialorder %v2557_v12, 0.0 }
 0x232   :  { %1322 = vpow2.f32 %v691_v61  ;;  %v612_v28 = vsub.f32 %v2171_v6, %v596_v11  ;;  %v705_v55 = vmul.f32 1.442695, %v2567_v18  ;;  %vm668_vm5 = vmand %vm2421_vm14, %vm652_vm10  ;;  %vm2794_vm14 = vnez %v2793_v10 }
 0x233   :  { %v1311_v50 = vpop.eup %1310  ;;  %v802_v63 = vpop.xlane.xlu0 %801  ;;  %1324 = vpow2.f32 %v689_v14 }
 0x234   :  { %v1313_v24 = vpop.eup %1312  ;;  %v707_v16 = vmul.f32 1.442695, %v612_v28  ;;  %v720_v38 = vsel %vm672_vm3, %v1311_v50, 0.0  ;;  %v819_v33 = vsub.f32 %v2241_v54, %v802_v63  ;;  %vm673_vm3 = vmand %vm2503_vm12, %vm657_vm2  ;;  %vm660_vm1 = vcmp.gt.f32.partialorder %v612_v28, 0.0 }
 0x235   :  { %v804_v6 = vpop.xlane.xlu1 %803  ;;  %747 = vadd.xlane.f32.xlu1 %v720_v38  ;;  %729 = vadd.xlane.f32.xlu0 %v711_v41  ;;  %v719_v2 = vsel %vm671_vm9, %v1313_v24, 0.0  ;;  %vm2790_vm9 = vnez %v2761_v60  ;;  %vm659_vm12 = vcmp.gt.f32.partialorder %v2567_v18, 0.0 }
 0x236   :  { %1326 = vpow2.f32 %v707_v16  ;;  %v820_v8 = vsub.f32 %v2259_v45, %v804_v6  ;;  %v881_v54 = vmul.f32 1.442695, %v819_v33  ;;  %vm667_vm11 = vmand %vm2790_vm9, %vm651_vm15 }
 0x237   :  { %v1315_v53 = vpop.eup %1314  ;;  %1328 = vpow2.f32 %v705_v55  ;;  %vm675_vm0 = vmand %vm2794_vm14, %vm659_vm12  ;;  %v902_v15 = vpop.xlane.xlu0 %901 }
 0x238   :  { %v883_v37 = vmul.f32 1.442695, %v820_v8  ;;  %v714_v4 = vsel %vm666_vm4, %v1315_v53, 0.0  ;;  %v1317_v25 = vpop.eup %1316  ;;  %vm2792_vm4 = vnez %v2791_v29  ;;  %vm836_vm6 = vcmp.gt.f32.partialorder %v820_v8, 0.0 }
 0x239   :  { %735 = vadd.xlane.f32.xlu1 %v714_v4  ;;  %745 = vadd.xlane.f32.xlu0 %v719_v2  ;;  %v713_v42 = vsel %vm665_vm13, %v1317_v25, 0.0  ;;  %vm676_vm7 = vmand %vm2792_vm4, %vm660_vm1  ;;  %v904_v20 = vpop.xlane.xlu1 %903  ;;  %v933_v44 = vadd.f32 1.0, %v902_v15 }
 0x23a   :  { %1330 = vpow2.f32 %v883_v37  ;;  %vm852_vm13 = vmand %vm2792_vm4, %vm836_vm6  ;;  %v934_v9 = vadd.f32 1.0, %v904_v20 }
 0x23b   :  { %v1319_v45 = vpop.eup %1318  ;;  %1332 = vpow2.f32 %v881_v54  ;;  %v906_v32 = vpop.xlane.xlu0 %905 }
 0x23c   :  { %v1321_v22 = vpop.eup %1320  ;;  %v722_v40 = vsel %vm674_vm8, %v1319_v45, 0.0  ;;  %vm835_vm8 = vcmp.gt.f32.partialorder %v819_v33, 0.0  ;;  %1334 = vlog2.f32 %v934_v9  ;;  %v935_v36 = vadd.f32 1.0, %v906_v32 }
 0x23d   :  { %751 = vadd.xlane.f32.xlu1 %v722_v40  ;;  %733 = vadd.xlane.f32.xlu0 %v713_v42  ;;  %v721_v19 = vsel %vm673_vm3, %v1321_v22, 0.0  ;;  %vm851_vm2 = vmand %vm2794_vm14, %vm835_vm8  ;;  %v908_v3 = vpop.xlane.xlu1 %907 }
 0x23e   :  { %v936_v0 = vadd.f32 1.0, %v908_v3 }
 0x23f   :  { %v1323_v62 = vpop.eup %1322  ;;  %v910_v26 = vpop.xlane.xlu0 %909 }
 0x240   :  { %v716_v52 = vsel %vm668_vm5, %v1323_v62, 0.0  ;;  %v1325_v31 = vpop.eup %1324  ;;  %v937_v14 = vadd.f32 1.0, %v910_v26 }
 0x241   :  { %739 = vadd.xlane.f32.xlu1 %v716_v52  ;;  %749 = vadd.xlane.f32.xlu0 %v721_v19  ;;  %v715_v1 = vsel %vm667_vm11, %v1325_v31, 0.0  ;;  %v912_v43 = vpop.xlane.xlu1 %911 }
 0x242   :  { %v938_v16 = vadd.f32 1.0, %v912_v43 }
 0x243   :  { %v1327_v13 = vpop.eup %1326  ;;  %v2611_v58 = vpop.xlane.xlu0 %913 }
 0x244   :  { %v724_v46 = vsel %vm676_vm7, %v1327_v13, 0.0  ;;  %v1329_v21 = vpop.eup %1328 }
 0x245   :  { %755 = vadd.xlane.f32.xlu1 %v724_v46  ;;  %737 = vadd.xlane.f32.xlu0 %v715_v1  ;;  %v723_v27 = vsel %vm675_vm0, %v1329_v21, 0.0  ;;  %v2609_v56 = vpop.xlane.xlu1 %915 }
 0x246   :  { %v940_v13 = vadd.f32 1.0, %v2609_v56 }
 0x247   :  { %v1331_v57 = vpop.eup %1330  ;;  %v918_v59 = vpop.xlane.xlu0 %917 }
 0x248   :  { %v900_v60 = vsel %vm852_vm13, %v1331_v57, 0.0  ;;  %v1333_v7 = vpop.eup %1332  ;;  %v941_v18 = vadd.f32 1.0, %v918_v59 }
 0x249   :  { %931 = vadd.xlane.f32.xlu1 %v900_v60  ;;  %753 = vadd.xlane.f32.xlu0 %v723_v27  ;;  %v899_v51 = vsel %vm851_vm2, %v1333_v7, 0.0  ;;  %v920_v30 = vpop.xlane.xlu1 %919  ;;  %v1335_v50 = vpop.eup %1334 }
 0x24a   :  { %v942_v17 = vadd.f32 1.0, %v920_v30  ;;  %v952_v38 = vmul.f32 0.6931472, %v1335_v50 }
 0x24b   :  { %v922_v49 = vpop.xlane.xlu0 %921 }
 0x24c   :  { %v943_v54 = vadd.f32 1.0, %v922_v49 }
 0x24d   :  { %929 = vadd.xlane.f32.xlu0 %v899_v51  ;;  %v924_v35 = vpop.xlane.xlu1 %923 }
 0x24e   :  { %v944_v41 = vadd.f32 1.0, %v924_v35 }
 0x24f   :  { %v2613_v12 = vpop.xlane.xlu0 %925 }
 0x250   :  { %v945_v3 = vadd.f32 1.0, %v2613_v12 }
 0x251   :  { %v928_v23 = vpop.xlane.xlu1 %927 }
 0x252   :  { %v946_v45 = vadd.f32 1.0, %v928_v23 }
 0x2ae   :  { %v728_v47 = vpop.xlane.xlu1 %727 }
 0x2af   :  { %v982_v39 = vadd.f32 1.0, %v728_v47  ;;  %v939_v47 = vadd.f32 1.0, %v2611_v58 }
 0x2b1   :  { %1336 = vlog2.f32 %v982_v39 }
 0x2b2   :  { %v744_v5 = vpop.xlane.xlu1 %743  ;;  %1338 = vlog2.f32 %v942_v17 }
 0x2b3   :  { %v990_v48 = vadd.f32 1.0, %v744_v5 }
 0x2b5   :  { %1340 = vlog2.f32 %v990_v48 }
 0x2b6   :  { %1342 = vlog2.f32 %v933_v44  ;;  %v726_v61 = vpop.xlane.xlu0 %725 }
 0x2b7   :  { %v981_v34 = vadd.f32 1.0, %v726_v61  ;;  %1344 = vlog2.f32 %v935_v36 }
 0x2b9   :  { %1346 = vlog2.f32 %v981_v34 }
 0x2ba   :  { %1348 = vlog2.f32 %v936_v0  ;;  %v732_v11 = vpop.xlane.xlu1 %731  ;;  %v742_v28 = vpop.xlane.xlu0 %741 }
 0x2bb   :  { %1350 = vlog2.f32 %v937_v14  ;;  %v984_v63 = vadd.f32 1.0, %v732_v11  ;;  %v989_v24 = vadd.f32 1.0, %v742_v28 }
 0x2bc   :  { %1352 = vlog2.f32 %v941_v18 }
 0x2bd   :  { %1354 = vlog2.f32 %v984_v63 }
 0x2be   :  { %v1337_v55 = vpop.eup %1336  ;;  %1356 = vlog2.f32 %v989_v24  ;;  %v748_v6 = vpop.xlane.xlu1 %747 }
 0x2bf   :  { %v730_v33 = vpop.xlane.xlu0 %729  ;;  %1358 = vlog2.f32 %v944_v41  ;;  %v1000_v8 = vmul.f32 0.6931472, %v1337_v55  ;;  %v992_v53 = vadd.f32 1.0, %v748_v6  ;;  %v1339_v37 = vpop.eup %1338 }
 0x2c0   :  { %v983_v2 = vadd.f32 1.0, %v730_v33  ;;  %1360 = vlog2.f32 %v938_v16  ;;  %v968_v62 = vmul.f32 0.6931472, %v1339_v37 }
 0x2c1   :  { %v1030_v4 = vadd.f32 %v1000_v8, %v952_v38  ;;  %1362 = vlog2.f32 %v992_v53 }
 0x2c2   :  { %v1341_v25 = vpop.eup %1340  ;;  %1364 = vlog2.f32 %v983_v2  ;;  %v736_v22 = vpop.xlane.xlu1 %735 }
 0x2c3   :  { %v746_v40 = vpop.xlane.xlu0 %745  ;;  %v1343_v42 = vpop.eup %1342  ;;  %1046 = vst [vmem:[%s2673_s4 + $0x8] sm:$0xff] %v1030_v4  ;;  %v1016_v52 = vmul.f32 0.6931472, %v1341_v25  ;;  %v986_v19 = vadd.f32 1.0, %v736_v22  ;;  %1366 = vlog2.f32 %v943_v54 }
 0x2c4   :  { %v991_v31 = vadd.f32 1.0, %v746_v40  ;;  %v1345_v29 = vpop.eup %1344  ;;  %v950_v21 = vmul.f32 0.6931472, %v1343_v42 }
 0x2c5   :  { %v1038_v46 = vadd.f32 %v1016_v52, %v968_v62  ;;  %1368 = vlog2.f32 %v986_v19  ;;  %v954_v11 = vmul.f32 0.6931472, %v1345_v29 }
 0x2c6   :  { %v1347_v1 = vpop.eup %1346  ;;  %1370 = vlog2.f32 %v991_v31  ;;  %v752_v10 = vpop.xlane.xlu1 %751 }
 0x2c7   :  { %v734_v57 = vpop.xlane.xlu0 %733  ;;  %v1349_v60 = vpop.eup %1348  ;;  %1372 = vlog2.f32 %v946_v45  ;;  %1054 = vst [vmem:[%s2673_s4 + $0x48] sm:$0xff] %v1038_v46  ;;  %v998_v27 = vmul.f32 0.6931472, %v1347_v1  ;;  %v994_v7 = vadd.f32 1.0, %v752_v10 }
 0x2c8   :  { %v985_v51 = vadd.f32 1.0, %v734_v57  ;;  %v2622_v20 = vpop.eup %1350  ;;  %1374 = vlog2.f32 %v940_v13  ;;  %v956_v35 = vmul.f32 0.6931472, %v1349_v60 }
 0x2c9   :  { %v1353_v15 = vpop.eup %1352  ;;  %v1029_v43 = vadd.f32 %v998_v27, %v950_v21  ;;  %1376 = vlog2.f32 %v994_v7  ;;  %v958_v31 = vmul.f32 0.6931472, %v2622_v20 }
 0x2ca   :  { %v1355_v32 = vpop.eup %1354  ;;  %1378 = vlog2.f32 %v985_v51  ;;  %v740_v56 = vpop.xlane.xlu1 %739  ;;  %v966_v17 = vmul.f32 0.6931472, %v1353_v15 }
 0x2cb   :  { %v750_v26 = vpop.xlane.xlu0 %749  ;;  %v1357_v30 = vpop.eup %1356  ;;  %1045 = vst [vmem:[%s2673_s4] sm:$0xff] %v1029_v43  ;;  %v1004_v59 = vmul.f32 0.6931472, %v1355_v32  ;;  %v988_v9 = vadd.f32 1.0, %v740_v56  ;;  %1380 = vlog2.f32 %v945_v3 }
 0x2cc   :  { %v993_v23 = vadd.f32 1.0, %v750_v26  ;;  %v1359_v49 = vpop.eup %1358  ;;  %v1014_v39 = vmul.f32 0.6931472, %v1357_v30 }
 0x2cd   :  { %v1361_v44 = vpop.eup %1360  ;;  %v1032_v12 = vadd.f32 %v1004_v59, %v956_v35  ;;  %1382 = vlog2.f32 %v988_v9  ;;  %v972_v14 = vmul.f32 0.6931472, %v1359_v49 }
 0x2ce   :  { %v1363_v5 = vpop.eup %1362  ;;  %v1037_v48 = vadd.f32 %v1014_v39, %v966_v17  ;;  %1384 = vlog2.f32 %v993_v23  ;;  %v756_v36 = vpop.xlane.xlu1 %755  ;;  %v960_v24 = vmul.f32 0.6931472, %v1361_v44 }
 0x2cf   :  { %v738_v0 = vpop.xlane.xlu0 %737  ;;  %v1365_v61 = vpop.eup %1364  ;;  %1048 = vst [vmem:[%s2673_s4 + $0x18] sm:$0xff] %v1032_v12  ;;  %v1020_v34 = vmul.f32 0.6931472, %v1363_v5  ;;  %v996_v18 = vadd.f32 1.0, %v756_v36  ;;  %1386 = vlog2.f32 %v939_v47 }
 0x2d0   :  { %v987_v58 = vadd.f32 1.0, %v738_v0  ;;  %1053 = vst [vmem:[%s2673_s4 + $0x40] sm:$0xff] %v1037_v48  ;;  %v1002_v28 = vmul.f32 0.6931472, %v1365_v61  ;;  %v1367_v50 = vpop.eup %1366 }
 0x2d1   :  { %v1040_v41 = vadd.f32 %v1020_v34, %v972_v14  ;;  %v970_v37 = vmul.f32 0.6931472, %v1367_v50 }
 0x2d2   :  { %v1369_v63 = vpop.eup %1368  ;;  %v1031_v16 = vadd.f32 %v1002_v28, %v954_v11  ;;  %1388 = vlog2.f32 %v987_v58  ;;  %v932_v55 = vpop.xlane.xlu1 %931 }
 0x2d3   :  { %v754_v38 = vpop.xlane.xlu0 %753  ;;  %v1371_v6 = vpop.eup %1370  ;;  %1056 = vst [vmem:[%s2673_s4 + $0x58] sm:$0xff] %v1040_v41  ;;  %v1008_v33 = vmul.f32 0.6931472, %v1369_v63  ;;  %1390 = vlog2.f32 %v996_v18  ;;  %v948_v8 = vadd.f32 1.0, %v932_v55 }
 0x2d4   :  { %v995_v53 = vadd.f32 1.0, %v754_v38  ;;  %v1373_v2 = vpop.eup %1372  ;;  %1047 = vst [vmem:[%s2673_s4 + $0x10] sm:$0xff] %v1031_v16  ;;  %v1018_v54 = vmul.f32 0.6931472, %v1371_v6 }
 0x2d5   :  { %v1375_v4 = vpop.eup %1374  ;;  %v1034_v25 = vadd.f32 %v1008_v33, %v960_v24  ;;  %1392 = vlog2.f32 %v948_v8  ;;  %v976_v62 = vmul.f32 0.6931472, %v1373_v2 }
 0x2d6   :  { %v1377_v45 = vpop.eup %1376  ;;  %v1039_v22 = vadd.f32 %v1018_v54, %v970_v37  ;;  %1394 = vlog2.f32 %v995_v53  ;;  %v964_v57 = vmul.f32 0.6931472, %v1375_v4 }
 0x2d7   :  { %v930_v40 = vpop.xlane.xlu0 %929  ;;  %v1379_v42 = vpop.eup %1378  ;;  %1050 = vst [vmem:[%s2673_s4 + $0x28] sm:$0xff] %v1034_v25  ;;  %v1024_v52 = vmul.f32 0.6931472, %v1377_v45 }
 0x2d8   :  { %v947_v19 = vadd.f32 1.0, %v930_v40  ;;  %1055 = vst [vmem:[%s2673_s4 + $0x50] sm:$0xff] %v1039_v22  ;;  %v1006_v13 = vmul.f32 0.6931472, %v1379_v42  ;;  %v1381_v29 = vpop.eup %1380 }
 0x2d9   :  { %v1042_v46 = vadd.f32 %v1024_v52, %v976_v62  ;;  %v974_v27 = vmul.f32 0.6931472, %v1381_v29 }
 0x2da   :  { %1396 = vlog2.f32 %v947_v19  ;;  %v1383_v1 = vpop.eup %1382  ;;  %v1033_v21 = vadd.f32 %v1006_v13, %v958_v31 }
 0x2db   :  { %v1385_v10 = vpop.eup %1384  ;;  %1058 = vst [vmem:[%s2673_s4 + $0x68] sm:$0xff] %v1042_v46  ;;  %v1012_v60 = vmul.f32 0.6931472, %v1383_v1 }
 0x2dc   :  { %1049 = vst [vmem:[%s2673_s4 + $0x20] sm:$0xff] %v1033_v21  ;;  %v1022_v7 = vmul.f32 0.6931472, %v1385_v10  ;;  %v1387_v51 = vpop.eup %1386 }
 0x2dd   :  { %v1036_v20 = vadd.f32 %v1012_v60, %v964_v57  ;;  %v962_v32 = vmul.f32 0.6931472, %v1387_v51 }
 0x2de   :  { %v1041_v3 = vadd.f32 %v1022_v7, %v974_v27 }
 0x2df   :  { %v1389_v15 = vpop.eup %1388  ;;  %1052 = vst [vmem:[%s2673_s4 + $0x38] sm:$0xff] %v1036_v20 }
 0x2e0   :  { %v1391_v43 = vpop.eup %1390  ;;  %1057 = vst [vmem:[%s2673_s4 + $0x60] sm:$0xff] %v1041_v3  ;;  %v1010_v56 = vmul.f32 0.6931472, %v1389_v15 }
 0x2e1   :  { %v1028_v35 = vmul.f32 0.6931472, %v1391_v43 }
 0x2e2   :  { %v1393_v26 = vpop.eup %1392  ;;  %v1035_v30 = vadd.f32 %v1010_v56, %v962_v32 }
 0x2e3   :  { %v980_v59 = vmul.f32 0.6931472, %v1393_v26  ;;  %v1395_v9 = vpop.eup %1394 }
 0x2e4   :  { %1051 = vst [vmem:[%s2673_s4 + $0x30] sm:$0xff] %v1035_v30  ;;  %v1026_v47 = vmul.f32 0.6931472, %v1395_v9 }
 0x2e5   :  { %v1044_v23 = vadd.f32 %v1028_v35, %v980_v59 }
 0x2e7   :  { %v1397_v49 = vpop.eup %1396  ;;  %1060 = vst [vmem:[%s2673_s4 + $0x78] sm:$0xff] %v1044_v23 }
 0x2e8   :  { %v978_v17 = vmul.f32 0.6931472, %v1397_v49 }
 0x2ea   :  { %v1043_v39 = vadd.f32 %v1026_v47, %v978_v17 }
 0x2ec   :  { %1059 = vst [vmem:[%s2673_s4 + $0x70] sm:$0xff] %v1043_v39 }

</bundles_post_ra>
